<compile_context>
chip_gen: v7x
topology: tpu7x:2x2x1
jax: 0.10.0
libtpu: 0.0.40
codegen_flags: <defaults>
</compile_context>

<pallas_src>
import math

import numpy as np
import jax
import jax.numpy as jnp
from jax.experimental import pallas as pl
from jax.experimental.pallas import tpu as pltpu

# ----------------------------- model hyper-params ---------------------------------
D_MODEL = 32
N_LAYERS = 2
HEADS = 4
MAX_SEQ = 8
D_FF = 64
NECK = 16
BATCH = 2
OUT_DIM = 2464           # fixed by Seq2Vec in the reference module
OUT_PAD = 2560           # 20 x 128 lanes (pad so every MXU / store tile is full-width)
EPS = 1e-6


def _vmem():
    return pl.BlockSpec(memory_space=pltpu.MemorySpace.VMEM)


def _norm(x, alpha, bias, eps=EPS):
    """PyTorch `Norm`: alpha*(x-mean)/(std+eps)+bias, std with Bessel correction (ddof=1)."""
    d = x.shape[-1]
    mean = jnp.mean(x, axis=-1, keepdims=True)
    var = jnp.sum((x - mean) ** 2, axis=-1, keepdims=True) / float(d - 1)
    std = jnp.sqrt(var)
    return alpha * (x - mean) / (std + eps) + bias


# ----------------------------- fused Pallas kernel ---------------------------------
def _fused_kernel(src_ref, ew_ref, ebpe_ref,
                  a1_ref, g1_ref, wqkv_ref, bqkv_ref, wo_ref, bo_ref,
                  a2_ref, g2_ref, w1_ref, c1_ref, w2_ref, c2_ref,
                  na_ref, ng_ref, outb_ref, outw_hbm_ref,
                  out_ref, sc_ref,
                  outw_vmem, outw_sem):
    B, S, D, H = BATCH, MAX_SEQ, D_MODEL, HEADS
    d_k = D // H

    # Prefetch the big bf16 Seq2Vec weight HBM->VMEM behind the encoder compute.
    outw_cp = pltpu.make_async_copy(outw_hbm_ref, outw_vmem, outw_sem)
    outw_cp.start()

    # ---- Neck2Seq + PositionalEncoder: one (B, neck) @ (neck, S*D) matmul ----
    xf = jnp.dot(src_ref[...], ew_ref[...],
                 preferred_element_type=jnp.float32) + ebpe_ref[...]        # (B, S*D)
    x = xf.reshape(B, S, D)

    # load the (tiny) per-layer parameter stacks once
    a1 = a1_ref[...]; g1 = g1_ref[...]; a2 = a2_ref[...]; g2 = g2_ref[...]
    wqkv = wqkv_ref[...]; bqkv = bqkv_ref[...]
    wo = wo_ref[...]; bo = bo_ref[...]
    w1 = w1_ref[...]; c1 = c1_ref[...]
    w2 = w2_ref[...]; c2 = c2_ref[...]

    inv_sqrt_dk = 1.0 / math.sqrt(d_k)
    for li in range(N_LAYERS):
        # ---------------- self-attention sub-layer ----------------
        x2 = _norm(x, a1[li], g1[li])
        x2f = x2.reshape(B * S, D)
        # fused QKV projection: single (B*S, D) @ (D, 3D) matmul
        qkv = jnp.dot(x2f, wqkv[li], preferred_element_type=jnp.float32) + bqkv[li]

        def head(mat_off, h):
            lo = mat_off + h * d_k
            return qkv[:, lo:lo + d_k].reshape(B, S, d_k)

        # stack heads along the leading (batch) axis: index = h*B + b
        qh = jnp.concatenate([head(0 * D, h) for h in range(H)], axis=0)    # (H*B, S, d_k)
        kh = jnp.concatenate([head(1 * D, h) for h in range(H)], axis=0)
        vh = jnp.concatenate([head(2 * D, h) for h in range(H)], axis=0)

        # TODO(synk): mask=None path only; masked_fill(mask == 0, -1e9) branch not implemented.
        s = jnp.einsum('bqd,bkd->bqk', qh, kh,
                       preferred_element_type=jnp.float32) * inv_sqrt_dk    # (H*B, S, S)
        m = jnp.max(s, axis=-1, keepdims=True)
        e = jnp.exp(s - m)
        p = e * pl.reciprocal(jnp.sum(e, axis=-1, keepdims=True), approx=True)
        sc_ref[li] = p                                                      # (H*B, S, S)
        o = jnp.einsum('bqk,bkd->bqd', p, vh,
                       preferred_element_type=jnp.float32)                  # (H*B, S, d_k)
        concat = jnp.concatenate([o[h * B:(h + 1) * B] for h in range(H)], axis=-1)
        attn = jnp.dot(concat.reshape(B * S, D), wo[li],
                       preferred_element_type=jnp.float32) + bo[li]
        x = x + attn.reshape(B, S, D)                                       # dropout == identity

        # ---------------- FeedForward sub-layer (the `FeedForward` module) ----------------
        x2f = _norm(x, a2[li], g2[li]).reshape(B * S, D)
        h1 = jnp.maximum(jnp.dot(x2f, w1[li],
                                 preferred_element_type=jnp.float32) + c1[li], 0.0)
        ff = jnp.dot(h1, w2[li], preferred_element_type=jnp.float32) + c2[li]
        x = x + ff.reshape(B, S, D)                                         # dropout == identity

    # ---------------- final Norm + Seq2Vec ----------------
    xn = _norm(x, na_ref[...], ng_ref[...])
    flat = xn.reshape(B, S * D).astype(jnp.bfloat16)                        # lane-dense (B, 256)

    outw_cp.wait()
    out_ref[...] = jnp.dot(flat, outw_vmem[...],
                           preferred_element_type=jnp.float32) + outb_ref[...]


# ----------------------------- pallas_call wrapper ---------------------------------
def decoder_forward(src, packed):
    """Fused Pallas implementation of DecoderNeuronGroup.forward(src, mask=None)."""
    out_full, scores_p = pl.pallas_call(
        _fused_kernel,
        out_shape=(jax.ShapeDtypeStruct((BATCH, OUT_PAD), jnp.float32),
                   jax.ShapeDtypeStruct((N_LAYERS, HEADS * BATCH, MAX_SEQ, MAX_SEQ),
                                        jnp.float32)),
        in_specs=[_vmem()] * 18 + [pl.BlockSpec(memory_space=pl.ANY)],
        out_specs=(_vmem(), _vmem()),
        scratch_shapes=[pltpu.VMEM((MAX_SEQ * D_MODEL, OUT_PAD), jnp.bfloat16),
                        pltpu.SemaphoreType.DMA],
    )(src,
      packed['ew'], packed['ebpe'],
      packed['a1'], packed['g1'], packed['wqkv'], packed['bqkv'],
      packed['wo'], packed['bo'], packed['a2'], packed['g2'],
      packed['w1'], packed['c1'], packed['w2'], packed['c2'],
      packed['norm_a'], packed['norm_g'], packed['out_b'], packed['out_w'])

    out = out_full[:, :OUT_DIM]
    scores = scores_p.reshape(N_LAYERS, HEADS, BATCH, MAX_SEQ, MAX_SEQ)
    scores = jnp.transpose(scores, (0, 2, 1, 3, 4))        # -> (L, B, H, S, S)
    return out, [scores[l] for l in range(N_LAYERS)]


# ----------------------------- parameters ------------------------------------------
def make_pe(max_seq_len, d_model):
    position = np.arange(max_seq_len, dtype=np.float32)[:, None]
    div_term = np.exp(np.arange(0, d_model, 2, dtype=np.float32) *
                      (-math.log(10000.0) / d_model))
    pe = np.zeros((max_seq_len, d_model), dtype=np.float32)
    pe[:, 0::2] = np.sin(position * div_term)
    pe[:, 1::2] = np.cos(position * div_term)
    return jnp.asarray(pe)


def init_params(key):
    keys = iter(jax.random.split(key, 128))

    def lin(in_f, out_f):
        bound = 1.0 / math.sqrt(in_f)
        w = jax.random.uniform(next(keys), (in_f, out_f), jnp.float32, -bound, bound)
        b = jax.random.uniform(next(keys), (1, out_f), jnp.float32, -bound, bound)
        return w, b

    ew, eb = [], []
    for _ in range(MAX_SEQ):
        w, b = lin(NECK, D_MODEL)
        ew.append(w)
        eb.append(b[0])
    params = {
        'embed_w': jnp.stack(ew, axis=0),                 # (S, neck, D)
        'embed_b': jnp.stack(eb, axis=0),                 # (S, D)
        'pe': make_pe(MAX_SEQ, D_MODEL),                  # (S, D)
    }
    layers = []
    for _ in range(N_LAYERS):
        wq, bq = lin(D_MODEL, D_MODEL)
        wk, bk = lin(D_MODEL, D_MODEL)
        wv, bv = lin(D_MODEL, D_MODEL)
        wo, bo = lin(D_MODEL, D_MODEL)
        w1, c1 = lin(D_MODEL, D_FF)
        w2, c2 = lin(D_FF, D_MODEL)
        layers.append(dict(
            a1=jnp.ones((1, D_MODEL), jnp.float32), g1=jnp.zeros((1, D_MODEL), jnp.float32),
            a2=jnp.ones((1, D_MODEL), jnp.float32), g2=jnp.zeros((1, D_MODEL), jnp.float32),
            wq=wq, bq=bq, wk=wk, bk=bk, wv=wv, bv=bv, wo=wo, bo=bo,
            w1=w1, c1=c1, w2=w2, c2=c2))
    params['layers'] = layers
    params['norm_a'] = jnp.ones((1, D_MODEL), jnp.float32)
    params['norm_g'] = jnp.zeros((1, D_MODEL), jnp.float32)
    w, b = lin(MAX_SEQ * D_MODEL, OUT_DIM)
    params['out_w'] = w                                   # (S*D, 2464)
    params['out_b'] = b                                   # (1, 2464)
    return params


def pack_params(p):
    """One-time weight preprocessing into kernel-friendly layouts."""
    S, D = MAX_SEQ, D_MODEL
    scale = math.sqrt(D_MODEL)
    layers = p['layers']

    def stack(key):
        return jnp.stack([lp[key] for lp in layers], axis=0)

    out_w_p = jnp.zeros((S * D, OUT_PAD), jnp.float32).at[:, :OUT_DIM].set(p['out_w'])
    out_b_p = jnp.zeros((1, OUT_PAD), jnp.float32).at[:, :OUT_DIM].set(p['out_b'])

    return {
        # Neck2Seq flattened + pre-scaled; PE + bias folded into one addend.
        'ew': jnp.transpose(p['embed_w'], (1, 0, 2)).reshape(NECK, S * D) * scale,
        'ebpe': (p['embed_b'] * scale + p['pe']).reshape(1, S * D),
        'a1': stack('a1'), 'g1': stack('g1'), 'a2': stack('a2'), 'g2': stack('g2'),
        'wqkv': jnp.stack([jnp.concatenate([lp['wq'], lp['wk'], lp['wv']], axis=1)
                           for lp in layers], axis=0),          # (L, D, 3D)
        'bqkv': jnp.stack([jnp.concatenate([lp['bq'], lp['bk'], lp['bv']], axis=1)
                           for lp in layers], axis=0),          # (L, 1, 3D)
        'wo': stack('wo'), 'bo': stack('bo'),
        'w1': stack('w1'), 'c1': stack('c1'),
        'w2': stack('w2'), 'c2': stack('c2'),
        'norm_a': p['norm_a'], 'norm_g': p['norm_g'],
        'out_w': out_w_p.astype(jnp.bfloat16),                  # (S*D, 2560) bf16, lives in HBM
        'out_b': out_b_p,                                       # (1, 2560) f32
    }


# ----------------------------- pure-JAX reference -----------------------------------
def reference_forward(src, params):
    x = jnp.einsum('bn,snd->bsd', src, params['embed_w']) + params['embed_b'][None]
    x = x * math.sqrt(D_MODEL) + params['pe'][None]
    d_k = D_MODEL // HEADS
    scores = []
    for lp in params['layers']:
        B, S, D = x.shape
        x2 = _norm(x, lp['a1'], lp['g1'])
        q = x2 @ lp['wq'] + lp['bq']
        k = x2 @ lp['wk'] + lp['bk']
        v = x2 @ lp['wv'] + lp['bv']
        qh = q.reshape(B, S, HEADS, d_k).transpose(0, 2, 1, 3)
        kh = k.reshape(B, S, HEADS, d_k).transpose(0, 2, 1, 3)
        vh = v.reshape(B, S, HEADS, d_k).transpose(0, 2, 1, 3)
        s = jnp.einsum('bhqd,bhkd->bhqk', qh, kh) / math.sqrt(d_k)
        p = jax.nn.softmax(s, axis=-1)
        scores.append(p)
        o = jnp.einsum('bhqk,bhkd->bhqd', p, vh).transpose(0, 2, 1, 3).reshape(B, S, D)
        x = x + (o @ lp['wo'] + lp['bo'])
        x2 = _norm(x, lp['a2'], lp['g2'])
        h1 = jax.nn.relu(x2 @ lp['w1'] + lp['c1'])
        x = x + (h1 @ lp['w2'] + lp['c2'])
    xn = _norm(x, params['norm_a'], params['norm_g'])
    out = xn.reshape(x.shape[0], -1) @ params['out_w'] + params['out_b']
    return out, scores


# ----------------------------------- main ------------------------------------------
if __name__ == "__main__":
    key = jax.random.PRNGKey(0)
    k_src, k_par = jax.random.split(key)
    src = jax.random.normal(k_src, (BATCH, NECK), jnp.float32)
    params = init_params(k_par)
    packed = pack_params(params)

    out, scores = decoder_forward(src, packed)
    out = jax.block_until_ready(out)
    scores = [jax.block_until_ready(s) for s in scores]

    assert out.shape == (BATCH, OUT_DIM)
    assert len(scores) == N_LAYERS
    assert scores[0].shape == (BATCH, HEADS, MAX_SEQ, MAX_SEQ)

    ref_out, ref_scores = reference_forward(src, params)
    np.testing.assert_allclose(np.asarray(out), np.asarray(ref_out), rtol=2e-2, atol=2e-2)
    for s, rs in zip(scores, ref_scores):
        np.testing.assert_allclose(np.asarray(s), np.asarray(rs), rtol=2e-2, atol=2e-2)

    print("KERNEL_OK")
</pallas_src>

<mosaic_0001>
module attributes {stable_mosaic.version = 11 : i64} {
  func.func @_fused_kernel(%arg0: memref<2x16xf32, #tpu.memory_space<vmem>>, %arg1: memref<16x256xf32, #tpu.memory_space<vmem>>, %arg2: memref<1x256xf32, #tpu.memory_space<vmem>>, %arg3: memref<2x1x32xf32, #tpu.memory_space<vmem>>, %arg4: memref<2x1x32xf32, #tpu.memory_space<vmem>>, %arg5: memref<2x32x96xf32, #tpu.memory_space<vmem>>, %arg6: memref<2x1x96xf32, #tpu.memory_space<vmem>>, %arg7: memref<2x32x32xf32, #tpu.memory_space<vmem>>, %arg8: memref<2x1x32xf32, #tpu.memory_space<vmem>>, %arg9: memref<2x1x32xf32, #tpu.memory_space<vmem>>, %arg10: memref<2x1x32xf32, #tpu.memory_space<vmem>>, %arg11: memref<2x32x64xf32, #tpu.memory_space<vmem>>, %arg12: memref<2x1x64xf32, #tpu.memory_space<vmem>>, %arg13: memref<2x64x32xf32, #tpu.memory_space<vmem>>, %arg14: memref<2x1x32xf32, #tpu.memory_space<vmem>>, %arg15: memref<1x32xf32, #tpu.memory_space<vmem>>, %arg16: memref<1x32xf32, #tpu.memory_space<vmem>>, %arg17: memref<1x2560xf32, #tpu.memory_space<vmem>>, %arg18: memref<256x2560xbf16, #tpu.memory_space<any>>, %arg19: memref<2x2560xf32, #tpu.memory_space<vmem>>, %arg20: memref<2x8x8x8xf32, #tpu.memory_space<vmem>>, %arg21: memref<256x2560xbf16, #tpu.memory_space<vmem>>, %arg22: memref<!tpu.dma_semaphore, #tpu.memory_space<semaphore_mem>>) attributes {dimension_semantics = [], scalar_prefetch = 0 : i64, scratch_operands = 2 : i64, tpu.core_type = #tpu.core_type<tc>} {
    tpu.enqueue_dma source(%arg18 : memref<256x2560xbf16, #tpu.memory_space<any>>) target(%arg21 : memref<256x2560xbf16, #tpu.memory_space<vmem>>) target_semaphore(%arg22 : memref<!tpu.dma_semaphore, #tpu.memory_space<semaphore_mem>>)
    %c0 = arith.constant 0 : index
    %c0_0 = arith.constant 0 : index
    %0 = vector.load %arg0[%c0, %c0_0] : memref<2x16xf32, #tpu.memory_space<vmem>>, vector<2x16xf32>
    %c0_1 = arith.constant 0 : index
    %c0_2 = arith.constant 0 : index
    %1 = vector.load %arg1[%c0_1, %c0_2] : memref<16x256xf32, #tpu.memory_space<vmem>>, vector<16x256xf32>
    %cst = arith.constant dense<0.000000e+00> : vector<2x256xf32>
    %2 = tpu.matmul %0, %1, %cst {dimension_numbers = #tpu.dot_dimension_numbers<[1], [0], [0], [1], [0, 0, 1, 1], [], []>} : vector<2x16xf32>, vector<16x256xf32>, vector<2x256xf32> -> vector<2x256xf32>
    %c0_3 = arith.constant 0 : index
    %c0_4 = arith.constant 0 : index
    %3 = vector.load %arg2[%c0_3, %c0_4] : memref<1x256xf32, #tpu.memory_space<vmem>>, vector<1x256xf32>
    %4 = vector.broadcast %3 : vector<1x256xf32> to vector<2x256xf32>
    %5 = arith.addf %2, %4 : vector<2x256xf32>
    %6 = vector.shape_cast %5 : vector<2x256xf32> to vector<2x8x32xf32>
    %c0_5 = arith.constant 0 : index
    %c0_6 = arith.constant 0 : index
    %c0_7 = arith.constant 0 : index
    %7 = vector.load %arg3[%c0_5, %c0_6, %c0_7] : memref<2x1x32xf32, #tpu.memory_space<vmem>>, vector<2x1x32xf32>
    %c0_8 = arith.constant 0 : index
    %c0_9 = arith.constant 0 : index
    %c0_10 = arith.constant 0 : index
    %8 = vector.load %arg4[%c0_8, %c0_9, %c0_10] : memref<2x1x32xf32, #tpu.memory_space<vmem>>, vector<2x1x32xf32>
    %c0_11 = arith.constant 0 : index
    %c0_12 = arith.constant 0 : index
    %c0_13 = arith.constant 0 : index
    %9 = vector.load %arg9[%c0_11, %c0_12, %c0_13] : memref<2x1x32xf32, #tpu.memory_space<vmem>>, vector<2x1x32xf32>
    %c0_14 = arith.constant 0 : index
    %c0_15 = arith.constant 0 : index
    %c0_16 = arith.constant 0 : index
    %10 = vector.load %arg10[%c0_14, %c0_15, %c0_16] : memref<2x1x32xf32, #tpu.memory_space<vmem>>, vector<2x1x32xf32>
    %c0_17 = arith.constant 0 : index
    %c0_18 = arith.constant 0 : index
    %c0_19 = arith.constant 0 : index
    %11 = vector.load %arg5[%c0_17, %c0_18, %c0_19] : memref<2x32x96xf32, #tpu.memory_space<vmem>>, vector<2x32x96xf32>
    %c0_20 = arith.constant 0 : index
    %c0_21 = arith.constant 0 : index
    %c0_22 = arith.constant 0 : index
    %12 = vector.load %arg6[%c0_20, %c0_21, %c0_22] : memref<2x1x96xf32, #tpu.memory_space<vmem>>, vector<2x1x96xf32>
    %c0_23 = arith.constant 0 : index
    %c0_24 = arith.constant 0 : index
    %c0_25 = arith.constant 0 : index
    %13 = vector.load %arg7[%c0_23, %c0_24, %c0_25] : memref<2x32x32xf32, #tpu.memory_space<vmem>>, vector<2x32x32xf32>
    %c0_26 = arith.constant 0 : index
    %c0_27 = arith.constant 0 : index
    %c0_28 = arith.constant 0 : index
    %14 = vector.load %arg8[%c0_26, %c0_27, %c0_28] : memref<2x1x32xf32, #tpu.memory_space<vmem>>, vector<2x1x32xf32>
    %c0_29 = arith.constant 0 : index
    %c0_30 = arith.constant 0 : index
    %c0_31 = arith.constant 0 : index
    %15 = vector.load %arg11[%c0_29, %c0_30, %c0_31] : memref<2x32x64xf32, #tpu.memory_space<vmem>>, vector<2x32x64xf32>
    %c0_32 = arith.constant 0 : index
    %c0_33 = arith.constant 0 : index
    %c0_34 = arith.constant 0 : index
    %16 = vector.load %arg12[%c0_32, %c0_33, %c0_34] : memref<2x1x64xf32, #tpu.memory_space<vmem>>, vector<2x1x64xf32>
    %c0_35 = arith.constant 0 : index
    %c0_36 = arith.constant 0 : index
    %c0_37 = arith.constant 0 : index
    %17 = vector.load %arg13[%c0_35, %c0_36, %c0_37] : memref<2x64x32xf32, #tpu.memory_space<vmem>>, vector<2x64x32xf32>
    %c0_38 = arith.constant 0 : index
    %c0_39 = arith.constant 0 : index
    %c0_40 = arith.constant 0 : index
    %18 = vector.load %arg14[%c0_38, %c0_39, %c0_40] : memref<2x1x32xf32, #tpu.memory_space<vmem>>, vector<2x1x32xf32>
    %19 = vector.extract_strided_slice %7 {offsets = [0, 0, 0], sizes = [1, 1, 32], strides = [1, 1, 1]} : vector<2x1x32xf32> to vector<1x1x32xf32>
    %20 = vector.shape_cast %19 : vector<1x1x32xf32> to vector<1x32xf32>
    %21 = vector.extract_strided_slice %8 {offsets = [0, 0, 0], sizes = [1, 1, 32], strides = [1, 1, 1]} : vector<2x1x32xf32> to vector<1x1x32xf32>
    %22 = vector.shape_cast %21 : vector<1x1x32xf32> to vector<1x32xf32>
    %cst_41 = arith.constant dense<0.000000e+00> : vector<2x8xf32>
    %23 = vector.multi_reduction <add>, %6, %cst_41 [2] : vector<2x8x32xf32> to vector<2x8xf32>
    %24 = vector.shape_cast %23 : vector<2x8xf32> to vector<2x8x1xf32>
    %cst_42 = arith.constant 3.200000e+01 : f32
    %25 = vector.broadcast %cst_42 : f32 to vector<2x8x1xf32>
    %26 = arith.divf %24, %25 : vector<2x8x1xf32>
    %27 = vector.broadcast %26 : vector<2x8x1xf32> to vector<2x8x32xf32>
    %28 = arith.subf %6, %27 : vector<2x8x32xf32>
    %29 = arith.mulf %28, %28 : vector<2x8x32xf32>
    %cst_43 = arith.constant dense<0.000000e+00> : vector<2x8xf32>
    %30 = vector.multi_reduction <add>, %29, %cst_43 [2] : vector<2x8x32xf32> to vector<2x8xf32>
    %31 = vector.shape_cast %30 : vector<2x8xf32> to vector<2x8x1xf32>
    %cst_44 = arith.constant 3.100000e+01 : f32
    %32 = vector.broadcast %cst_44 : f32 to vector<2x8x1xf32>
    %33 = arith.divf %31, %32 : vector<2x8x1xf32>
    %34 = math.sqrt %33 : vector<2x8x1xf32>
    %35 = vector.broadcast %26 : vector<2x8x1xf32> to vector<2x8x32xf32>
    %36 = arith.subf %6, %35 : vector<2x8x32xf32>
    %37 = vector.shape_cast %20 : vector<1x32xf32> to vector<1x1x32xf32>
    %38 = vector.broadcast %37 : vector<1x1x32xf32> to vector<2x8x32xf32>
    %39 = arith.mulf %38, %36 : vector<2x8x32xf32>
    %cst_45 = arith.constant 9.99999997E-7 : f32
    %40 = vector.broadcast %cst_45 : f32 to vector<2x8x1xf32>
    %41 = arith.addf %34, %40 : vector<2x8x1xf32>
    %42 = vector.broadcast %41 : vector<2x8x1xf32> to vector<2x8x32xf32>
    %43 = arith.divf %39, %42 : vector<2x8x32xf32>
    %44 = vector.shape_cast %22 : vector<1x32xf32> to vector<1x1x32xf32>
    %45 = vector.broadcast %44 : vector<1x1x32xf32> to vector<2x8x32xf32>
    %46 = arith.addf %43, %45 : vector<2x8x32xf32>
    %47 = vector.shape_cast %46 : vector<2x8x32xf32> to vector<16x32xf32>
    %48 = vector.extract_strided_slice %11 {offsets = [0, 0, 0], sizes = [1, 32, 96], strides = [1, 1, 1]} : vector<2x32x96xf32> to vector<1x32x96xf32>
    %49 = vector.shape_cast %48 : vector<1x32x96xf32> to vector<32x96xf32>
    %cst_46 = arith.constant dense<0.000000e+00> : vector<16x96xf32>
    %50 = tpu.matmul %47, %49, %cst_46 {dimension_numbers = #tpu.dot_dimension_numbers<[1], [0], [0], [1], [0, 0, 1, 1], [], []>} : vector<16x32xf32>, vector<32x96xf32>, vector<16x96xf32> -> vector<16x96xf32>
    %51 = vector.extract_strided_slice %12 {offsets = [0, 0, 0], sizes = [1, 1, 96], strides = [1, 1, 1]} : vector<2x1x96xf32> to vector<1x1x96xf32>
    %52 = vector.shape_cast %51 : vector<1x1x96xf32> to vector<1x96xf32>
    %53 = vector.broadcast %52 : vector<1x96xf32> to vector<16x96xf32>
    %54 = arith.addf %50, %53 : vector<16x96xf32>
    %55 = vector.extract_strided_slice %54 {offsets = [0, 0], sizes = [16, 8], strides = [1, 1]} : vector<16x96xf32> to vector<16x8xf32>
    %56 = vector.shape_cast %55 : vector<16x8xf32> to vector<2x8x8xf32>
    %57 = vector.extract_strided_slice %54 {offsets = [0, 8], sizes = [16, 8], strides = [1, 1]} : vector<16x96xf32> to vector<16x8xf32>
    %58 = vector.shape_cast %57 : vector<16x8xf32> to vector<2x8x8xf32>
    %59 = vector.extract_strided_slice %54 {offsets = [0, 16], sizes = [16, 8], strides = [1, 1]} : vector<16x96xf32> to vector<16x8xf32>
    %60 = vector.shape_cast %59 : vector<16x8xf32> to vector<2x8x8xf32>
    %61 = vector.extract_strided_slice %54 {offsets = [0, 24], sizes = [16, 8], strides = [1, 1]} : vector<16x96xf32> to vector<16x8xf32>
    %62 = vector.shape_cast %61 : vector<16x8xf32> to vector<2x8x8xf32>
    %63 = tpu.concatenate %56, %58, %60, %62 in 0 : vector<2x8x8xf32>, vector<2x8x8xf32>, vector<2x8x8xf32>, vector<2x8x8xf32> -> vector<8x8x8xf32>
    %64 = vector.extract_strided_slice %54 {offsets = [0, 32], sizes = [16, 8], strides = [1, 1]} : vector<16x96xf32> to vector<16x8xf32>
    %65 = vector.shape_cast %64 : vector<16x8xf32> to vector<2x8x8xf32>
    %66 = vector.extract_strided_slice %54 {offsets = [0, 40], sizes = [16, 8], strides = [1, 1]} : vector<16x96xf32> to vector<16x8xf32>
    %67 = vector.shape_cast %66 : vector<16x8xf32> to vector<2x8x8xf32>
    %68 = vector.extract_strided_slice %54 {offsets = [0, 48], sizes = [16, 8], strides = [1, 1]} : vector<16x96xf32> to vector<16x8xf32>
    %69 = vector.shape_cast %68 : vector<16x8xf32> to vector<2x8x8xf32>
    %70 = vector.extract_strided_slice %54 {offsets = [0, 56], sizes = [16, 8], strides = [1, 1]} : vector<16x96xf32> to vector<16x8xf32>
    %71 = vector.shape_cast %70 : vector<16x8xf32> to vector<2x8x8xf32>
    %72 = tpu.concatenate %65, %67, %69, %71 in 0 : vector<2x8x8xf32>, vector<2x8x8xf32>, vector<2x8x8xf32>, vector<2x8x8xf32> -> vector<8x8x8xf32>
    %73 = vector.extract_strided_slice %54 {offsets = [0, 64], sizes = [16, 8], strides = [1, 1]} : vector<16x96xf32> to vector<16x8xf32>
    %74 = vector.shape_cast %73 : vector<16x8xf32> to vector<2x8x8xf32>
    %75 = vector.extract_strided_slice %54 {offsets = [0, 72], sizes = [16, 8], strides = [1, 1]} : vector<16x96xf32> to vector<16x8xf32>
    %76 = vector.shape_cast %75 : vector<16x8xf32> to vector<2x8x8xf32>
    %77 = vector.extract_strided_slice %54 {offsets = [0, 80], sizes = [16, 8], strides = [1, 1]} : vector<16x96xf32> to vector<16x8xf32>
    %78 = vector.shape_cast %77 : vector<16x8xf32> to vector<2x8x8xf32>
    %79 = vector.extract_strided_slice %54 {offsets = [0, 88], sizes = [16, 8], strides = [1, 1]} : vector<16x96xf32> to vector<16x8xf32>
    %80 = vector.shape_cast %79 : vector<16x8xf32> to vector<2x8x8xf32>
    %81 = tpu.concatenate %74, %76, %78, %80 in 0 : vector<2x8x8xf32>, vector<2x8x8xf32>, vector<2x8x8xf32>, vector<2x8x8xf32> -> vector<8x8x8xf32>
    "tpu.trace_start"() <{level = 10 : i32, message = "bqd,bkd->bqk"}> : () -> ()
    %cst_47 = arith.constant dense<0.000000e+00> : vector<8x8x8xf32>
    %82 = tpu.matmul %63, %72, %cst_47 {dimension_numbers = #tpu.dot_dimension_numbers<[2], [2], [1], [1], [0, 0, 0, 1, 1, 1], [0], [0]>} : vector<8x8x8xf32>, vector<8x8x8xf32>, vector<8x8x8xf32> -> vector<8x8x8xf32>
    "tpu.trace_stop"() : () -> ()
    %cst_48 = arith.constant 0.353553385 : f32
    %83 = vector.broadcast %cst_48 : f32 to vector<8x8x8xf32>
    %84 = arith.mulf %82, %83 : vector<8x8x8xf32>
    %cst_49 = arith.constant dense<0xFF800000> : vector<8x8xf32>
    %85 = vector.multi_reduction <maximumf>, %84, %cst_49 [2] : vector<8x8x8xf32> to vector<8x8xf32>
    %86 = vector.shape_cast %85 : vector<8x8xf32> to vector<8x8x1xf32>
    %87 = vector.broadcast %86 : vector<8x8x1xf32> to vector<8x8x8xf32>
    %88 = arith.subf %84, %87 : vector<8x8x8xf32>
    %89 = math.exp %88 : vector<8x8x8xf32>
    %cst_50 = arith.constant dense<0.000000e+00> : vector<8x8xf32>
    %90 = vector.multi_reduction <add>, %89, %cst_50 [2] : vector<8x8x8xf32> to vector<8x8xf32>
    %91 = vector.shape_cast %90 : vector<8x8xf32> to vector<8x8x1xf32>
    %92 = tpu.reciprocal %91 {approx = true} : vector<8x8x1xf32> -> vector<8x8x1xf32>
    %93 = vector.broadcast %92 : vector<8x8x1xf32> to vector<8x8x8xf32>
    %94 = arith.mulf %89, %93 : vector<8x8x8xf32>
    %c0_51 = arith.constant 0 : index
    %c0_52 = arith.constant 0 : index
    %c0_53 = arith.constant 0 : index
    %c0_54 = arith.constant 0 : index
    %95 = vector.load %arg20[%c0_51, %c0_52, %c0_53, %c0_54] : memref<2x8x8x8xf32, #tpu.memory_space<vmem>>, vector<1x8x8x8xf32>
    %96 = vector.shape_cast %95 : vector<1x8x8x8xf32> to vector<8x8x8xf32>
    %97 = vector.shape_cast %94 : vector<8x8x8xf32> to vector<1x8x8x8xf32>
    tpu.vector_store %arg20[%c0_51, %c0_52, %c0_53, %c0_54], %97 {strides = array<i32>} : memref<2x8x8x8xf32, #tpu.memory_space<vmem>>, vector<1x8x8x8xf32>,
    "tpu.trace_start"() <{level = 10 : i32, message = "bqk,bkd->bqd"}> : () -> ()
    %cst_55 = arith.constant dense<0.000000e+00> : vector<8x8x8xf32>
    %98 = tpu.matmul %94, %81, %cst_55 {dimension_numbers = #tpu.dot_dimension_numbers<[2], [1], [1], [2], [0, 0, 0, 1, 1, 2], [0], [0]>} : vector<8x8x8xf32>, vector<8x8x8xf32>, vector<8x8x8xf32> -> vector<8x8x8xf32>
    "tpu.trace_stop"() : () -> ()
    %99 = vector.extract_strided_slice %98 {offsets = [0, 0, 0], sizes = [2, 8, 8], strides = [1, 1, 1]} : vector<8x8x8xf32> to vector<2x8x8xf32>
    %100 = vector.extract_strided_slice %98 {offsets = [2, 0, 0], sizes = [2, 8, 8], strides = [1, 1, 1]} : vector<8x8x8xf32> to vector<2x8x8xf32>
    %101 = vector.extract_strided_slice %98 {offsets = [4, 0, 0], sizes = [2, 8, 8], strides = [1, 1, 1]} : vector<8x8x8xf32> to vector<2x8x8xf32>
    %102 = vector.extract_strided_slice %98 {offsets = [6, 0, 0], sizes = [2, 8, 8], strides = [1, 1, 1]} : vector<8x8x8xf32> to vector<2x8x8xf32>
    %103 = tpu.concatenate %99, %100, %101, %102 in 2 : vector<2x8x8xf32>, vector<2x8x8xf32>, vector<2x8x8xf32>, vector<2x8x8xf32> -> vector<2x8x32xf32>
    %104 = vector.shape_cast %103 : vector<2x8x32xf32> to vector<16x32xf32>
    %105 = vector.extract_strided_slice %13 {offsets = [0, 0, 0], sizes = [1, 32, 32], strides = [1, 1, 1]} : vector<2x32x32xf32> to vector<1x32x32xf32>
    %106 = vector.shape_cast %105 : vector<1x32x32xf32> to vector<32x32xf32>
    %cst_56 = arith.constant dense<0.000000e+00> : vector<16x32xf32>
    %107 = tpu.matmul %104, %106, %cst_56 {dimension_numbers = #tpu.dot_dimension_numbers<[1], [0], [0], [1], [0, 0, 1, 1], [], []>} : vector<16x32xf32>, vector<32x32xf32>, vector<16x32xf32> -> vector<16x32xf32>
    %108 = vector.extract_strided_slice %14 {offsets = [0, 0, 0], sizes = [1, 1, 32], strides = [1, 1, 1]} : vector<2x1x32xf32> to vector<1x1x32xf32>
    %109 = vector.shape_cast %108 : vector<1x1x32xf32> to vector<1x32xf32>
    %110 = vector.broadcast %109 : vector<1x32xf32> to vector<16x32xf32>
    %111 = arith.addf %107, %110 : vector<16x32xf32>
    %112 = vector.shape_cast %111 : vector<16x32xf32> to vector<2x8x32xf32>
    %113 = arith.addf %6, %112 : vector<2x8x32xf32>
    %114 = vector.extract_strided_slice %9 {offsets = [0, 0, 0], sizes = [1, 1, 32], strides = [1, 1, 1]} : vector<2x1x32xf32> to vector<1x1x32xf32>
    %115 = vector.shape_cast %114 : vector<1x1x32xf32> to vector<1x32xf32>
    %116 = vector.extract_strided_slice %10 {offsets = [0, 0, 0], sizes = [1, 1, 32], strides = [1, 1, 1]} : vector<2x1x32xf32> to vector<1x1x32xf32>
    %117 = vector.shape_cast %116 : vector<1x1x32xf32> to vector<1x32xf32>
    %cst_57 = arith.constant dense<0.000000e+00> : vector<2x8xf32>
    %118 = vector.multi_reduction <add>, %113, %cst_57 [2] : vector<2x8x32xf32> to vector<2x8xf32>
    %119 = vector.shape_cast %118 : vector<2x8xf32> to vector<2x8x1xf32>
    %cst_58 = arith.constant 3.200000e+01 : f32
    %120 = vector.broadcast %cst_58 : f32 to vector<2x8x1xf32>
    %121 = arith.divf %119, %120 : vector<2x8x1xf32>
    %122 = vector.broadcast %121 : vector<2x8x1xf32> to vector<2x8x32xf32>
    %123 = arith.subf %113, %122 : vector<2x8x32xf32>
    %124 = arith.mulf %123, %123 : vector<2x8x32xf32>
    %cst_59 = arith.constant dense<0.000000e+00> : vector<2x8xf32>
    %125 = vector.multi_reduction <add>, %124, %cst_59 [2] : vector<2x8x32xf32> to vector<2x8xf32>
    %126 = vector.shape_cast %125 : vector<2x8xf32> to vector<2x8x1xf32>
    %cst_60 = arith.constant 3.100000e+01 : f32
    %127 = vector.broadcast %cst_60 : f32 to vector<2x8x1xf32>
    %128 = arith.divf %126, %127 : vector<2x8x1xf32>
    %129 = math.sqrt %128 : vector<2x8x1xf32>
    %130 = vector.broadcast %121 : vector<2x8x1xf32> to vector<2x8x32xf32>
    %131 = arith.subf %113, %130 : vector<2x8x32xf32>
    %132 = vector.shape_cast %115 : vector<1x32xf32> to vector<1x1x32xf32>
    %133 = vector.broadcast %132 : vector<1x1x32xf32> to vector<2x8x32xf32>
    %134 = arith.mulf %133, %131 : vector<2x8x32xf32>
    %cst_61 = arith.constant 9.99999997E-7 : f32
    %135 = vector.broadcast %cst_61 : f32 to vector<2x8x1xf32>
    %136 = arith.addf %129, %135 : vector<2x8x1xf32>
    %137 = vector.broadcast %136 : vector<2x8x1xf32> to vector<2x8x32xf32>
    %138 = arith.divf %134, %137 : vector<2x8x32xf32>
    %139 = vector.shape_cast %117 : vector<1x32xf32> to vector<1x1x32xf32>
    %140 = vector.broadcast %139 : vector<1x1x32xf32> to vector<2x8x32xf32>
    %141 = arith.addf %138, %140 : vector<2x8x32xf32>
    %142 = vector.shape_cast %141 : vector<2x8x32xf32> to vector<16x32xf32>
    %143 = vector.extract_strided_slice %15 {offsets = [0, 0, 0], sizes = [1, 32, 64], strides = [1, 1, 1]} : vector<2x32x64xf32> to vector<1x32x64xf32>
    %144 = vector.shape_cast %143 : vector<1x32x64xf32> to vector<32x64xf32>
    %cst_62 = arith.constant dense<0.000000e+00> : vector<16x64xf32>
    %145 = tpu.matmul %142, %144, %cst_62 {dimension_numbers = #tpu.dot_dimension_numbers<[1], [0], [0], [1], [0, 0, 1, 1], [], []>} : vector<16x32xf32>, vector<32x64xf32>, vector<16x64xf32> -> vector<16x64xf32>
    %146 = vector.extract_strided_slice %16 {offsets = [0, 0, 0], sizes = [1, 1, 64], strides = [1, 1, 1]} : vector<2x1x64xf32> to vector<1x1x64xf32>
    %147 = vector.shape_cast %146 : vector<1x1x64xf32> to vector<1x64xf32>
    %148 = vector.broadcast %147 : vector<1x64xf32> to vector<16x64xf32>
    %149 = arith.addf %145, %148 : vector<16x64xf32>
    %cst_63 = arith.constant 0.000000e+00 : f32
    %150 = vector.broadcast %cst_63 : f32 to vector<16x64xf32>
    %151 = arith.maximumf %149, %150 : vector<16x64xf32>
    %152 = vector.extract_strided_slice %17 {offsets = [0, 0, 0], sizes = [1, 64, 32], strides = [1, 1, 1]} : vector<2x64x32xf32> to vector<1x64x32xf32>
    %153 = vector.shape_cast %152 : vector<1x64x32xf32> to vector<64x32xf32>
    %cst_64 = arith.constant dense<0.000000e+00> : vector<16x32xf32>
    %154 = tpu.matmul %151, %153, %cst_64 {dimension_numbers = #tpu.dot_dimension_numbers<[1], [0], [0], [1], [0, 0, 1, 1], [], []>} : vector<16x64xf32>, vector<64x32xf32>, vector<16x32xf32> -> vector<16x32xf32>
    %155 = vector.extract_strided_slice %18 {offsets = [0, 0, 0], sizes = [1, 1, 32], strides = [1, 1, 1]} : vector<2x1x32xf32> to vector<1x1x32xf32>
    %156 = vector.shape_cast %155 : vector<1x1x32xf32> to vector<1x32xf32>
    %157 = vector.broadcast %156 : vector<1x32xf32> to vector<16x32xf32>
    %158 = arith.addf %154, %157 : vector<16x32xf32>
    %159 = vector.shape_cast %158 : vector<16x32xf32> to vector<2x8x32xf32>
    %160 = arith.addf %113, %159 : vector<2x8x32xf32>
    %161 = vector.extract_strided_slice %7 {offsets = [1, 0, 0], sizes = [1, 1, 32], strides = [1, 1, 1]} : vector<2x1x32xf32> to vector<1x1x32xf32>
    %162 = vector.shape_cast %161 : vector<1x1x32xf32> to vector<1x32xf32>
    %163 = vector.extract_strided_slice %8 {offsets = [1, 0, 0], sizes = [1, 1, 32], strides = [1, 1, 1]} : vector<2x1x32xf32> to vector<1x1x32xf32>
    %164 = vector.shape_cast %163 : vector<1x1x32xf32> to vector<1x32xf32>
    %cst_65 = arith.constant dense<0.000000e+00> : vector<2x8xf32>
    %165 = vector.multi_reduction <add>, %160, %cst_65 [2] : vector<2x8x32xf32> to vector<2x8xf32>
    %166 = vector.shape_cast %165 : vector<2x8xf32> to vector<2x8x1xf32>
    %cst_66 = arith.constant 3.200000e+01 : f32
    %167 = vector.broadcast %cst_66 : f32 to vector<2x8x1xf32>
    %168 = arith.divf %166, %167 : vector<2x8x1xf32>
    %169 = vector.broadcast %168 : vector<2x8x1xf32> to vector<2x8x32xf32>
    %170 = arith.subf %160, %169 : vector<2x8x32xf32>
    %171 = arith.mulf %170, %170 : vector<2x8x32xf32>
    %cst_67 = arith.constant dense<0.000000e+00> : vector<2x8xf32>
    %172 = vector.multi_reduction <add>, %171, %cst_67 [2] : vector<2x8x32xf32> to vector<2x8xf32>
    %173 = vector.shape_cast %172 : vector<2x8xf32> to vector<2x8x1xf32>
    %cst_68 = arith.constant 3.100000e+01 : f32
    %174 = vector.broadcast %cst_68 : f32 to vector<2x8x1xf32>
    %175 = arith.divf %173, %174 : vector<2x8x1xf32>
    %176 = math.sqrt %175 : vector<2x8x1xf32>
    %177 = vector.broadcast %168 : vector<2x8x1xf32> to vector<2x8x32xf32>
    %178 = arith.subf %160, %177 : vector<2x8x32xf32>
    %179 = vector.shape_cast %162 : vector<1x32xf32> to vector<1x1x32xf32>
    %180 = vector.broadcast %179 : vector<1x1x32xf32> to vector<2x8x32xf32>
    %181 = arith.mulf %180, %178 : vector<2x8x32xf32>
    %cst_69 = arith.constant 9.99999997E-7 : f32
    %182 = vector.broadcast %cst_69 : f32 to vector<2x8x1xf32>
    %183 = arith.addf %176, %182 : vector<2x8x1xf32>
    %184 = vector.broadcast %183 : vector<2x8x1xf32> to vector<2x8x32xf32>
    %185 = arith.divf %181, %184 : vector<2x8x32xf32>
    %186 = vector.shape_cast %164 : vector<1x32xf32> to vector<1x1x32xf32>
    %187 = vector.broadcast %186 : vector<1x1x32xf32> to vector<2x8x32xf32>
    %188 = arith.addf %185, %187 : vector<2x8x32xf32>
    %189 = vector.shape_cast %188 : vector<2x8x32xf32> to vector<16x32xf32>
    %190 = vector.extract_strided_slice %11 {offsets = [1, 0, 0], sizes = [1, 32, 96], strides = [1, 1, 1]} : vector<2x32x96xf32> to vector<1x32x96xf32>
    %191 = vector.shape_cast %190 : vector<1x32x96xf32> to vector<32x96xf32>
    %cst_70 = arith.constant dense<0.000000e+00> : vector<16x96xf32>
    %192 = tpu.matmul %189, %191, %cst_70 {dimension_numbers = #tpu.dot_dimension_numbers<[1], [0], [0], [1], [0, 0, 1, 1], [], []>} : vector<16x32xf32>, vector<32x96xf32>, vector<16x96xf32> -> vector<16x96xf32>
    %193 = vector.extract_strided_slice %12 {offsets = [1, 0, 0], sizes = [1, 1, 96], strides = [1, 1, 1]} : vector<2x1x96xf32> to vector<1x1x96xf32>
    %194 = vector.shape_cast %193 : vector<1x1x96xf32> to vector<1x96xf32>
    %195 = vector.broadcast %194 : vector<1x96xf32> to vector<16x96xf32>
    %196 = arith.addf %192, %195 : vector<16x96xf32>
    %197 = vector.extract_strided_slice %196 {offsets = [0, 0], sizes = [16, 8], strides = [1, 1]} : vector<16x96xf32> to vector<16x8xf32>
    %198 = vector.shape_cast %197 : vector<16x8xf32> to vector<2x8x8xf32>
    %199 = vector.extract_strided_slice %196 {offsets = [0, 8], sizes = [16, 8], strides = [1, 1]} : vector<16x96xf32> to vector<16x8xf32>
    %200 = vector.shape_cast %199 : vector<16x8xf32> to vector<2x8x8xf32>
    %201 = vector.extract_strided_slice %196 {offsets = [0, 16], sizes = [16, 8], strides = [1, 1]} : vector<16x96xf32> to vector<16x8xf32>
    %202 = vector.shape_cast %201 : vector<16x8xf32> to vector<2x8x8xf32>
    %203 = vector.extract_strided_slice %196 {offsets = [0, 24], sizes = [16, 8], strides = [1, 1]} : vector<16x96xf32> to vector<16x8xf32>
    %204 = vector.shape_cast %203 : vector<16x8xf32> to vector<2x8x8xf32>
    %205 = tpu.concatenate %198, %200, %202, %204 in 0 : vector<2x8x8xf32>, vector<2x8x8xf32>, vector<2x8x8xf32>, vector<2x8x8xf32> -> vector<8x8x8xf32>
    %206 = vector.extract_strided_slice %196 {offsets = [0, 32], sizes = [16, 8], strides = [1, 1]} : vector<16x96xf32> to vector<16x8xf32>
    %207 = vector.shape_cast %206 : vector<16x8xf32> to vector<2x8x8xf32>
    %208 = vector.extract_strided_slice %196 {offsets = [0, 40], sizes = [16, 8], strides = [1, 1]} : vector<16x96xf32> to vector<16x8xf32>
    %209 = vector.shape_cast %208 : vector<16x8xf32> to vector<2x8x8xf32>
    %210 = vector.extract_strided_slice %196 {offsets = [0, 48], sizes = [16, 8], strides = [1, 1]} : vector<16x96xf32> to vector<16x8xf32>
    %211 = vector.shape_cast %210 : vector<16x8xf32> to vector<2x8x8xf32>
    %212 = vector.extract_strided_slice %196 {offsets = [0, 56], sizes = [16, 8], strides = [1, 1]} : vector<16x96xf32> to vector<16x8xf32>
    %213 = vector.shape_cast %212 : vector<16x8xf32> to vector<2x8x8xf32>
    %214 = tpu.concatenate %207, %209, %211, %213 in 0 : vector<2x8x8xf32>, vector<2x8x8xf32>, vector<2x8x8xf32>, vector<2x8x8xf32> -> vector<8x8x8xf32>
    %215 = vector.extract_strided_slice %196 {offsets = [0, 64], sizes = [16, 8], strides = [1, 1]} : vector<16x96xf32> to vector<16x8xf32>
    %216 = vector.shape_cast %215 : vector<16x8xf32> to vector<2x8x8xf32>
    %217 = vector.extract_strided_slice %196 {offsets = [0, 72], sizes = [16, 8], strides = [1, 1]} : vector<16x96xf32> to vector<16x8xf32>
    %218 = vector.shape_cast %217 : vector<16x8xf32> to vector<2x8x8xf32>
    %219 = vector.extract_strided_slice %196 {offsets = [0, 80], sizes = [16, 8], strides = [1, 1]} : vector<16x96xf32> to vector<16x8xf32>
    %220 = vector.shape_cast %219 : vector<16x8xf32> to vector<2x8x8xf32>
    %221 = vector.extract_strided_slice %196 {offsets = [0, 88], sizes = [16, 8], strides = [1, 1]} : vector<16x96xf32> to vector<16x8xf32>
    %222 = vector.shape_cast %221 : vector<16x8xf32> to vector<2x8x8xf32>
    %223 = tpu.concatenate %216, %218, %220, %222 in 0 : vector<2x8x8xf32>, vector<2x8x8xf32>, vector<2x8x8xf32>, vector<2x8x8xf32> -> vector<8x8x8xf32>
    "tpu.trace_start"() <{level = 10 : i32, message = "bqd,bkd->bqk"}> : () -> ()
    %cst_71 = arith.constant dense<0.000000e+00> : vector<8x8x8xf32>
    %224 = tpu.matmul %205, %214, %cst_71 {dimension_numbers = #tpu.dot_dimension_numbers<[2], [2], [1], [1], [0, 0, 0, 1, 1, 1], [0], [0]>} : vector<8x8x8xf32>, vector<8x8x8xf32>, vector<8x8x8xf32> -> vector<8x8x8xf32>
    "tpu.trace_stop"() : () -> ()
    %cst_72 = arith.constant 0.353553385 : f32
    %225 = vector.broadcast %cst_72 : f32 to vector<8x8x8xf32>
    %226 = arith.mulf %224, %225 : vector<8x8x8xf32>
    %cst_73 = arith.constant dense<0xFF800000> : vector<8x8xf32>
    %227 = vector.multi_reduction <maximumf>, %226, %cst_73 [2] : vector<8x8x8xf32> to vector<8x8xf32>
    %228 = vector.shape_cast %227 : vector<8x8xf32> to vector<8x8x1xf32>
    %229 = vector.broadcast %228 : vector<8x8x1xf32> to vector<8x8x8xf32>
    %230 = arith.subf %226, %229 : vector<8x8x8xf32>
    %231 = math.exp %230 : vector<8x8x8xf32>
    %cst_74 = arith.constant dense<0.000000e+00> : vector<8x8xf32>
    %232 = vector.multi_reduction <add>, %231, %cst_74 [2] : vector<8x8x8xf32> to vector<8x8xf32>
    %233 = vector.shape_cast %232 : vector<8x8xf32> to vector<8x8x1xf32>
    %234 = tpu.reciprocal %233 {approx = true} : vector<8x8x1xf32> -> vector<8x8x1xf32>
    %235 = vector.broadcast %234 : vector<8x8x1xf32> to vector<8x8x8xf32>
    %236 = arith.mulf %231, %235 : vector<8x8x8xf32>
    %c1 = arith.constant 1 : index
    %c0_75 = arith.constant 0 : index
    %c0_76 = arith.constant 0 : index
    %c0_77 = arith.constant 0 : index
    %237 = vector.load %arg20[%c1, %c0_75, %c0_76, %c0_77] : memref<2x8x8x8xf32, #tpu.memory_space<vmem>>, vector<1x8x8x8xf32>
    %238 = vector.shape_cast %237 : vector<1x8x8x8xf32> to vector<8x8x8xf32>
    %239 = vector.shape_cast %236 : vector<8x8x8xf32> to vector<1x8x8x8xf32>
    tpu.vector_store %arg20[%c1, %c0_75, %c0_76, %c0_77], %239 {strides = array<i32>} : memref<2x8x8x8xf32, #tpu.memory_space<vmem>>, vector<1x8x8x8xf32>,
    "tpu.trace_start"() <{level = 10 : i32, message = "bqk,bkd->bqd"}> : () -> ()
    %cst_78 = arith.constant dense<0.000000e+00> : vector<8x8x8xf32>
    %240 = tpu.matmul %236, %223, %cst_78 {dimension_numbers = #tpu.dot_dimension_numbers<[2], [1], [1], [2], [0, 0, 0, 1, 1, 2], [0], [0]>} : vector<8x8x8xf32>, vector<8x8x8xf32>, vector<8x8x8xf32> -> vector<8x8x8xf32>
    "tpu.trace_stop"() : () -> ()
    %241 = vector.extract_strided_slice %240 {offsets = [0, 0, 0], sizes = [2, 8, 8], strides = [1, 1, 1]} : vector<8x8x8xf32> to vector<2x8x8xf32>
    %242 = vector.extract_strided_slice %240 {offsets = [2, 0, 0], sizes = [2, 8, 8], strides = [1, 1, 1]} : vector<8x8x8xf32> to vector<2x8x8xf32>
    %243 = vector.extract_strided_slice %240 {offsets = [4, 0, 0], sizes = [2, 8, 8], strides = [1, 1, 1]} : vector<8x8x8xf32> to vector<2x8x8xf32>
    %244 = vector.extract_strided_slice %240 {offsets = [6, 0, 0], sizes = [2, 8, 8], strides = [1, 1, 1]} : vector<8x8x8xf32> to vector<2x8x8xf32>
    %245 = tpu.concatenate %241, %242, %243, %244 in 2 : vector<2x8x8xf32>, vector<2x8x8xf32>, vector<2x8x8xf32>, vector<2x8x8xf32> -> vector<2x8x32xf32>
    %246 = vector.shape_cast %245 : vector<2x8x32xf32> to vector<16x32xf32>
    %247 = vector.extract_strided_slice %13 {offsets = [1, 0, 0], sizes = [1, 32, 32], strides = [1, 1, 1]} : vector<2x32x32xf32> to vector<1x32x32xf32>
    %248 = vector.shape_cast %247 : vector<1x32x32xf32> to vector<32x32xf32>
    %cst_79 = arith.constant dense<0.000000e+00> : vector<16x32xf32>
    %249 = tpu.matmul %246, %248, %cst_79 {dimension_numbers = #tpu.dot_dimension_numbers<[1], [0], [0], [1], [0, 0, 1, 1], [], []>} : vector<16x32xf32>, vector<32x32xf32>, vector<16x32xf32> -> vector<16x32xf32>
    %250 = vector.extract_strided_slice %14 {offsets = [1, 0, 0], sizes = [1, 1, 32], strides = [1, 1, 1]} : vector<2x1x32xf32> to vector<1x1x32xf32>
    %251 = vector.shape_cast %250 : vector<1x1x32xf32> to vector<1x32xf32>
    %252 = vector.broadcast %251 : vector<1x32xf32> to vector<16x32xf32>
    %253 = arith.addf %249, %252 : vector<16x32xf32>
    %254 = vector.shape_cast %253 : vector<16x32xf32> to vector<2x8x32xf32>
    %255 = arith.addf %160, %254 : vector<2x8x32xf32>
    %256 = vector.extract_strided_slice %9 {offsets = [1, 0, 0], sizes = [1, 1, 32], strides = [1, 1, 1]} : vector<2x1x32xf32> to vector<1x1x32xf32>
    %257 = vector.shape_cast %256 : vector<1x1x32xf32> to vector<1x32xf32>
    %258 = vector.extract_strided_slice %10 {offsets = [1, 0, 0], sizes = [1, 1, 32], strides = [1, 1, 1]} : vector<2x1x32xf32> to vector<1x1x32xf32>
    %259 = vector.shape_cast %258 : vector<1x1x32xf32> to vector<1x32xf32>
    %cst_80 = arith.constant dense<0.000000e+00> : vector<2x8xf32>
    %260 = vector.multi_reduction <add>, %255, %cst_80 [2] : vector<2x8x32xf32> to vector<2x8xf32>
    %261 = vector.shape_cast %260 : vector<2x8xf32> to vector<2x8x1xf32>
    %cst_81 = arith.constant 3.200000e+01 : f32
    %262 = vector.broadcast %cst_81 : f32 to vector<2x8x1xf32>
    %263 = arith.divf %261, %262 : vector<2x8x1xf32>
    %264 = vector.broadcast %263 : vector<2x8x1xf32> to vector<2x8x32xf32>
    %265 = arith.subf %255, %264 : vector<2x8x32xf32>
    %266 = arith.mulf %265, %265 : vector<2x8x32xf32>
    %cst_82 = arith.constant dense<0.000000e+00> : vector<2x8xf32>
    %267 = vector.multi_reduction <add>, %266, %cst_82 [2] : vector<2x8x32xf32> to vector<2x8xf32>
    %268 = vector.shape_cast %267 : vector<2x8xf32> to vector<2x8x1xf32>
    %cst_83 = arith.constant 3.100000e+01 : f32
    %269 = vector.broadcast %cst_83 : f32 to vector<2x8x1xf32>
    %270 = arith.divf %268, %269 : vector<2x8x1xf32>
    %271 = math.sqrt %270 : vector<2x8x1xf32>
    %272 = vector.broadcast %263 : vector<2x8x1xf32> to vector<2x8x32xf32>
    %273 = arith.subf %255, %272 : vector<2x8x32xf32>
    %274 = vector.shape_cast %257 : vector<1x32xf32> to vector<1x1x32xf32>
    %275 = vector.broadcast %274 : vector<1x1x32xf32> to vector<2x8x32xf32>
    %276 = arith.mulf %275, %273 : vector<2x8x32xf32>
    %cst_84 = arith.constant 9.99999997E-7 : f32
    %277 = vector.broadcast %cst_84 : f32 to vector<2x8x1xf32>
    %278 = arith.addf %271, %277 : vector<2x8x1xf32>
    %279 = vector.broadcast %278 : vector<2x8x1xf32> to vector<2x8x32xf32>
    %280 = arith.divf %276, %279 : vector<2x8x32xf32>
    %281 = vector.shape_cast %259 : vector<1x32xf32> to vector<1x1x32xf32>
    %282 = vector.broadcast %281 : vector<1x1x32xf32> to vector<2x8x32xf32>
    %283 = arith.addf %280, %282 : vector<2x8x32xf32>
    %284 = vector.shape_cast %283 : vector<2x8x32xf32> to vector<16x32xf32>
    %285 = vector.extract_strided_slice %15 {offsets = [1, 0, 0], sizes = [1, 32, 64], strides = [1, 1, 1]} : vector<2x32x64xf32> to vector<1x32x64xf32>
    %286 = vector.shape_cast %285 : vector<1x32x64xf32> to vector<32x64xf32>
    %cst_85 = arith.constant dense<0.000000e+00> : vector<16x64xf32>
    %287 = tpu.matmul %284, %286, %cst_85 {dimension_numbers = #tpu.dot_dimension_numbers<[1], [0], [0], [1], [0, 0, 1, 1], [], []>} : vector<16x32xf32>, vector<32x64xf32>, vector<16x64xf32> -> vector<16x64xf32>
    %288 = vector.extract_strided_slice %16 {offsets = [1, 0, 0], sizes = [1, 1, 64], strides = [1, 1, 1]} : vector<2x1x64xf32> to vector<1x1x64xf32>
    %289 = vector.shape_cast %288 : vector<1x1x64xf32> to vector<1x64xf32>
    %290 = vector.broadcast %289 : vector<1x64xf32> to vector<16x64xf32>
    %291 = arith.addf %287, %290 : vector<16x64xf32>
    %cst_86 = arith.constant 0.000000e+00 : f32
    %292 = vector.broadcast %cst_86 : f32 to vector<16x64xf32>
    %293 = arith.maximumf %291, %292 : vector<16x64xf32>
    %294 = vector.extract_strided_slice %17 {offsets = [1, 0, 0], sizes = [1, 64, 32], strides = [1, 1, 1]} : vector<2x64x32xf32> to vector<1x64x32xf32>
    %295 = vector.shape_cast %294 : vector<1x64x32xf32> to vector<64x32xf32>
    %cst_87 = arith.constant dense<0.000000e+00> : vector<16x32xf32>
    %296 = tpu.matmul %293, %295, %cst_87 {dimension_numbers = #tpu.dot_dimension_numbers<[1], [0], [0], [1], [0, 0, 1, 1], [], []>} : vector<16x64xf32>, vector<64x32xf32>, vector<16x32xf32> -> vector<16x32xf32>
    %297 = vector.extract_strided_slice %18 {offsets = [1, 0, 0], sizes = [1, 1, 32], strides = [1, 1, 1]} : vector<2x1x32xf32> to vector<1x1x32xf32>
    %298 = vector.shape_cast %297 : vector<1x1x32xf32> to vector<1x32xf32>
    %299 = vector.broadcast %298 : vector<1x32xf32> to vector<16x32xf32>
    %300 = arith.addf %296, %299 : vector<16x32xf32>
    %301 = vector.shape_cast %300 : vector<16x32xf32> to vector<2x8x32xf32>
    %302 = arith.addf %255, %301 : vector<2x8x32xf32>
    %c0_88 = arith.constant 0 : index
    %c0_89 = arith.constant 0 : index
    %303 = vector.load %arg15[%c0_88, %c0_89] : memref<1x32xf32, #tpu.memory_space<vmem>>, vector<1x32xf32>
    %c0_90 = arith.constant 0 : index
    %c0_91 = arith.constant 0 : index
    %304 = vector.load %arg16[%c0_90, %c0_91] : memref<1x32xf32, #tpu.memory_space<vmem>>, vector<1x32xf32>
    %cst_92 = arith.constant dense<0.000000e+00> : vector<2x8xf32>
    %305 = vector.multi_reduction <add>, %302, %cst_92 [2] : vector<2x8x32xf32> to vector<2x8xf32>
    %306 = vector.shape_cast %305 : vector<2x8xf32> to vector<2x8x1xf32>
    %cst_93 = arith.constant 3.200000e+01 : f32
    %307 = vector.broadcast %cst_93 : f32 to vector<2x8x1xf32>
    %308 = arith.divf %306, %307 : vector<2x8x1xf32>
    %309 = vector.broadcast %308 : vector<2x8x1xf32> to vector<2x8x32xf32>
    %310 = arith.subf %302, %309 : vector<2x8x32xf32>
    %311 = arith.mulf %310, %310 : vector<2x8x32xf32>
    %cst_94 = arith.constant dense<0.000000e+00> : vector<2x8xf32>
    %312 = vector.multi_reduction <add>, %311, %cst_94 [2] : vector<2x8x32xf32> to vector<2x8xf32>
    %313 = vector.shape_cast %312 : vector<2x8xf32> to vector<2x8x1xf32>
    %cst_95 = arith.constant 3.100000e+01 : f32
    %314 = vector.broadcast %cst_95 : f32 to vector<2x8x1xf32>
    %315 = arith.divf %313, %314 : vector<2x8x1xf32>
    %316 = math.sqrt %315 : vector<2x8x1xf32>
    %317 = vector.broadcast %308 : vector<2x8x1xf32> to vector<2x8x32xf32>
    %318 = arith.subf %302, %317 : vector<2x8x32xf32>
    %319 = vector.shape_cast %303 : vector<1x32xf32> to vector<1x1x32xf32>
    %320 = vector.broadcast %319 : vector<1x1x32xf32> to vector<2x8x32xf32>
    %321 = arith.mulf %320, %318 : vector<2x8x32xf32>
    %cst_96 = arith.constant 9.99999997E-7 : f32
    %322 = vector.broadcast %cst_96 : f32 to vector<2x8x1xf32>
    %323 = arith.addf %316, %322 : vector<2x8x1xf32>
    %324 = vector.broadcast %323 : vector<2x8x1xf32> to vector<2x8x32xf32>
    %325 = arith.divf %321, %324 : vector<2x8x32xf32>
    %326 = vector.shape_cast %304 : vector<1x32xf32> to vector<1x1x32xf32>
    %327 = vector.broadcast %326 : vector<1x1x32xf32> to vector<2x8x32xf32>
    %328 = arith.addf %325, %327 : vector<2x8x32xf32>
    %329 = vector.shape_cast %328 : vector<2x8x32xf32> to vector<2x256xf32>
    %330 = arith.truncf %329 : vector<2x256xf32> to vector<2x256xbf16>
    tpu.wait_dma2 semaphore(%arg22 : memref<!tpu.dma_semaphore, #tpu.memory_space<semaphore_mem>>) src(%arg18 : memref<256x2560xbf16, #tpu.memory_space<any>>) dst(%arg21 : memref<256x2560xbf16, #tpu.memory_space<vmem>>)
    %c0_97 = arith.constant 0 : index
    %c0_98 = arith.constant 0 : index
    %331 = vector.load %arg21[%c0_97, %c0_98] : memref<256x2560xbf16, #tpu.memory_space<vmem>>, vector<256x2560xbf16>
    %cst_99 = arith.constant dense<0.000000e+00> : vector<2x2560xf32>
    %332 = tpu.matmul %330, %331, %cst_99 {dimension_numbers = #tpu.dot_dimension_numbers<[1], [0], [0], [1], [0, 0, 1, 1], [], []>} : vector<2x256xbf16>, vector<256x2560xbf16>, vector<2x2560xf32> -> vector<2x2560xf32>
    %c0_100 = arith.constant 0 : index
    %c0_101 = arith.constant 0 : index
    %333 = vector.load %arg17[%c0_100, %c0_101] : memref<1x2560xf32, #tpu.memory_space<vmem>>, vector<1x2560xf32>
    %334 = vector.broadcast %333 : vector<1x2560xf32> to vector<2x2560xf32>
    %335 = arith.addf %332, %334 : vector<2x2560xf32>
    %c0_102 = arith.constant 0 : index
    %c0_103 = arith.constant 0 : index
    %336 = vector.load %arg19[%c0_102, %c0_103] : memref<2x2560xf32, #tpu.memory_space<vmem>>, vector<2x2560xf32>
    tpu.vector_store %arg19[%c0_102, %c0_103], %335 {strides = array<i32>} : memref<2x2560xf32, #tpu.memory_space<vmem>>, vector<2x2560xf32>,
    return
  }
}

</mosaic_0001>

<bundles_post_ra>
// kernel: tpu_custom_call.1
= control target key start
LH: loop header
LB: loop body
LE: loop exit
PB: predicated region body
PF: predicated region fallthrough
CT: control target
= control target key end

     0   :  { %s7622_s0 = inlined_call_operand.hbm [shape: f32[2,16], index: 0, kind: input, shape index: {}]   ;;  %s7623_s1 = inlined_call_operand.hbm [shape: f32[16,256], index: 1, kind: input, shape index: {}]   ;;  %s7624_s2 = inlined_call_operand.hbm [shape: f32[1,256], index: 2, kind: input, shape index: {}]   ;;  %s7625_s3 = inlined_call_operand.hbm [shape: f32[2,1,32], index: 3, kind: input, shape index: {}]   ;;  %s7626_s4 = inlined_call_operand.hbm [shape: f32[2,1,32], index: 4, kind: input, shape index: {}]   ;;  %s7627_s5 = inlined_call_operand.hbm [shape: f32[2,32,96], index: 5, kind: input, shape index: {}]   ;;  %s7628_s6 = inlined_call_operand.hbm [shape: f32[2,1,96], index: 6, kind: input, shape index: {}]   ;;  %s7629_s7 = inlined_call_operand.hbm [shape: f32[2,32,32], index: 7, kind: input, shape index: {}]   ;;  %s7630_s8 = inlined_call_operand.hbm [shape: f32[2,1,32], index: 8, kind: input, shape index: {}]   ;;  %s7631_s9 = inlined_call_operand.hbm [shape: f32[2,1,32], index: 9, kind: input, shape index: {}]   ;;  %s7632_s10 = inlined_call_operand.hbm [shape: f32[2,1,32], index: 10, kind: input, shape index: {}]   ;;  %s7633_s11 = inlined_call_operand.hbm [shape: f32[2,32,64], index: 11, kind: input, shape index: {}]   ;;  %s7634_s12 = inlined_call_operand.hbm [shape: f32[2,1,64], index: 12, kind: input, shape index: {}]   ;;  %s7635_s13 = inlined_call_operand.vmem [shape: f32[2,64,32], index: 13, kind: input, shape index: {}]   ;;  %s7636_s14 = inlined_call_operand.hbm [shape: f32[2,1,32], index: 14, kind: input, shape index: {}]   ;;  %s7637_s15 = inlined_call_operand.hbm [shape: f32[1,32], index: 15, kind: input, shape index: {}]   ;;  %s7638_s16 = inlined_call_operand.hbm [shape: f32[1,32], index: 16, kind: input, shape index: {}]   ;;  %s7639_s17 = inlined_call_operand.hbm [shape: f32[1,2560], index: 17, kind: input, shape index: {}]   ;;  %s7640_s18 = inlined_call_operand.hbm [shape: bf16[256,2560], index: 18, kind: input, shape index: {}]   ;;  %s7641_s19 = inlined_call_operand.hbm [shape: f32[2,2560], index: 19, kind: output, shape index: {0}]   ;;  %s7642_s20 = inlined_call_operand.hbm [shape: f32[2,8,8,8], index: 20, kind: output, shape index: {1}]  }
   0x1   :  { %7652 = sst [smem:[#allocation48_spill]] %s7622_s0 }
   0x2   :  { %7653 = sst [smem:[#allocation49_spill]] %s7623_s1 }
   0x3   :  { %7654 = sst [smem:[#allocation50_spill]] %s7624_s2 }
   0x4   :  { %7655 = sst [smem:[#allocation51_spill]] %s7625_s3 }
   0x5   :  { %7656 = sst [smem:[#allocation52_spill]] %s7626_s4 }
   0x6   :  { %7657 = sst [smem:[#allocation53_spill]] %s7641_s19 }
   0x7   :  { %7658 = sst [smem:[#allocation54_spill]] %s7642_s20 }
   0x8   :  { %26 = vsyncpa [#allocation5], 0 }
   0x9   :  { %27 = vsyncpa [#allocation8], 0 }
   0xa   :  { %28 = vsyncpa [#allocation11], 0 }
   0xb   :  { %29 = vsyncpa [#allocation14], 0 }
   0xc   :  { %30 = vsyncpa [#allocation17], 0 }
   0xd   :  { %31 = vsyncpa [#allocation20], 0 }
   0xe   :  { %32 = vsyncpa [#allocation23], 0 }
   0xf   :  { %33 = vsyncpa [#allocation26], 0 }
  0x10   :  { %34 = vsyncpa [#allocation29], 0 }
  0x11   :  { %35 = vsyncpa [#allocation6], 0 }
  0x12   :  { %36 = vsyncpa [#allocation33], 0  ;;  %s6519_s1 = smov [#allocation7]   ;;  %s7659_s2 = sld [smem:[#allocation49_spill]] }
  0x13   :  { %s52_s22 = sshll.u32 %s6519_s1, 4  ;;  %s53_s22 = int_to_ptr.vmem [resolvable:$true] %s52_s22 }
  0x18   :  { %s6077_s25 = scalar_lea.hbm %s7659_s2, 512 }
  0x19   :  { %p6078_p0 = scmp.ne.s32.totalorder %s7659_s2, %s6077_s25  ;;  %p6081_p1 = scmp.lt.u32.totalorder %s6077_s25, %s7659_s2 }
  0x1b   :  { %p6083_p2 = pnand %p6081_p1, %p6078_p0 }
  0x1d   :  { %6086 = shalt.err (!%p6083_p2)
}
  0x1e   :  { %s6087_s4 = scalar_lea.vmem %s53_s22, 512  ;;  %p6092_p4 = scmp.lt.s32.totalorder %s53_s22, %s53_s22 }
  0x1f   :  { %p6088_p3 = scmp.ne.s32.totalorder %s53_s22, %s6087_s4  ;;  %p6093_p5 = scmp.lt.s32.totalorder %s6087_s4, %s6087_s4 }
  0x21   :  { %p6094_p6 = por %p6093_p5, %p6092_p4 }
  0x23   :  { %p6095_p7 = pnand %p6094_p6, %p6088_p3 }
  0x25   :  { %6098 = shalt.err (!%p6095_p7)
}
  0x26   :  { %s6520_s29 = smov 256   ;;  %s7650_s30 = smov 16  }
  0x27   :  { %58 = dma.hbm_to_vmem [thread:$0]  %s7659_s2, 512, %s53_s22, [#allocation8], %s6520_s29, %s6520_s29, %s7650_s30  }
  0x28   :  { %s6522_s1 = smov [#allocation10]   ;;  %s7660_s3 = sld [smem:[#allocation51_spill]] }
  0x29   :  { %s74_s23 = sshll.u32 %s6522_s1, 4  ;;  %s75_s23 = int_to_ptr.vmem [resolvable:$true] %s74_s23 }
  0x2e   :  { %s6099_s26 = scalar_lea.hbm %s7660_s3, 32 }
  0x2f   :  { %p6100_p8 = scmp.ne.s32.totalorder %s7660_s3, %s6099_s26  ;;  %p6103_p9 = scmp.lt.u32.totalorder %s6099_s26, %s7660_s3 }
  0x31   :  { %p6105_p10 = pnand %p6103_p9, %p6100_p8 }
  0x33   :  { %6108 = shalt.err (!%p6105_p10)
}
  0x34   :  { %s6109_s20 = scalar_lea.vmem %s75_s23, 32  ;;  %p6114_p12 = scmp.lt.s32.totalorder %s75_s23, %s75_s23 }
  0x35   :  { %p6110_p11 = scmp.ne.s32.totalorder %s75_s23, %s6109_s20  ;;  %p6115_p13 = scmp.lt.s32.totalorder %s6109_s20, %s6109_s20 }
  0x37   :  { %p6116_p0 = por %p6115_p13, %p6114_p12 }
  0x39   :  { %p6117_p1 = pnand %p6116_p0, %p6110_p11 }
  0x3b   :  { %6120 = shalt.err (!%p6117_p1)
}
  0x3c   :  { %s6523_s22 = smov 1   ;;  %s6524_s0 = smov [#allocation13]  }
  0x3d   :  { %80 = dma.hbm_to_vmem [thread:$0]  %s7660_s3, 32, %s75_s23, [#allocation11], %s7650_s30, %s7650_s30, %s6523_s22  }
  0x3e   :  { %s98_s19 = sshll.u32 %s6524_s0, 4  ;;  %s6121_s24 = scalar_lea.hbm %s7627_s5, 1024  ;;  %s99_s19 = int_to_ptr.vmem [resolvable:$true] %s98_s19 }
  0x3f   :  { %p6122_p2 = scmp.ne.s32.totalorder %s7627_s5, %s6121_s24  ;;  %p6125_p3 = scmp.lt.u32.totalorder %s6121_s24, %s7627_s5 }
  0x41   :  { %p6127_p4 = pnand %p6125_p3, %p6122_p2 }
  0x43   :  { %6130 = shalt.err (!%p6127_p4)
}
  0x44   :  { %s6131_s28 = scalar_lea.vmem %s99_s19, 1024  ;;  %p6136_p6 = scmp.lt.s32.totalorder %s99_s19, %s99_s19 }
  0x45   :  { %p6132_p5 = scmp.ne.s32.totalorder %s99_s19, %s6131_s28  ;;  %p6137_p7 = scmp.lt.s32.totalorder %s6131_s28, %s6131_s28 }
  0x47   :  { %p6138_p8 = por %p6137_p7, %p6136_p6 }
  0x49   :  { %p6139_p9 = pnand %p6138_p8, %p6132_p5 }
  0x4b   :  { %6142 = shalt.err (!%p6139_p9)
}
  0x4c   :  { %s6525_s23 = smov 128   ;;  %s6526_s3 = smov 8  }
  0x4d   :  { %104 = dma.hbm_to_vmem [thread:$0]  %s7627_s5, 1024, %s99_s19, [#allocation14], %s6525_s23, %s6525_s23, %s6526_s3  }
  0x4e   :  { %s6527_s29 = smov [#allocation16]   ;;  %s6528_s21 = smov [#allocation19]  }
  0x4f   :  { %s122_s0 = sshll.u32 %s6527_s29, 4  ;;  %s146_s1 = sshll.u32 %s6528_s21, 4  ;;  %s123_s0 = int_to_ptr.vmem [resolvable:$true] %s122_s0  ;;  %s6710_s1 = int_to_ptr.vmem [resolvable:$true] %s146_s1 }
  0x50   :  { %s6143_s20 = scalar_lea.hbm %s7629_s7, 1024 }
  0x51   :  { %p6144_p10 = scmp.ne.s32.totalorder %s7629_s7, %s6143_s20  ;;  %p6147_p11 = scmp.lt.u32.totalorder %s6143_s20, %s7629_s7 }
  0x53   :  { %p6149_p12 = pnand %p6147_p11, %p6144_p10 }
  0x55   :  { %6152 = shalt.err (!%p6149_p12)
}
  0x56   :  { %s6153_s5 = scalar_lea.vmem %s123_s0, 1024  ;;  %p6158_p0 = scmp.lt.s32.totalorder %s123_s0, %s123_s0 }
  0x57   :  { %p6154_p13 = scmp.ne.s32.totalorder %s123_s0, %s6153_s5  ;;  %p6159_p1 = scmp.lt.s32.totalorder %s6153_s5, %s6153_s5 }
  0x59   :  { %p6160_p2 = por %p6159_p1, %p6158_p0 }
  0x5b   :  { %p6161_p3 = pnand %p6160_p2, %p6154_p13 }
  0x5d   :  { %6164 = shalt.err (!%p6161_p3)
}
  0x5e   :  { %128 = dma.hbm_to_vmem [thread:$0]  %s7629_s7, 1024, %s123_s0, [#allocation17], %s6525_s23, %s6525_s23, %s6526_s3  }
  0x5f   :  { %s6165_s30 = scalar_lea.hbm %s7631_s9, 32 }
  0x60   :  { %p6166_p4 = scmp.ne.s32.totalorder %s7631_s9, %s6165_s30  ;;  %p6169_p5 = scmp.lt.u32.totalorder %s6165_s30, %s7631_s9 }
  0x62   :  { %p6171_p6 = pnand %p6169_p5, %p6166_p4 }
  0x64   :  { %6174 = shalt.err (!%p6171_p6)
}
  0x65   :  { %s6175_s26 = scalar_lea.vmem %s6710_s1, 32  ;;  %p6180_p8 = scmp.lt.s32.totalorder %s6710_s1, %s6710_s1 }
  0x66   :  { %p6176_p7 = scmp.ne.s32.totalorder %s6710_s1, %s6175_s26  ;;  %p6181_p9 = scmp.lt.s32.totalorder %s6175_s26, %s6175_s26 }
  0x68   :  { %p6182_p10 = por %p6181_p9, %p6180_p8 }
  0x6a   :  { %p6183_p11 = pnand %p6182_p10, %p6176_p7 }
  0x6c   :  { %6186 = shalt.err (!%p6183_p11)
}
  0x6d   :  { %s7661_s7 = smov 16   ;;  %s6529_s28 = smov [#allocation22]  }
  0x6e   :  { %152 = dma.hbm_to_vmem [thread:$0]  %s7631_s9, 32, %s6710_s1, [#allocation20], %s7661_s7, %s7661_s7, %s6523_s22  }
  0x6f   :  { %s170_s5 = sshll.u32 %s6529_s28, 4  ;;  %s6530_s19 = smov [#allocation25]   ;;  %s171_s5 = int_to_ptr.vmem [resolvable:$true] %s170_s5 }
  0x70   :  { %s196_s4 = sshll.u32 %s6530_s19, 4  ;;  %s6187_s30 = scalar_lea.hbm %s7633_s11, 1024  ;;  %s6747_s4 = int_to_ptr.vmem [resolvable:$true] %s196_s4 }
  0x71   :  { %p6188_p12 = scmp.ne.s32.totalorder %s7633_s11, %s6187_s30  ;;  %p6191_p13 = scmp.lt.u32.totalorder %s6187_s30, %s7633_s11 }
  0x73   :  { %p6193_p0 = pnand %p6191_p13, %p6188_p12 }
  0x75   :  { %6196 = shalt.err (!%p6193_p0)
}
  0x76   :  { %s6197_s9 = scalar_lea.vmem %s171_s5, 1024  ;;  %p6202_p2 = scmp.lt.s32.totalorder %s171_s5, %s171_s5 }
  0x77   :  { %p6198_p1 = scmp.ne.s32.totalorder %s171_s5, %s6197_s9  ;;  %p6203_p3 = scmp.lt.s32.totalorder %s6197_s9, %s6197_s9 }
  0x79   :  { %p6204_p4 = por %p6203_p3, %p6202_p2 }
  0x7b   :  { %p6205_p5 = pnand %p6204_p4, %p6198_p1 }
  0x7d   :  { %6208 = shalt.err (!%p6205_p5)
}
  0x7e   :  { %176 = dma.hbm_to_vmem [thread:$0]  %s7633_s11, 1024, %s171_s5, [#allocation23], %s6525_s23, %s6525_s23, %s6526_s3  }
  0x7f   :  { %s6209_s28 = scalar_lea.hbm %s7636_s14, 32 }
  0x80   :  { %p6210_p6 = scmp.ne.s32.totalorder %s7636_s14, %s6209_s28  ;;  %p6213_p7 = scmp.lt.u32.totalorder %s6209_s28, %s7636_s14 }
  0x82   :  { %p6215_p8 = pnand %p6213_p7, %p6210_p6 }
  0x84   :  { %6218 = shalt.err (!%p6215_p8)
}
  0x85   :  { %s6219_s21 = scalar_lea.vmem %s6747_s4, 32  ;;  %p6224_p10 = scmp.lt.s32.totalorder %s6747_s4, %s6747_s4 }
  0x86   :  { %p6220_p9 = scmp.ne.s32.totalorder %s6747_s4, %s6219_s21  ;;  %p6225_p11 = scmp.lt.s32.totalorder %s6219_s21, %s6219_s21 }
  0x88   :  { %p6226_p12 = por %p6225_p11, %p6224_p10 }
  0x8a   :  { %p6227_p13 = pnand %p6226_p12, %p6220_p9 }
  0x8c   :  { %6230 = shalt.err (!%p6227_p13)
}
  0x8d   :  { %202 = dma.hbm_to_vmem [thread:$0]  %s7636_s14, 32, %s6747_s4, [#allocation26], %s7661_s7, %s7661_s7, %s6523_s22  }
  0x8e   :  { %s6531_s24 = smov [#allocation28]   ;;  %s6532_s20 = smov [#allocation4]  }
  0x8f   :  { %s219_s25 = sshll.u32 %s6531_s24, 4  ;;  %s43_s9 = sshll.u32 %s6532_s20, 4  ;;  %s220_s25 = int_to_ptr.vmem [resolvable:$true] %s219_s25  ;;  %s44_s9 = int_to_ptr.vmem [resolvable:$true] %s43_s9 }
  0x90   :  { %s6231_s0 = scalar_lea.hbm %s7638_s16, 16 }
  0x91   :  { %p6232_p0 = scmp.ne.s32.totalorder %s7638_s16, %s6231_s0  ;;  %p6235_p1 = scmp.lt.u32.totalorder %s6231_s0, %s7638_s16 }
  0x93   :  { %p6237_p2 = pnand %p6235_p1, %p6232_p0 }
  0x95   :  { %6240 = shalt.err (!%p6237_p2)
}
  0x96   :  { %s6241_s14 = scalar_lea.vmem %s220_s25, 16  ;;  %s6245_s4 = scalar_lea.vmem %s220_s25, 32 }
  0x97   :  { %p6242_p3 = scmp.ne.s32.totalorder %s220_s25, %s6241_s14  ;;  %p6246_p4 = scmp.lt.s32.totalorder %s220_s25, %s220_s25 }
  0x98   :  { %p6247_p5 = scmp.lt.s32.totalorder %s6245_s4, %s6241_s14 }
  0x9a   :  { %p6248_p6 = por %p6247_p5, %p6246_p4 }
  0x9c   :  { %p6249_p7 = pnand %p6248_p6, %p6242_p3 }
  0x9e   :  { %6252 = shalt.err (!%p6249_p7)
}
  0x9f   :  { %222 = dma.hbm_to_vmem [thread:$0]  %s7638_s16, 16, %s220_s25, [#allocation29]  }
  0xa0   :  { %s7662_s5 = sld [smem:[#allocation48_spill]] }
  0xa6   :  { %s6253_s24 = scalar_lea.hbm %s7662_s5, 32 }
  0xa7   :  { %p6254_p8 = scmp.ne.s32.totalorder %s7662_s5, %s6253_s24  ;;  %p6257_p9 = scmp.lt.u32.totalorder %s6253_s24, %s7662_s5 }
  0xa9   :  { %p6259_p10 = pnand %p6257_p9, %p6254_p8 }
  0xab   :  { %6262 = shalt.err (!%p6259_p10)
}
  0xac   :  { %s6263_s27 = scalar_lea.vmem %s44_s9, 32  ;;  %p6268_p12 = scmp.lt.s32.totalorder %s44_s9, %s44_s9 }
  0xad   :  { %p6264_p11 = scmp.ne.s32.totalorder %s44_s9, %s6263_s27  ;;  %p6269_p13 = scmp.lt.s32.totalorder %s6263_s27, %s6263_s27 }
  0xaf   :  { %p6270_p0 = por %p6269_p13, %p6268_p12 }
  0xb1   :  { %p6271_p1 = pnand %p6270_p0, %p6264_p11 }
  0xb3   :  { %6274 = shalt.err (!%p6271_p1)
}
  0xb4   :  { %46 = dma.hbm_to_vmem [thread:$0]  %s7662_s5, 32, %s44_s9, [#allocation5]  }
  0xb5   :  { %s6533_s28 = smov [#allocation9]   ;;  %s6534_s2 = smov [#allocation12]  }
  0xb6   :  { %s65_s19 = sshll.u32 %s6533_s28, 4  ;;  %s86_s14 = sshll.u32 %s6534_s2, 4  ;;  %s66_s19 = int_to_ptr.vmem [resolvable:$true] %s65_s19  ;;  %s6808_s14 = int_to_ptr.vmem [resolvable:$true] %s86_s14 }
  0xb7   :  { %s7663_s30 = sld [smem:[#allocation50_spill]] }
  0xbd   :  { %s6275_s21 = scalar_lea.hbm %s7663_s30, 32 }
  0xbe   :  { %p6276_p2 = scmp.ne.s32.totalorder %s7663_s30, %s6275_s21  ;;  %p6279_p3 = scmp.lt.u32.totalorder %s6275_s21, %s7663_s30 }
  0xc0   :  { %p6281_p4 = pnand %p6279_p3, %p6276_p2 }
  0xc2   :  { %6284 = shalt.err (!%p6281_p4)
}
  0xc3   :  { %s6285_s9 = scalar_lea.vmem %s66_s19, 32  ;;  %p6290_p6 = scmp.lt.s32.totalorder %s66_s19, %s66_s19 }
  0xc4   :  { %p6286_p5 = scmp.ne.s32.totalorder %s66_s19, %s6285_s9  ;;  %p6291_p7 = scmp.lt.s32.totalorder %s6285_s9, %s6285_s9 }
  0xc6   :  { %p6292_p8 = por %p6291_p7, %p6290_p6 }
  0xc8   :  { %p6293_p9 = pnand %p6292_p8, %p6286_p5 }
  0xca   :  { %6296 = shalt.err (!%p6293_p9)
}
  0xcb   :  { %68 = dma.hbm_to_vmem [thread:$0]  %s7663_s30, 32, %s66_s19, [#allocation8]  }
  0xcc   :  { %s7664_s16 = sld [smem:[#allocation52_spill]] }
  0xd2   :  { %s6297_s25 = scalar_lea.hbm %s7664_s16, 32 }
  0xd3   :  { %p6298_p10 = scmp.ne.s32.totalorder %s7664_s16, %s6297_s25  ;;  %p6301_p11 = scmp.lt.u32.totalorder %s6297_s25, %s7664_s16 }
  0xd5   :  { %p6303_p12 = pnand %p6301_p11, %p6298_p10 }
  0xd7   :  { %6306 = shalt.err (!%p6303_p12)
}
  0xd8   :  { %s6307_s21 = scalar_lea.vmem %s6808_s14, 32  ;;  %p6312_p0 = scmp.lt.s32.totalorder %s6808_s14, %s6808_s14 }
  0xd9   :  { %p6308_p13 = scmp.ne.s32.totalorder %s6808_s14, %s6307_s21  ;;  %p6313_p1 = scmp.lt.s32.totalorder %s6307_s21, %s6307_s21 }
  0xdb   :  { %p6314_p2 = por %p6313_p1, %p6312_p0 }
  0xdd   :  { %p6315_p3 = pnand %p6314_p2, %p6308_p13 }
  0xdf   :  { %6318 = shalt.err (!%p6315_p3)
}
  0xe0   :  { %92 = dma.hbm_to_vmem [thread:$0]  %s7664_s16, 32, %s6808_s14, [#allocation11], %s7661_s7, %s7661_s7, %s6523_s22  }
  0xe1   :  { %s6535_s11 = smov [#allocation15]   ;;  %s6536_s20 = smov [#allocation18]  }
  0xe2   :  { %s110_s24 = sshll.u32 %s6535_s11, 4  ;;  %s134_s1 = sshll.u32 %s6536_s20, 4  ;;  %s111_s24 = int_to_ptr.vmem [resolvable:$true] %s110_s24  ;;  %s6842_s1 = int_to_ptr.vmem [resolvable:$true] %s134_s1 }
  0xe3   :  { %s6319_s26 = scalar_lea.hbm %s7628_s6, 32 }
  0xe4   :  { %p6320_p4 = scmp.ne.s32.totalorder %s7628_s6, %s6319_s26  ;;  %p6323_p5 = scmp.lt.u32.totalorder %s6319_s26, %s7628_s6 }
  0xe6   :  { %p6325_p6 = pnand %p6323_p5, %p6320_p4 }
  0xe8   :  { %6328 = shalt.err (!%p6325_p6)
}
  0xe9   :  { %s6329_s14 = scalar_lea.vmem %s111_s24, 32  ;;  %p6334_p8 = scmp.lt.s32.totalorder %s111_s24, %s111_s24 }
  0xea   :  { %p6330_p7 = scmp.ne.s32.totalorder %s111_s24, %s6329_s14  ;;  %p6335_p9 = scmp.lt.s32.totalorder %s6329_s14, %s6329_s14 }
  0xec   :  { %p6336_p10 = por %p6335_p9, %p6334_p8 }
  0xee   :  { %p6337_p11 = pnand %p6336_p10, %p6330_p7 }
  0xf0   :  { %6340 = shalt.err (!%p6337_p11)
}
  0xf1   :  { %116 = dma.hbm_to_vmem [thread:$0]  %s7628_s6, 32, %s111_s24, [#allocation14], %s7661_s7, %s7661_s7, %s6523_s22  }
  0xf2   :  { %s6341_s21 = scalar_lea.hbm %s7630_s8, 32 }
  0xf3   :  { %p6342_p12 = scmp.ne.s32.totalorder %s7630_s8, %s6341_s21  ;;  %p6345_p13 = scmp.lt.u32.totalorder %s6341_s21, %s7630_s8 }
  0xf5   :  { %p6347_p0 = pnand %p6345_p13, %p6342_p12 }
  0xf7   :  { %6350 = shalt.err (!%p6347_p0)
}
  0xf8   :  { %s6351_s9 = scalar_lea.vmem %s6842_s1, 32  ;;  %p6356_p2 = scmp.lt.s32.totalorder %s6842_s1, %s6842_s1 }
  0xf9   :  { %p6352_p1 = scmp.ne.s32.totalorder %s6842_s1, %s6351_s9  ;;  %p6357_p3 = scmp.lt.s32.totalorder %s6351_s9, %s6351_s9 }
  0xfb   :  { %p6358_p4 = por %p6357_p3, %p6356_p2 }
  0xfd   :  { %p6359_p5 = pnand %p6358_p4, %p6352_p1 }
  0xff   :  { %6362 = shalt.err (!%p6359_p5)
}
 0x100   :  { %140 = dma.hbm_to_vmem [thread:$0]  %s7630_s8, 32, %s6842_s1, [#allocation17], %s7661_s7, %s7661_s7, %s6523_s22  }
 0x101   :  { %s6537_s5 = smov [#allocation21]   ;;  %s6538_s0 = smov [#allocation24]  }
 0x102   :  { %s158_s26 = sshll.u32 %s6537_s5, 4  ;;  %s182_s27 = sshll.u32 %s6538_s0, 4  ;;  %s159_s26 = int_to_ptr.vmem [resolvable:$true] %s158_s26  ;;  %s6879_s27 = int_to_ptr.vmem [resolvable:$true] %s182_s27 }
 0x103   :  { %s6363_s14 = scalar_lea.hbm %s7632_s10, 32 }
 0x104   :  { %p6364_p6 = scmp.ne.s32.totalorder %s7632_s10, %s6363_s14  ;;  %p6367_p7 = scmp.lt.u32.totalorder %s6363_s14, %s7632_s10 }
 0x106   :  { %p6369_p8 = pnand %p6367_p7, %p6364_p6 }
 0x108   :  { %6372 = shalt.err (!%p6369_p8)
}
 0x109   :  { %s6373_s8 = scalar_lea.vmem %s159_s26, 32  ;;  %p6378_p10 = scmp.lt.s32.totalorder %s159_s26, %s159_s26 }
 0x10a   :  { %p6374_p9 = scmp.ne.s32.totalorder %s159_s26, %s6373_s8  ;;  %p6379_p11 = scmp.lt.s32.totalorder %s6373_s8, %s6373_s8 }
 0x10c   :  { %p6380_p12 = por %p6379_p11, %p6378_p10 }
 0x10e   :  { %p6381_p13 = pnand %p6380_p12, %p6374_p9 }
 0x110   :  { %6384 = shalt.err (!%p6381_p13)
}
 0x111   :  { %164 = dma.hbm_to_vmem [thread:$0]  %s7632_s10, 32, %s159_s26, [#allocation20], %s7661_s7, %s7661_s7, %s6523_s22  }
 0x112   :  { %s6385_s11 = scalar_lea.hbm %s7634_s12, 32 }
 0x113   :  { %p6386_p0 = scmp.ne.s32.totalorder %s7634_s12, %s6385_s11  ;;  %p6389_p1 = scmp.lt.u32.totalorder %s6385_s11, %s7634_s12 }
 0x115   :  { %p6391_p2 = pnand %p6389_p1, %p6386_p0 }
 0x117   :  { %6394 = shalt.err (!%p6391_p2)
}
 0x118   :  { %s6395_s5 = scalar_lea.vmem %s6879_s27, 32  ;;  %p6400_p4 = scmp.lt.s32.totalorder %s6879_s27, %s6879_s27 }
 0x119   :  { %p6396_p3 = scmp.ne.s32.totalorder %s6879_s27, %s6395_s5  ;;  %p6401_p5 = scmp.lt.s32.totalorder %s6395_s5, %s6395_s5 }
 0x11b   :  { %p6402_p6 = por %p6401_p5, %p6400_p4 }
 0x11d   :  { %p6403_p7 = pnand %p6402_p6, %p6396_p3 }
 0x11f   :  { %6406 = shalt.err (!%p6403_p7)
}
 0x120   :  { %188 = dma.hbm_to_vmem [thread:$0]  %s7634_s12, 32, %s6879_s27, [#allocation23], %s7661_s7, %s7661_s7, %s6523_s22  }
 0x121   :  { %s6539_s0 = smov [#allocation27]   ;;  %s6540_s28 = smov [#allocation30]  }
 0x122   :  { %s209_s25 = sshll.u32 %s6539_s0, 4  ;;  %s229_s14 = sshll.u32 %s6540_s28, 4  ;;  %s210_s25 = int_to_ptr.vmem [resolvable:$true] %s209_s25  ;;  %s230_s14 = int_to_ptr.vmem [resolvable:$true] %s229_s14 }
 0x123   :  { %s6407_s4 = scalar_lea.hbm %s7637_s15, 16 }
 0x124   :  { %p6408_p8 = scmp.ne.s32.totalorder %s7637_s15, %s6407_s4  ;;  %p6411_p9 = scmp.lt.u32.totalorder %s6407_s4, %s7637_s15 }
 0x126   :  { %p6413_p10 = pnand %p6411_p9, %p6408_p8 }
 0x128   :  { %6416 = shalt.err (!%p6413_p10)
}
 0x129   :  { %s6417_s12 = scalar_lea.vmem %s210_s25, 16  ;;  %s6421_s22 = scalar_lea.vmem %s210_s25, 32 }
 0x12a   :  { %p6418_p11 = scmp.ne.s32.totalorder %s210_s25, %s6417_s12  ;;  %p6422_p12 = scmp.lt.s32.totalorder %s210_s25, %s210_s25 }
 0x12b   :  { %p6423_p13 = scmp.lt.s32.totalorder %s6421_s22, %s6417_s12 }
 0x12d   :  { %p6424_p0 = por %p6423_p13, %p6422_p12 }
 0x12f   :  { %p6425_p1 = pnand %p6424_p0, %p6418_p11 }
 0x131   :  { %6428 = shalt.err (!%p6425_p1)
}
 0x132   :  { %212 = dma.hbm_to_vmem [thread:$0]  %s7637_s15, 16, %s210_s25, [#allocation26]  }
 0x133   :  { %s6429_s20 = scalar_lea.hbm %s7639_s17, 320 }
 0x134   :  { %p6430_p2 = scmp.ne.s32.totalorder %s7639_s17, %s6429_s20  ;;  %p6433_p3 = scmp.lt.u32.totalorder %s6429_s20, %s7639_s17 }
 0x136   :  { %p6435_p4 = pnand %p6433_p3, %p6430_p2 }
 0x138   :  { %6438 = shalt.err (!%p6435_p4)
}
 0x139   :  { %s6439_s10 = scalar_lea.vmem %s230_s14, 320  ;;  %p6444_p6 = scmp.lt.s32.totalorder %s230_s14, %s230_s14 }
 0x13a   :  { %p6440_p5 = scmp.ne.s32.totalorder %s230_s14, %s6439_s10  ;;  %p6445_p7 = scmp.lt.s32.totalorder %s6439_s10, %s6439_s10 }
 0x13c   :  { %p6446_p8 = por %p6445_p7, %p6444_p6 }
 0x13e   :  { %p6447_p9 = pnand %p6446_p8, %p6440_p5 }
 0x140   :  { %6450 = shalt.err (!%p6447_p9)
}
 0x141   :  { %232 = dma.hbm_to_vmem [thread:$0]  %s7639_s17, 320, %s230_s14, [#allocation29]  }
 0x142   :  { %6495 = dma.done.wait [#allocation5], 32  }
 0x143   :  { %6496 = vsyncadd [#allocation5], 4294967264 }
 0x144   :  { %6497 = dma.done.wait [#allocation8], 544  }
 0x145   :  { %6498 = vsyncadd [#allocation8], 4294966752 }
 0x146   :  { %6499 = dma.done.wait [#allocation11], 64  }
 0x147   :  { %6500 = vsyncadd [#allocation11], 4294967232 }
 0x148   :  { %6501 = dma.done.wait [#allocation14], 1056  }
 0x149   :  { %6502 = vsyncadd [#allocation14], 4294966240 }
 0x14a   :  { %6503 = dma.done.wait [#allocation17], 1056  }
 0x14b   :  { %6504 = vsyncadd [#allocation17], 4294966240 }
 0x14c   :  { %6505 = dma.done.wait [#allocation20], 64  }
 0x14d   :  { %6506 = vsyncadd [#allocation20], 4294967232 }
 0x14e   :  { %6507 = dma.done.wait [#allocation23], 1056  }
 0x14f   :  { %6508 = vsyncadd [#allocation23], 4294966240 }
 0x150   :  { %6509 = dma.done.wait [#allocation26], 48  }
 0x151   :  { %6510 = vsyncadd [#allocation26], 4294967248 }
 0x152   :  { %6511 = dma.done.wait [#allocation29], 336  }
 0x153   :  { %6512 = vsyncadd [#allocation29], 4294966960  ;;  %s288_s0 = sld [smem:[#allocation0]]   ;;  %s6541_s17 = smov 2560   ;;  %v6542_v0 = vmov 0.0   ;;  %vm336_vm0 = vcmask 130048   ;;  %v326_v8 = vlaneseq }
 0x154   :  { %300 = sst [smem:[#allocation35]] %s6541_s17  ;;  %404 = vmatprep.mubr.f32.mxu0 %v6542_v0  ;;  %5588 = vmatprep.subr.mxu1 %v6542_v0  ;;  %s6543_s25 = smov 20   ;;  %v6553_v19 = vmov 1983009808   ;;  %v6554_v24 = vmov 1934713408  }
 0x155   :  { %302 = sst [smem:[#allocation35 + $0x1]] %s6541_s17  ;;  %s6544_s28 = smov 64   ;;  %v6949_v9 = vshrl.u32 %v326_v8, 7  ;;  %v433_v20 = vunpack.c.l.s4 %v6553_v19  ;;  %v465_v25 = vunpack.c.l.s4 %v6554_v24  ;;  %vm537_vm1 = vcmask 261120  }
 0x156   :  { %304 = sst [smem:[#allocation35 + $0x2]] %s6543_s25  ;;  %s6545_s14 = smov 2   ;;  %vm6555_vm6 = vmmov 0   ;;  %vm699_vm7 = vcmask 64512   ;;  %vm2046_vm8 = vcmask 195584   ;;  %vm2289_vm13 = vcmask 523264  }
 0x157   :  { %306 = sst [smem:[#allocation35 + $0x3]] %s6544_s28  ;;  %s6546_s2 = smov 1280   ;;  %v6952_v10 = vsub.s32 0, %v6949_v9  ;;  %v6956_v13 = vsub.s32 1, %v6949_v9  ;;  %v434_v23 = vunpack.c.0.s8 %v433_v20  ;;  %v466_v31 = vunpack.c.0.s8 %v465_v25  ;;  %5590 = vmatprep.mubr.msk.f32.mxu1 %vm6555_vm6, %v6542_v0 }
 0x158   :  { %308 = sst [smem:[#allocation35 + $0x4]] %s6525_s23  ;;  %s6547_s29 = smov 4  }
 0x159   :  { %310 = sst [smem:[#allocation35 + $0x5]] %s6545_s14  ;;  %s5361_s16 = sshll.u32 %s288_s0, 26  ;;  %v6966_v28 = vsub.s32 %v434_v23, %v6949_v9  ;;  %v6971_v38 = vsub.s32 %v466_v31, %v6949_v9 }
 0x15a   :  { %312 = sst [smem:[#allocation35 + $0x6]] %s6546_s2  ;;  %s5362_s4 = sadd.s32 134217728, %s5361_s16 }
 0x15b   :  { %314 = sst [smem:[#allocation35 + $0x7]] %s6544_s28  ;;  %s6548_s8 = smov [#allocation2]  }
 0x15c   :  { %316 = sst [smem:[#allocation35 + $0x8]] %s6547_s29  ;;  %s296_s1 = sshll.u32 %s6548_s8, 4  ;;  %s297_s1 = int_to_ptr.vmem [resolvable:$true] %s296_s1 }
 0x15d   :  { %s6549_s21 = smov [#allocation3]   ;;  %s6550_s12 = smov [#allocation34]  }
 0x15e   :  { %318 = dma.general %s7640_s18, 40960, %s297_s1, %s6549_s21, %s6550_s12, [#allocation35], %s5362_s4, 0  }
 0x15f   :  { %v321_v1 = vld [vmem:[#allocation7 + $0x8] sm:$0xff]  ;;  %v323_v2 = vld [vmem:[#allocation7 + $0x18] sm:$0xff]  ;;  %v320_v3 = vld [vmem:[#allocation7] sm:$0xff]  ;;  %s6551_s18 = smov 32   ;;  %s6552_s19 = smov 96  }
 0x160   :  { %v5831_v4 = vpack.c.bf16 %v323_v2, %v321_v1  ;;  %v322_v5 = vld [vmem:[#allocation7 + $0x10] sm:$0xff]  ;;  %v319_v7 = vld [vmem:[#allocation4] sm:$0x3]  ;;  %v324_v11 = vld [vmem:[#allocation9] sm:$0x3]  ;;  %s6556_s30 = smov 120  }
 0x161   :  { %v5833_v6 = vpack.c.bf16 %v322_v5, %v320_v3  ;;  %v329_v12 = vrot.slane %v324_v11, %v6952_v10  ;;  %v333_v16 = vrot.slane %v324_v11, %v6956_v13  ;;  %v489_v59 = vld [vmem:[#allocation13] sm:$0xff]  ;;  %v490_v60 = vld [vmem:[#allocation13 + $0x8] sm:$0xff]  ;;  %v491_v61 = vld [vmem:[#allocation13 + $0x10] sm:$0xff]  ;;  %s6557_s11 = smov 104   ;;  %s6558_s20 = smov 112  }
 0x162   :  { %5832 = vmatprep.subr.bf16.mxu0 %v5831_v4  ;;  %v5835_v62 = vpack.c.bf16 %v490_v60, %v489_v59  ;;  %v492_v63 = vld [vmem:[#allocation13 + $0x18] sm:$0xff]  ;;  %s6559_s9 = smov 24  }
 0x163   :  { %5834 = vmatpush1.bf16.msra.mxu0 %v5833_v6  ;;  %v5839_v1 = vpack.c.bf16 %v492_v63, %v491_v61  ;;  %v5365_v24 = vld [vmem:[#allocation12] ss:$0 sm:$0xff] }
 0x164   :  { %5836 = vmatprep.subr.bf16.mxu0 %v5835_v62 }
 0x166   :  { %5363 = vmatmul.mubr.msk.f32.vlgmr.msra.gmra.mrb[0].mxu0 %vm336_vm0, %v319_v7 }
 0x167   :  { %5838 = vmatpush3.bf16.msra.mxu0 %v5835_v62 }
 0x168   :  { %5840 = vmatprep.subr.bf16.mxu0 %v5839_v1 }
 0x16b   :  { %5842 = vmatpush3.bf16.msra.mxu0 %v5839_v1 }
 0x16c   :  { %5578 = vmatprep.subr.mxu0 %v6542_v0 }
 0x239   :  { %v406_v14 = vpop.f32.mrb[0].mxu0 }
 0x23a   :  { %v407_v15 = vadd.f32 %v406_v14, %v329_v12  ;;  %v408_v17 = vpop.f32.mrb[1].mxu0 }
 0x23b   :  { %v409_v18 = vadd.f32 %v408_v17, %v333_v16 }
 0x23c   :  { %418 = vrot.lane.b32.xlu1 %v407_v15, %s6551_s18  ;;  %412 = vrot.lane.b32.xlu0 %v407_v15, %s6552_s19 }
 0x240   :  { %422 = vrot.lane.b32.xlu1 %v409_v18, %s6552_s19  ;;  %415 = vrot.lane.b32.xlu0 %v407_v15, %s6544_s28 }
 0x244   :  { %428 = vrot.lane.b32.xlu1 %v409_v18, %s6551_s18  ;;  %425 = vrot.lane.b32.xlu0 %v409_v18, %s6544_s28 }
 0x2ae   :  { %v419_v21 = vpop.permute.xlu1 %418  ;;  %v413_v22 = vpop.permute.xlu0 %412 }
 0x2af   :  { %v439_v29 = vcombine.low %v413_v22, %v419_v21  ;;  %v5364_v21 = vld [vmem:[#allocation10] ss:$0 sm:$0xff] }
 0x2b1   :  { %v446_v35 = vrot.slane %v439_v29, %v6966_v28 }
 0x2b2   :  { %v423_v26 = vpop.permute.xlu1 %422  ;;  %v416_v27 = vpop.permute.xlu0 %415 }
 0x2b3   :  { %v431_v30 = vcombine.low %v407_v15, %v416_v27 }
 0x2b5   :  { %v438_v32 = vrot.slane %v431_v30, %v6966_v28 }
 0x2b6   :  { %v429_v33 = vpop.permute.xlu1 %428  ;;  %v426_v34 = vpop.permute.xlu0 %425 }
 0x2b7   :  { %v455_v36 = vcombine.low %v423_v26, %v429_v33  ;;  %v447_v37 = vcombine.low %v409_v18, %v426_v34  ;;  %v463_v39 = vcombine.low %v438_v32, %v446_v35  ;;  %v5366_v32 = vld [vmem:[#allocation15] ss:$0 sm:$0xff] }
 0x2b9   :  { %v462_v40 = vrot.slane %v455_v36, %v6966_v28  ;;  %v454_v41 = vrot.slane %v447_v37, %v6966_v28  ;;  %v470_v43 = vrot.slane %v463_v39, %v6971_v38 }
 0x2bb   :  { %v471_v42 = vcombine.low %v454_v41, %v462_v40 }
 0x2bd   :  { %v478_v44 = vrot.slane %v471_v42, %v6971_v38 }
 0x2bf   :  { %v6977_v45 = vcombine.high %v470_v43, %v478_v44  ;;  %v6979_v46 = vcombine.low %v470_v43, %v478_v44 }
 0x2c1   :  { %v541_v47 = vsel %vm537_vm1, %v6977_v45, 0.0  ;;  %v538_v48 = vsel %vm537_vm1, %v6979_v46, 0.0 }
 0x2c2   :  { %542 = vadd.xlane.f32.xlu1 %v541_v47  ;;  %539 = vadd.xlane.f32.xlu0 %v538_v48 }
 0x34f   :  { %v543_v49 = vpop.xlane.xlu1 %542  ;;  %v540_v50 = vpop.xlane.xlu0 %539 }
 0x350   :  { %v546_v51 = vmul.f32 0.03125, %v543_v49  ;;  %v545_v52 = vmul.f32 0.03125, %v540_v50 }
 0x352   :  { %v548_v53 = vsub.f32 %v6977_v45, %v546_v51  ;;  %v547_v54 = vsub.f32 %v6979_v46, %v545_v52 }
 0x354   :  { %v549_v55 = vmul.f32 %v547_v54, %v547_v54  ;;  %v550_v57 = vmul.f32 %v548_v53, %v548_v53  ;;  %v580_v22 = vmul.f32 %v5364_v21, %v547_v54  ;;  %v581_v26 = vmul.f32 %v5364_v21, %v548_v53 }
 0x356   :  { %v551_v56 = vsel %vm537_vm1, %v549_v55, 0.0  ;;  %v554_v58 = vsel %vm537_vm1, %v550_v57, 0.0 }
 0x357   :  { %552 = vadd.xlane.f32.xlu0 %v551_v56 }
 0x35b   :  { %555 = vadd.xlane.f32.xlu0 %v554_v58 }
 0x3e4   :  { %v553_v2 = vpop.xlane.xlu0 %552 }
 0x3e5   :  { %v558_v3 = vmul.f32 0.032258064, %v553_v2 }
 0x3e7   :  { %5973 = vrsqrt.f32 %v558_v3  ;;  %vm562_vm2 = vcmp.eq.f32.partialorder %v558_v3, inf  ;;  %v565_v8 = vand.u32 2147483648, %v558_v3  ;;  %vm564_vm3 = vcmp.eq.f32.partialorder %v558_v3, 0.0 }
 0x3e8   :  { %v556_v4 = vpop.xlane.xlu0 %555 }
 0x3e9   :  { %v559_v5 = vmul.f32 0.032258064, %v556_v4 }
 0x3eb   :  { %5975 = vrsqrt.f32 %v559_v5  ;;  %vm569_vm4 = vcmp.eq.f32.partialorder %v559_v5, inf  ;;  %v572_v17 = vand.u32 2147483648, %v559_v5  ;;  %vm571_vm5 = vcmp.eq.f32.partialorder %v559_v5, 0.0 }
 0x3f1   :  { %v5974_v6 = vpop.eup %5973 }
 0x3f2   :  { %v561_v7 = vmul.f32 %v5974_v6, %v558_v3 }
 0x3f4   :  { %v563_v11 = vsel %vm562_vm2, %v558_v3, %v561_v7 }
 0x3f5   :  { %v5976_v12 = vpop.eup %5975  ;;  %v566_v14 = vsel %vm564_vm3, %v565_v8, %v563_v11 }
 0x3f6   :  { %v568_v15 = vmul.f32 %v5976_v12, %v559_v5  ;;  %v582_v16 = vadd.f32 1e-06, %v566_v14 }
 0x3f8   :  { %v570_v18 = vsel %vm569_vm4, %v559_v5, %v568_v15  ;;  %5977 = vrcp.f32 %v582_v16 }
 0x3f9   :  { %v573_v19 = vsel %vm571_vm5, %v572_v17, %v570_v18 }
 0x3fa   :  { %v583_v20 = vadd.f32 1e-06, %v573_v19 }
 0x3fc   :  { %5979 = vrcp.f32 %v583_v20 }
 0x402   :  { %v5978_v23 = vpop.eup %5977 }
 0x403   :  { %v585_v25 = vmul.f32 %v5978_v23, %v580_v22 }
 0x405   :  { %v594_v27 = vadd.f32 %v5365_v24, %v585_v25 }
 0x406   :  { %v5980_v29 = vpop.eup %5979 }
 0x407   :  { %v587_v30 = vmul.f32 %v5980_v29, %v581_v26  ;;  %5575 = vmatprep.mubr.msk.f32.mxu0 %vm537_vm1, %v594_v27 }
 0x409   :  { %v595_v31 = vadd.f32 %v5365_v24, %v587_v30 }
 0x40b   :  { %5576 = vmatmul.mubr.msk.f32.vlgmr.msra.gmra.mrb[2].mxu0 %vm537_vm1, %v595_v31 }
 0x40c   :  { %5580 = vmatprep.mubr.msk.f32.mxu0 %vm6555_vm6, %v6542_v0 }
 0x4de   :  { %v5577_v33 = vpop.f32.mrb[2].mxu0 }
 0x4df   :  { %v6996_v34 = vadd.f32 %v5577_v33, %v5366_v32  ;;  %v674_v35 = vpop.f32.mrb[3].mxu0 }
 0x4e0   :  { %v6998_v36 = vadd.f32 %v5366_v32, %v674_v35 }
 0x4e1   :  { %687 = vrot.lane.b32.xlu0 %v6996_v34, %s6556_s30 }
 0x4e2   :  { %685 = vrot.lane.b32.xlu1 %v6998_v36, %s6556_s30 }
 0x4e5   :  { %693 = vrot.lane.b32.xlu0 %v6998_v36, %s6557_s11 }
 0x4e6   :  { %689 = vrot.lane.b32.xlu1 %v6998_v36, %s6558_s20 }
 0x4e9   :  { %697 = vrot.lane.b32.xlu0 %v6998_v36, %s6552_s19 }
 0x4ea   :  { %691 = vrot.lane.b32.xlu1 %v6996_v34, %s6558_s20 }
 0x4ee   :  { %695 = vrot.lane.b32.xlu1 %v6996_v34, %s6557_s11 }
 0x4f2   :  { %774 = vrot.lane.b32.xlu1 %v6996_v34, %s6552_s19 }
 0x553   :  { %v7016_v37 = vpop.permute.xlu0 %687 }
 0x554   :  { %926 = vrot.lane.b32.xlu1 %v7016_v37, %s6552_s19  ;;  %v7020_v39 = vpop.permute.xlu1 %685 }
 0x555   :  { %850 = vrot.lane.b32.xlu0 %v7020_v39, %s6552_s19 }
 0x557   :  { %v7024_v40 = vpop.permute.xlu0 %693 }
 0x558   :  { %v7026_v41 = vpop.permute.xlu1 %689 }
 0x559   :  { %1002 = vrot.lane.b32.xlu0 %v7026_v41, %s6552_s19 }
 0x55b   :  { %v698_v42 = vpop.permute.xlu0 %697 }
 0x55c   :  { %5579 = vmatpush3.xpose.msk.msra.mxu0 %vm699_vm7, %v698_v42  ;;  %v7031_v43 = vpop.permute.xlu1 %691 }
 0x55d   :  { %1154 = vrot.lane.b32.xlu0 %v7024_v40, %s6552_s19  ;;  %1078 = vrot.lane.b32.xlu1 %v7031_v43, %s6552_s19 }
 0x55e   :  { %5583 = vmatprep.subr.mxu0 %v6542_v0 }
 0x55f   :  { %5581 = vmatmul.mubr.msk.f32.vlgmr.msra.gmra.mrb[4].mxu0 %vm699_vm7, %v6998_v36 }
 0x560   :  { %v7040_v44 = vpop.permute.xlu1 %695  ;;  %5585 = vmatprep.mubr.msk.f32.mxu0 %vm6555_vm6, %v6542_v0 }
 0x561   :  { %1230 = vrot.lane.b32.xlu1 %v7040_v44, %s6552_s19 }
 0x564   :  { %v775_v47 = vpop.permute.xlu1 %774 }
 0x565   :  { %5584 = vmatpush3.xpose.msk.msra.mxu0 %vm699_vm7, %v775_v47 }
 0x566   :  { %5593 = vmatprep.subr.mxu0 %v6542_v0 }
 0x568   :  { %5586 = vmatmul.mubr.msk.f32.vlgmr.msra.gmra.mrb[6].mxu0 %vm699_vm7, %v6996_v34 }
 0x569   :  { %5595 = vmatprep.mubr.msk.f32.mxu0 %vm6555_vm6, %v6542_v0 }
 0x5c6   :  { %v927_v48 = vpop.permute.xlu1 %926 }
 0x5c7   :  { %v851_v49 = vpop.permute.xlu0 %850  ;;  %5594 = vmatpush3.xpose.msk.msra.mxu0 %vm699_vm7, %v927_v48 }
 0x5c8   :  { %5589 = vmatpush3.xpose.msk.msra.mxu1 %vm699_vm7, %v851_v49  ;;  %5603 = vmatprep.subr.mxu0 %v6542_v0 }
 0x5c9   :  { %5598 = vmatprep.subr.mxu1 %v6542_v0 }
 0x5ca   :  { %5596 = vmatmul.mubr.msk.f32.vlgmr.msra.gmra.mrb[8].mxu0 %vm699_vm7, %v7016_v37 }
 0x5cb   :  { %5591 = vmatmul.mubr.msk.f32.vlgmr.msra.gmra.mrb[0].mxu1 %vm699_vm7, %v7020_v39  ;;  %v1003_v50 = vpop.permute.xlu0 %1002  ;;  %5605 = vmatprep.mubr.msk.f32.mxu0 %vm6555_vm6, %v6542_v0 }
 0x5cc   :  { %5599 = vmatpush3.xpose.msk.msra.mxu1 %vm699_vm7, %v1003_v50  ;;  %5600 = vmatprep.mubr.msk.f32.mxu1 %vm6555_vm6, %v6542_v0 }
 0x5cd   :  { %5608 = vmatprep.subr.mxu1 %v6542_v0 }
 0x5cf   :  { %5601 = vmatmul.mubr.msk.f32.vlgmr.msra.gmra.mrb[2].mxu1 %vm699_vm7, %v7026_v41  ;;  %v1155_v51 = vpop.permute.xlu0 %1154  ;;  %v1079_v52 = vpop.permute.xlu1 %1078 }
 0x5d0   :  { %5604 = vmatpush3.xpose.msk.msra.mxu0 %vm699_vm7, %v1079_v52  ;;  %5609 = vmatpush3.xpose.msk.msra.mxu1 %vm699_vm7, %v1155_v51 }
 0x5d1   :  { %5610 = vmatprep.mubr.msk.f32.mxu1 %vm6555_vm6, %v6542_v0  ;;  %5613 = vmatprep.subr.mxu0 %v6542_v0 }
 0x5d2   :  { %5618 = vmatprep.subr.mxu1 %v6542_v0 }
 0x5d3   :  { %5606 = vmatmul.mubr.msk.f32.vlgmr.msra.gmra.mrb[10].mxu0 %vm699_vm7, %v7031_v43  ;;  %5611 = vmatmul.mubr.msk.f32.vlgmr.msra.gmra.mrb[4].mxu1 %vm699_vm7, %v7024_v40  ;;  %v1231_v53 = vpop.permute.xlu1 %1230 }
 0x5d4   :  { %5614 = vmatpush3.xpose.msk.msra.mxu0 %vm699_vm7, %v1231_v53  ;;  %5615 = vmatprep.mubr.msk.f32.mxu0 %vm6555_vm6, %v6542_v0 }
 0x5d5   :  { %5623 = vmatprep.subr.mxu0 %v6542_v0  ;;  %5620 = vmatprep.mubr.msk.f32.mxu1 %vm6555_vm6, %v6542_v0 }
 0x5d7   :  { %5616 = vmatmul.mubr.msk.f32.vlgmr.msra.gmra.mrb[12].mxu0 %vm699_vm7, %v7040_v44 }
 0x5d8   :  { %5625 = vmatprep.mubr.msk.f32.mxu0 %vm6555_vm6, %v6542_v0 }
 0x632   :  { %v770_v54 = vpop.f32.mrb[4].mxu0 }
 0x633   :  { %v1306_v55 = vmul.f32 0.35355338, %v770_v54  ;;  %v5582_v56 = vpop.f32.mrb[5].mxu0 }
 0x635   :  { %v1314_v57 = vsel %vm699_vm7, %v1306_v55, -inf }
 0x636   :  { %1315 = vmax.xlane.f32.xlu0 %v1314_v57 }
 0x63b   :  { %v846_v58 = vpop.f32.mrb[6].mxu0 }
 0x63c   :  { %v1307_v59 = vmul.f32 0.35355338, %v846_v58  ;;  %v5587_v60 = vpop.f32.mrb[7].mxu0 }
 0x63e   :  { %v1317_v61 = vsel %vm699_vm7, %v1307_v59, -inf }
 0x63f   :  { %1318 = vmax.xlane.f32.xlu1 %v1317_v61 }
 0x69d   :  { %v998_v62 = vpop.f32.mrb[8].mxu0 }
 0x69e   :  { %v922_v63 = vpop.f32.mrb[0].mxu1  ;;  %v5597_v1 = vpop.f32.mrb[9].mxu0  ;;  %v1309_v4 = vmul.f32 0.35355338, %v998_v62 }
 0x69f   :  { %v1308_v2 = vmul.f32 0.35355338, %v922_v63  ;;  %v5592_v3 = vpop.f32.mrb[1].mxu1 }
 0x6a0   :  { %v1323_v12 = vsel %vm699_vm7, %v1309_v4, -inf }
 0x6a1   :  { %v1320_v5 = vsel %vm699_vm7, %v1308_v2, -inf }
 0x6a2   :  { %1321 = vmax.xlane.f32.xlu0 %v1320_v5  ;;  %v1074_v6 = vpop.f32.mrb[2].mxu1 }
 0x6a3   :  { %v1310_v7 = vmul.f32 0.35355338, %v1074_v6  ;;  %v5602_v8 = vpop.f32.mrb[3].mxu1 }
 0x6a5   :  { %v1326_v11 = vsel %vm699_vm7, %v1310_v7, -inf }
 0x6a6   :  { %v1226_v14 = vpop.f32.mrb[4].mxu1  ;;  %1327 = vmax.xlane.f32.xlu1 %v1326_v11  ;;  %1324 = vmax.xlane.f32.xlu0 %v1323_v12  ;;  %v1150_v15 = vpop.f32.mrb[10].mxu0 }
 0x6a7   :  { %v1312_v16 = vmul.f32 0.35355338, %v1226_v14  ;;  %v1311_v17 = vmul.f32 0.35355338, %v1150_v15  ;;  %v5607_v18 = vpop.f32.mrb[11].mxu0  ;;  %v5612_v19 = vpop.f32.mrb[5].mxu1 }
 0x6a9   :  { %v1332_v20 = vsel %vm699_vm7, %v1312_v16, -inf  ;;  %v1329_v21 = vsel %vm699_vm7, %v1311_v17, -inf }
 0x6aa   :  { %1333 = vmax.xlane.f32.xlu1 %v1332_v20  ;;  %1330 = vmax.xlane.f32.xlu0 %v1329_v21  ;;  %v1302_v22 = vpop.f32.mrb[12].mxu0 }
 0x6ab   :  { %v1313_v23 = vmul.f32 0.35355338, %v1302_v22  ;;  %v5617_v24 = vpop.f32.mrb[13].mxu0 }
 0x6ad   :  { %v1335_v25 = vsel %vm699_vm7, %v1313_v23, -inf }
 0x6ae   :  { %1336 = vmax.xlane.f32.xlu0 %v1335_v25 }
 0x6bb   :  { %1410 = vrot.lane.b32.xlu1 %v6998_v36, %s6544_s28 }
 0x6bf   :  { %1562 = vrot.lane.b32.xlu1 %v7020_v39, %s6544_s28 }
 0x6c3   :  { %1638 = vrot.lane.b32.xlu1 %v7016_v37, %s6544_s28  ;;  %v1316_v29 = vpop.xlane.xlu0 %1315 }
 0x6c4   :  { %1486 = vrot.lane.b32.xlu0 %v6996_v34, %s6544_s28  ;;  %v1338_v30 = vsub.f32 %v1306_v55, %v1316_v29 }
 0x6c6   :  { %v1346_v32 = vmul.f32 1.442695, %v1338_v30 }
 0x6c7   :  { %1790 = vrot.lane.b32.xlu1 %v7031_v43, %s6544_s28 }
 0x6c8   :  { %1714 = vrot.lane.b32.xlu0 %v7026_v41, %s6544_s28 }
 0x6cc   :  { %v1319_v26 = vpop.xlane.xlu1 %1318 }
 0x6cd   :  { %v1339_v27 = vsub.f32 %v1307_v59, %v1319_v26 }
 0x6cf   :  { %v1348_v31 = vmul.f32 1.442695, %v1339_v27 }
 0x6d1   :  { %5981 = vpow2.f32 %v1348_v31 }
 0x6d2   :  { %5983 = vpow2.f32 %v1346_v32 }
 0x6db   :  { %v7108_v33 = vpop.eup %5981 }
 0x6dc   :  { %v1365_v35 = vsel %vm699_vm7, %v7108_v33, 0.0  ;;  %v7112_v34 = vpop.eup %5983 }
 0x6dd   :  { %v1362_v36 = vsel %vm699_vm7, %v7112_v34, 0.0 }
 0x6e7   :  { %1366 = vadd.xlane.f32.xlu0 %v1365_v35 }
 0x6eb   :  { %1363 = vadd.xlane.f32.xlu1 %v1362_v36 }
 0x72f   :  { %v1322_v37 = vpop.xlane.xlu0 %1321 }
 0x730   :  { %v1340_v39 = vsub.f32 %v1308_v2, %v1322_v37 }
 0x732   :  { %v1350_v41 = vmul.f32 1.442695, %v1340_v39 }
 0x733   :  { %v1325_v42 = vpop.xlane.xlu0 %1324  ;;  %v1328_v43 = vpop.xlane.xlu1 %1327 }
 0x734   :  { %5985 = vpow2.f32 %v1350_v41  ;;  %v1341_v47 = vsub.f32 %v1309_v4, %v1325_v42  ;;  %v1342_v48 = vsub.f32 %v1310_v7, %v1328_v43 }
 0x736   :  { %v1352_v49 = vmul.f32 1.442695, %v1341_v47  ;;  %v1354_v50 = vmul.f32 1.442695, %v1342_v48 }
 0x737   :  { %v1331_v51 = vpop.xlane.xlu0 %1330  ;;  %v1334_v52 = vpop.xlane.xlu1 %1333 }
 0x738   :  { %5987 = vpow2.f32 %v1352_v49  ;;  %v1343_v53 = vsub.f32 %v1311_v17, %v1331_v51  ;;  %v1344_v54 = vsub.f32 %v1312_v16, %v1334_v52  ;;  %v499_v52 = vld [vmem:[#allocation16] sm:$0xff] }
 0x739   :  { %5989 = vpow2.f32 %v1354_v50 }
 0x73a   :  { %v1356_v55 = vmul.f32 1.442695, %v1343_v53  ;;  %v1358_v56 = vmul.f32 1.442695, %v1344_v54  ;;  %v500_v53 = vld [vmem:[#allocation16 + $0x8] sm:$0xff] }
 0x73b   :  { %v1337_v57 = vpop.xlane.xlu0 %1336  ;;  %v1411_v58 = vpop.permute.xlu1 %1410  ;;  %v5843_v54 = vpack.c.bf16 %v500_v53, %v499_v52  ;;  %v522_v53 = vld [vmem:[%s7635_s13 + $0x18] sm:$0xff] }
 0x73c   :  { %5991 = vpow2.f32 %v1356_v55  ;;  %v1345_v59 = vsub.f32 %v1313_v23, %v1337_v57  ;;  %5619 = vmatpush3.msra.mxu1 %v1411_v58  ;;  %v501_v55 = vld [vmem:[#allocation16 + $0x10] sm:$0xff] }
 0x73d   :  { %5993 = vpow2.f32 %v1358_v56  ;;  %5628 = vmatprep.subr.mxu1 %v6542_v0  ;;  %v502_v56 = vld [vmem:[#allocation16 + $0x18] sm:$0xff] }
 0x73e   :  { %v5986_v60 = vpop.eup %5985  ;;  %v1360_v61 = vmul.f32 1.442695, %v1345_v59  ;;  %v5847_v57 = vpack.c.bf16 %v502_v56, %v501_v55  ;;  %v523_v55 = vld [vmem:[%s7635_s13 + $0x20] sm:$0xff]  ;;  %v524_v56 = vld [vmem:[%s7635_s13 + $0x28] sm:$0xff] }
 0x73f   :  { %v1487_v62 = vpop.permute.xlu0 %1486  ;;  %v1368_v63 = vsel %vm699_vm7, %v5986_v60, 0.0  ;;  %v1563_v14 = vpop.permute.xlu1 %1562 }
 0x740   :  { %5995 = vpow2.f32 %v1360_v61  ;;  %1369 = vadd.xlane.f32.xlu1 %v1368_v63  ;;  %5624 = vmatpush3.msra.mxu0 %v1487_v62 }
 0x741   :  { %5633 = vmatprep.subr.mxu0 %v6542_v0 }
 0x742   :  { %v5988_v1 = vpop.eup %5987 }
 0x743   :  { %v5990_v2 = vpop.eup %5989  ;;  %v1371_v3 = vsel %vm699_vm7, %v5988_v1, 0.0  ;;  %v1639_v15 = vpop.permute.xlu1 %1638 }
 0x744   :  { %1372 = vadd.xlane.f32.xlu0 %v1371_v3  ;;  %v1374_v4 = vsel %vm699_vm7, %v5990_v2, 0.0  ;;  %v1715_v16 = vpop.permute.xlu0 %1714 }
 0x745   :  { %1375 = vadd.xlane.f32.xlu1 %v1374_v4 }
 0x746   :  { %v7121_v5 = vpop.eup %5991 }
 0x747   :  { %v7123_v6 = vpop.eup %5993  ;;  %v1377_v7 = vsel %vm699_vm7, %v7121_v5, 0.0  ;;  %v1791_v17 = vpop.permute.xlu1 %1790 }
 0x748   :  { %1378 = vadd.xlane.f32.xlu0 %v1377_v7  ;;  %v1380_v8 = vsel %vm699_vm7, %v7123_v6, 0.0 }
 0x749   :  { %1381 = vadd.xlane.f32.xlu1 %v1380_v8 }
 0x74a   :  { %v7129_v11 = vpop.eup %5995 }
 0x74b   :  { %v1383_v12 = vsel %vm699_vm7, %v7129_v11, 0.0 }
 0x74c   :  { %1384 = vadd.xlane.f32.xlu0 %v1383_v12 }
 0x75a   :  { %1942 = vrot.lane.b32.xlu1 %v7040_v44, %s6544_s28 }
 0x762   :  { %1866 = vrot.lane.b32.xlu0 %v7024_v40, %s6544_s28 }
 0x774   :  { %v1367_v18 = vpop.xlane.xlu0 %1366 }
 0x775   :  { %5997 = vrcp.f32 %v1367_v18 }
 0x778   :  { %v1364_v19 = vpop.xlane.xlu1 %1363 }
 0x779   :  { %5999 = vrcp.f32 %v1364_v19 }
 0x77f   :  { %v5998_v20 = vpop.eup %5997 }
 0x780   :  { %v1395_v21 = vmul.f32 %v5998_v20, %v7108_v33 }
 0x782   :  { %1403 = vst.msk [vmem:[#allocation32 + $0x8] sm:$0xff] %vm699_vm7, %v1395_v21  ;;  %5626 = vmatmul.mubr.msk.f32.vlgmr.msra.gmra.mrb[14].mxu0 %vm699_vm7, %v1395_v21 }
 0x783   :  { %v6000_v22 = vpop.eup %5999  ;;  %5634 = vmatpush3.msra.mxu0 %v1639_v15  ;;  %5635 = vmatprep.mubr.msk.f32.mxu0 %vm6555_vm6, %v6542_v0 }
 0x784   :  { %v1394_v40 = vmul.f32 %v6000_v22, %v7112_v34  ;;  %5643 = vmatprep.subr.mxu0 %v6542_v0  ;;  %v5393_v22 = vld [vmem:[#allocation18] ss:$0 sm:$0xff] }
 0x786   :  { %1402 = vst.msk [vmem:[#allocation32] sm:$0xff] %vm699_vm7, %v1394_v40  ;;  %5621 = vmatmul.mubr.msk.f32.vlgmr.msra.gmra.mrb[6].mxu1 %vm699_vm7, %v1394_v40 }
 0x787   :  { %5629 = vmatpush3.msra.mxu1 %v1563_v14  ;;  %5630 = vmatprep.mubr.msk.f32.mxu1 %vm6555_vm6, %v6542_v0 }
 0x788   :  { %5638 = vmatprep.subr.mxu1 %v6542_v0 }
 0x7cd   :  { %v1370_v44 = vpop.xlane.xlu1 %1369 }
 0x7ce   :  { %6001 = vrcp.f32 %v1370_v44 }
 0x7d1   :  { %v1373_v23 = vpop.xlane.xlu0 %1372 }
 0x7d2   :  { %6003 = vrcp.f32 %v1373_v23  ;;  %v1376_v24 = vpop.xlane.xlu1 %1375 }
 0x7d3   :  { %6005 = vrcp.f32 %v1376_v24 }
 0x7d5   :  { %v1379_v25 = vpop.xlane.xlu0 %1378 }
 0x7d6   :  { %6007 = vrcp.f32 %v1379_v25  ;;  %v1382_v26 = vpop.xlane.xlu1 %1381 }
 0x7d7   :  { %6009 = vrcp.f32 %v1382_v26 }
 0x7d8   :  { %v6002_v27 = vpop.eup %6001 }
 0x7d9   :  { %v1396_v29 = vmul.f32 %v6002_v27, %v5986_v60  ;;  %v1385_v30 = vpop.xlane.xlu0 %1384 }
 0x7da   :  { %6011 = vrcp.f32 %v1385_v30  ;;  %v1943_v42 = vpop.permute.xlu1 %1942 }
 0x7db   :  { %1404 = vst.msk [vmem:[#allocation32 + $0x10] sm:$0xff] %vm699_vm7, %v1396_v29  ;;  %5631 = vmatmul.mubr.msk.f32.vlgmr.msra.gmra.mrb[8].mxu1 %vm699_vm7, %v1396_v29 }
 0x7dc   :  { %v6004_v31 = vpop.eup %6003  ;;  %5639 = vmatpush3.msra.mxu1 %v1715_v16  ;;  %5640 = vmatprep.mubr.msk.f32.mxu1 %vm6555_vm6, %v6542_v0 }
 0x7dd   :  { %v6006_v32 = vpop.eup %6005  ;;  %v1397_v33 = vmul.f32 %v6004_v31, %v5988_v1  ;;  %5648 = vmatprep.subr.mxu1 %v6542_v0  ;;  %v1867_v34 = vpop.permute.xlu0 %1866 }
 0x7de   :  { %v1398_v35 = vmul.f32 %v6006_v32, %v5990_v2 }
 0x7df   :  { %1405 = vst.msk [vmem:[#allocation32 + $0x18] sm:$0xff] %vm699_vm7, %v1397_v33  ;;  %5636 = vmatmul.mubr.msk.f32.vlgmr.msra.gmra.mrb[16].mxu0 %vm699_vm7, %v1397_v33 }
 0x7e0   :  { %v6008_v36 = vpop.eup %6007  ;;  %1406 = vst.msk [vmem:[#allocation32 + $0x20] sm:$0xff] %vm699_vm7, %v1398_v35  ;;  %5641 = vmatmul.mubr.msk.f32.vlgmr.msra.gmra.mrb[10].mxu1 %vm699_vm7, %v1398_v35  ;;  %5644 = vmatpush3.msra.mxu0 %v1791_v17 }
 0x7e1   :  { %v6010_v37 = vpop.eup %6009  ;;  %v1399_v39 = vmul.f32 %v6008_v36, %v7121_v5  ;;  %5649 = vmatpush3.msra.mxu1 %v1867_v34  ;;  %5645 = vmatprep.mubr.msk.f32.mxu0 %vm6555_vm6, %v6542_v0 }
 0x7e2   :  { %v1400_v41 = vmul.f32 %v6010_v37, %v7123_v6  ;;  %5650 = vmatprep.mubr.msk.f32.mxu1 %vm6555_vm6, %v6542_v0  ;;  %5653 = vmatprep.subr.mxu0 %v6542_v0 }
 0x7e3   :  { %1407 = vst.msk [vmem:[#allocation32 + $0x28] sm:$0xff] %vm699_vm7, %v1399_v39  ;;  %5646 = vmatmul.mubr.msk.f32.vlgmr.msra.gmra.mrb[18].mxu0 %vm699_vm7, %v1399_v39  ;;  %5844 = vmatprep.subr.bf16.mxu1 %v5843_v54  ;;  %v509_v39 = vld [vmem:[#allocation22] sm:$0xff] }
 0x7e4   :  { %v6012_v43 = vpop.eup %6011  ;;  %1408 = vst.msk [vmem:[#allocation32 + $0x30] sm:$0xff] %vm699_vm7, %v1400_v41  ;;  %5651 = vmatmul.mubr.msk.f32.vlgmr.msra.gmra.mrb[12].mxu1 %vm699_vm7, %v1400_v41  ;;  %5654 = vmatpush3.msra.mxu0 %v1943_v42  ;;  %v510_v41 = vld [vmem:[#allocation22 + $0x8] sm:$0xff]  ;;  %v511_v42 = vld [vmem:[#allocation22 + $0x10] sm:$0xff] }
 0x7e5   :  { %v1401_v47 = vmul.f32 %v6012_v43, %v7129_v11  ;;  %5655 = vmatprep.mubr.msk.f32.mxu0 %vm6555_vm6, %v6542_v0  ;;  %5846 = vmatpush3.bf16.msra.mxu1 %v5843_v54  ;;  %v5851_v43 = vpack.c.bf16 %v510_v41, %v509_v39 }
 0x7e6   :  { %5848 = vmatprep.subr.bf16.mxu1 %v5847_v57 }
 0x7e7   :  { %1409 = vst.msk [vmem:[#allocation32 + $0x38] sm:$0xff] %vm699_vm7, %v1401_v47  ;;  %5656 = vmatmul.mubr.msk.f32.vlgmr.msra.gmra.mrb[20].mxu0 %vm699_vm7, %v1401_v47  ;;  %v512_v47 = vld [vmem:[#allocation22 + $0x18] sm:$0xff]  ;;  %5852 = vmatprep.subr.bf16.mxu0 %v5851_v43 }
 0x7e8   :  { %5854 = vmatpush3.bf16.msra.mxu0 %v5851_v43 }
 0x7e9   :  { %5850 = vmatpush3.bf16.msra.mxu1 %v5847_v57  ;;  %v5867_v57 = vpack.c.bf16 %v524_v56, %v523_v55  ;;  %v493_v55 = vld [vmem:[#allocation13 + $0x20] sm:$0xff]  ;;  %v494_v56 = vld [vmem:[#allocation13 + $0x28] sm:$0xff] }
 0x855   :  { %v1558_v48 = vpop.f32.mrb[14].mxu0 }
 0x856   :  { %v5627_v49 = vpop.f32.mrb[15].mxu0 }
 0x857   :  { %v519_v49 = vld [vmem:[%s7635_s13] sm:$0xff] }
 0x859   :  { %v1482_v50 = vpop.f32.mrb[6].mxu1 }
 0x85a   :  { %v5622_v51 = vpop.f32.mrb[7].mxu1 }
 0x85b   :  { %v521_v51 = vld [vmem:[%s7635_s13 + $0x10] sm:$0xff] }
 0x85c   :  { %v5863_v54 = vpack.c.bf16 %v522_v53, %v521_v51 }
 0x8ae   :  { %v1634_v58 = vpop.f32.mrb[8].mxu1 }
 0x8af   :  { %2020 = vrot.lane.b32.xlu0 %v1634_v58, %s6526_s3  ;;  %v5632_v59 = vpop.f32.mrb[9].mxu1 }
 0x8b2   :  { %v1710_v60 = vpop.f32.mrb[16].mxu0 }
 0x8b3   :  { %v1786_v61 = vpop.f32.mrb[10].mxu1  ;;  %2022 = vrot.lane.b32.xlu1 %v1710_v60, %s6526_s3  ;;  %v5637_v62 = vpop.f32.mrb[17].mxu0 }
 0x8b4   :  { %2028 = vrot.lane.b32.xlu0 %v1786_v61, %s7661_s7  ;;  %v5642_v63 = vpop.f32.mrb[11].mxu1 }
 0x8b6   :  { %v1862_v1 = vpop.f32.mrb[18].mxu0 }
 0x8b7   :  { %v1938_v2 = vpop.f32.mrb[12].mxu1  ;;  %2030 = vrot.lane.b32.xlu1 %v1862_v1, %s7661_s7  ;;  %v5647_v3 = vpop.f32.mrb[19].mxu0 }
 0x8b8   :  { %2036 = vrot.lane.b32.xlu0 %v1938_v2, %s6559_s9  ;;  %v5652_v4 = vpop.f32.mrb[13].mxu1 }
 0x8ba   :  { %v2014_v5 = vpop.f32.mrb[20].mxu0 }
 0x8bb   :  { %2038 = vrot.lane.b32.xlu1 %v2014_v5, %s6559_s9  ;;  %v5657_v6 = vpop.f32.mrb[21].mxu0 }
 0x921   :  { %v2021_v7 = vpop.permute.xlu0 %2020 }
 0x922   :  { %v2042_v12 = vsel %vm699_vm7, %v1482_v50, %v2021_v7  ;;  %v520_v50 = vld [vmem:[%s7635_s13 + $0x8] sm:$0xff] }
 0x923   :  { %v5859_v52 = vpack.c.bf16 %v520_v50, %v519_v49 }
 0x925   :  { %v2023_v8 = vpop.permute.xlu1 %2022  ;;  %5860 = vmatprep.subr.bf16.mxu1 %v5859_v52 }
 0x926   :  { %v2029_v11 = vpop.permute.xlu0 %2028  ;;  %v2043_v18 = vsel %vm699_vm7, %v1558_v48, %v2023_v8  ;;  %v5855_v48 = vpack.c.bf16 %v512_v47, %v511_v42 }
 0x927   :  { %v2044_v15 = vsel %vm336_vm0, %v2042_v12, %v2029_v11 }
 0x928   :  { %5856 = vmatprep.subr.bf16.mxu0 %v5855_v48 }
 0x929   :  { %v2031_v14 = vpop.permute.xlu1 %2030  ;;  %5858 = vmatpush3.bf16.msra.mxu0 %v5855_v48 }
 0x92a   :  { %v2037_v16 = vpop.permute.xlu0 %2036  ;;  %v2045_v19 = vsel %vm336_vm0, %v2043_v18, %v2031_v14  ;;  %v5396_v14 = vld [vmem:[#allocation19] ss:$0 sm:$0xff] }
 0x92b   :  { %v2047_v17 = vsel %vm2046_vm8, %v2044_v15, %v2037_v16 }
 0x92c   :  { %5666 = vmatprep.mubr.msk.f32.mxu1 %vm537_vm1, %v2047_v17  ;;  %v5397_v17 = vld [vmem:[#allocation21] ss:$0 sm:$0xff] }
 0x92d   :  { %v2039_v20 = vpop.permute.xlu1 %2038 }
 0x92e   :  { %v2048_v21 = vsel %vm2046_vm8, %v2045_v19, %v2039_v20 }
 0x92f   :  { %5667 = vmatmul.mubr.msk.f32.vlgmr.msra.gmra.mrb[14].mxu1 %vm537_vm1, %v2048_v21 }
 0x930   :  { %5862 = vmatpush3.bf16.msra.mxu1 %v5859_v52 }
 0x931   :  { %5864 = vmatprep.subr.bf16.mxu1 %v5863_v54 }
 0x934   :  { %5866 = vmatpush3.bf16.msra.mxu1 %v5863_v54 }
 0x935   :  { %5868 = vmatprep.subr.bf16.mxu1 %v5867_v57 }
 0x938   :  { %5870 = vmatpush3.bf16.msra.mxu1 %v5867_v57  ;;  %v495_v57 = vld [vmem:[#allocation13 + $0x30] sm:$0xff] }
 0xa02   :  { %v5668_v40 = vpop.f32.mrb[14].mxu1 }
 0xa03   :  { %v2133_v44 = vadd.f32 %v5668_v40, %v5393_v22  ;;  %v2127_v23 = vpop.f32.mrb[15].mxu1 }
 0xa04   :  { %v2128_v24 = vadd.f32 %v5393_v22, %v2127_v23  ;;  %v526_v23 = vld [vmem:[%s7635_s13 + $0x38] sm:$0xff] }
 0xa05   :  { %v7189_v25 = vadd.f32 %v2133_v44, %v6977_v45  ;;  %v525_v44 = vld [vmem:[%s7635_s13 + $0x30] sm:$0xff] }
 0xa06   :  { %v7192_v26 = vadd.f32 %v2128_v24, %v6979_v46  ;;  %v5871_v24 = vpack.c.bf16 %v526_v23, %v525_v44 }
 0xa07   :  { %v2141_v27 = vsel %vm537_vm1, %v7189_v25, 0.0 }
 0xa08   :  { %2142 = vadd.xlane.f32.xlu1 %v2141_v27  ;;  %v2138_v29 = vsel %vm537_vm1, %v7192_v26, 0.0  ;;  %5872 = vmatprep.subr.bf16.mxu1 %v5871_v24  ;;  %v5398_v27 = vld [vmem:[#allocation24] ss:$0 sm:$0xff] }
 0xa09   :  { %2139 = vadd.xlane.f32.xlu0 %v2138_v29  ;;  %5874 = vmatpush3.bf16.msra.mxu1 %v5871_v24 }
 0xa0a   :  { %5720 = vmatprep.subr.mxu1 %v6542_v0 }
 0xa95   :  { %v2143_v30 = vpop.xlane.xlu1 %2142 }
 0xa96   :  { %v2145_v31 = vmul.f32 0.03125, %v2143_v30  ;;  %v2140_v32 = vpop.xlane.xlu0 %2139 }
 0xa97   :  { %v2144_v33 = vmul.f32 0.03125, %v2140_v32 }
 0xa98   :  { %v2147_v35 = vsub.f32 %v7189_v25, %v2145_v31 }
 0xa99   :  { %v2146_v45 = vsub.f32 %v7192_v26, %v2144_v33 }
 0xa9a   :  { %v2149_v36 = vmul.f32 %v2147_v35, %v2147_v35  ;;  %v2179_v19 = vmul.f32 %v5396_v14, %v2147_v35 }
 0xa9b   :  { %v2148_v34 = vmul.f32 %v2146_v45, %v2146_v45  ;;  %v2178_v15 = vmul.f32 %v5396_v14, %v2146_v45  ;;  %v5401_v45 = vld [vmem:[#allocation25] ss:$0 sm:$0xff] }
 0xa9c   :  { %v2153_v37 = vsel %vm537_vm1, %v2149_v36, 0.0 }
 0xa9d   :  { %v2150_v46 = vsel %vm537_vm1, %v2148_v34, 0.0 }
 0xa9e   :  { %2151 = vadd.xlane.f32.xlu0 %v2150_v46 }
 0xaa2   :  { %2154 = vadd.xlane.f32.xlu0 %v2153_v37 }
 0xb2b   :  { %v2152_v58 = vpop.xlane.xlu0 %2151 }
 0xb2c   :  { %v2156_v59 = vmul.f32 0.032258064, %v2152_v58  ;;  %v5875_v58 = vpack.c.bf16 %v494_v56, %v493_v55 }
 0xb2e   :  { %6013 = vrsqrt.f32 %v2156_v59  ;;  %vm2160_vm9 = vcmp.eq.f32.partialorder %v2156_v59, inf  ;;  %v2163_v1 = vand.u32 2147483648, %v2156_v59  ;;  %vm2162_vm10 = vcmp.eq.f32.partialorder %v2156_v59, 0.0  ;;  %5876 = vmatprep.subr.bf16.mxu0 %v5875_v58 }
 0xb2f   :  { %v2155_v60 = vpop.xlane.xlu0 %2154 }
 0xb30   :  { %v2157_v61 = vmul.f32 0.032258064, %v2155_v60 }
 0xb32   :  { %6015 = vrsqrt.f32 %v2157_v61  ;;  %vm2167_vm11 = vcmp.eq.f32.partialorder %v2157_v61, inf  ;;  %v2170_v7 = vand.u32 2147483648, %v2157_v61  ;;  %vm2169_vm12 = vcmp.eq.f32.partialorder %v2157_v61, 0.0 }
 0xb38   :  { %v6014_v62 = vpop.eup %6013 }
 0xb39   :  { %v2159_v63 = vmul.f32 %v6014_v62, %v2156_v59 }
 0xb3b   :  { %v2161_v2 = vsel %vm2160_vm9, %v2156_v59, %v2159_v63  ;;  %v496_v59 = vld [vmem:[#allocation13 + $0x38] sm:$0xff] }
 0xb3c   :  { %v6016_v3 = vpop.eup %6015  ;;  %v2164_v4 = vsel %vm2162_vm10, %v2163_v1, %v2161_v2  ;;  %v5879_v60 = vpack.c.bf16 %v496_v59, %v495_v57 }
 0xb3d   :  { %v2166_v5 = vmul.f32 %v6016_v3, %v2157_v61  ;;  %v2180_v6 = vadd.f32 1e-06, %v2164_v4 }
 0xb3f   :  { %v2168_v8 = vsel %vm2167_vm11, %v2157_v61, %v2166_v5  ;;  %6017 = vrcp.f32 %v2180_v6  ;;  %vm4354_vm11 = vcmask 785408  }
 0xb40   :  { %v2171_v11 = vsel %vm2169_vm12, %v2170_v7, %v2168_v8 }
 0xb41   :  { %v2181_v12 = vadd.f32 1e-06, %v2171_v11 }
 0xb43   :  { %6019 = vrcp.f32 %v2181_v12 }
 0xb49   :  { %v6018_v16 = vpop.eup %6017 }
 0xb4a   :  { %v2183_v18 = vmul.f32 %v6018_v16, %v2178_v15 }
 0xb4c   :  { %v2192_v20 = vadd.f32 %v5397_v17, %v2183_v18 }
 0xb4d   :  { %v6020_v21 = vpop.eup %6019 }
 0xb4e   :  { %v2185_v22 = vmul.f32 %v6020_v21, %v2179_v19  ;;  %5677 = vmatprep.mubr.msk.f32.mxu0 %vm537_vm1, %v2192_v20 }
 0xb50   :  { %v2193_v40 = vadd.f32 %v5397_v17, %v2185_v22  ;;  %v5404_v17 = vld [vmem:[#allocation10 + $0x1] ss:$0 sm:$0xff]  ;;  %v5405_v22 = vld [vmem:[#allocation12 + $0x1] ss:$0 sm:$0xff] }
 0xb52   :  { %5678 = vmatmul.mubr.msk.f32.vlgmr.msra.gmra.mrb[22].mxu0 %vm537_vm1, %v2193_v40 }
 0xb53   :  { %5878 = vmatpush3.bf16.msra.mxu0 %v5875_v58 }
 0xb54   :  { %5880 = vmatprep.subr.bf16.mxu0 %v5879_v60 }
 0xb57   :  { %5882 = vmatpush3.bf16.msra.mxu0 %v5879_v60 }
 0xb58   :  { %5710 = vmatprep.subr.mxu0 %v6542_v0 }
 0xc25   :  { %v5679_v29 = vpop.f32.mrb[22].mxu0 }
 0xc26   :  { %v2278_v30 = vadd.f32 %v5679_v29, %v5398_v27  ;;  %v2272_v31 = vpop.f32.mrb[23].mxu0 }
 0xc27   :  { %v2273_v32 = vadd.f32 %v5398_v27, %v2272_v31  ;;  %v5406_v27 = vld [vmem:[#allocation15 + $0x1] ss:$0 sm:$0xff] }
 0xc28   :  { %v2282_v35 = vmax.f32 %v2278_v30, 0.0 }
 0xc29   :  { %v2281_v33 = vmax.f32 %v2273_v32, 0.0 }
 0xc2b   :  { %5696 = vmatprep.mubr.msk.f32.mxu1 %vm2289_vm13, %v2281_v33 }
 0xc2c   :  { %5697 = vmatmul.mubr.msk.f32.vlgmr.msra.gmra.mrb[16].mxu1 %vm2289_vm13, %v2282_v35 }
 0xc2d   :  { %5722 = vmatprep.mubr.msk.f32.mxu1 %vm6555_vm6, %v6542_v0 }
 0xcff   :  { %v5698_v34 = vpop.f32.mrb[16].mxu1 }
 0xd00   :  { %v2368_v46 = vadd.f32 %v5698_v34, %v5401_v45  ;;  %v2362_v36 = vpop.f32.mrb[17].mxu1 }
 0xd01   :  { %v2363_v37 = vadd.f32 %v5401_v45, %v2362_v36 }
 0xd02   :  { %v7234_v39 = vadd.f32 %v2368_v46, %v7189_v25 }
 0xd03   :  { %v7237_v41 = vadd.f32 %v2363_v37, %v7192_v26 }
 0xd04   :  { %v2376_v42 = vsel %vm537_vm1, %v7234_v39, 0.0 }
 0xd05   :  { %2377 = vadd.xlane.f32.xlu0 %v2376_v42  ;;  %v2373_v43 = vsel %vm537_vm1, %v7237_v41, 0.0 }
 0xd06   :  { %2374 = vadd.xlane.f32.xlu1 %v2373_v43 }
 0xd92   :  { %v2378_v47 = vpop.xlane.xlu0 %2377 }
 0xd93   :  { %v2380_v48 = vmul.f32 0.03125, %v2378_v47  ;;  %v2375_v49 = vpop.xlane.xlu1 %2374 }
 0xd94   :  { %v2379_v50 = vmul.f32 0.03125, %v2375_v49 }
 0xd95   :  { %v2382_v51 = vsub.f32 %v7234_v39, %v2380_v48 }
 0xd96   :  { %v2381_v25 = vsub.f32 %v7237_v41, %v2379_v50 }
 0xd97   :  { %v2384_v52 = vmul.f32 %v2382_v51, %v2382_v51  ;;  %v2414_v18 = vmul.f32 %v5404_v17, %v2382_v51 }
 0xd98   :  { %v2383_v53 = vmul.f32 %v2381_v25, %v2381_v25  ;;  %v2413_v20 = vmul.f32 %v5404_v17, %v2381_v25 }
 0xd99   :  { %v2388_v26 = vsel %vm537_vm1, %v2384_v52, 0.0 }
 0xd9a   :  { %2389 = vadd.xlane.f32.xlu0 %v2388_v26  ;;  %v2385_v54 = vsel %vm537_vm1, %v2383_v53, 0.0 }
 0xd9b   :  { %2386 = vadd.xlane.f32.xlu1 %v2385_v54 }
 0xe27   :  { %v2390_v61 = vpop.xlane.xlu0 %2389 }
 0xe28   :  { %v2392_v62 = vmul.f32 0.032258064, %v2390_v61  ;;  %v2387_v63 = vpop.xlane.xlu1 %2386 }
 0xe29   :  { %v2391_v1 = vmul.f32 0.032258064, %v2387_v63 }
 0xe2a   :  { %6021 = vrsqrt.f32 %v2392_v62  ;;  %vm2402_vm14 = vcmp.eq.f32.partialorder %v2392_v62, inf  ;;  %v2405_v5 = vand.u32 2147483648, %v2392_v62  ;;  %vm2404_vm15 = vcmp.eq.f32.partialorder %v2392_v62, 0.0 }
 0xe2b   :  { %6023 = vrsqrt.f32 %v2391_v1  ;;  %vm2395_vm2 = vcmp.eq.f32.partialorder %v2391_v1, inf  ;;  %v2398_v8 = vand.u32 2147483648, %v2391_v1  ;;  %vm2397_vm3 = vcmp.eq.f32.partialorder %v2391_v1, 0.0 }
 0xe34   :  { %v6022_v2 = vpop.eup %6021 }
 0xe35   :  { %v6024_v3 = vpop.eup %6023  ;;  %v2401_v4 = vmul.f32 %v6022_v2, %v2392_v62 }
 0xe36   :  { %v2394_v6 = vmul.f32 %v6024_v3, %v2391_v1 }
 0xe37   :  { %v2403_v7 = vsel %vm2402_vm14, %v2392_v62, %v2401_v4 }
 0xe38   :  { %v2406_v11 = vsel %vm2404_vm15, %v2405_v5, %v2403_v7  ;;  %v2396_v12 = vsel %vm2395_vm2, %v2391_v1, %v2394_v6 }
 0xe39   :  { %v2416_v14 = vadd.f32 1e-06, %v2406_v11  ;;  %v2399_v15 = vsel %vm2397_vm3, %v2398_v8, %v2396_v12 }
 0xe3a   :  { %v2415_v16 = vadd.f32 1e-06, %v2399_v15 }
 0xe3b   :  { %6025 = vrcp.f32 %v2416_v14 }
 0xe3c   :  { %6027 = vrcp.f32 %v2415_v16 }
 0xe45   :  { %v6026_v19 = vpop.eup %6025 }
 0xe46   :  { %v6028_v21 = vpop.eup %6027  ;;  %v2420_v40 = vmul.f32 %v6026_v19, %v2414_v18 }
 0xe47   :  { %v2418_v44 = vmul.f32 %v6028_v21, %v2413_v20 }
 0xe48   :  { %v2428_v24 = vadd.f32 %v5405_v22, %v2420_v40 }
 0xe49   :  { %v2427_v23 = vadd.f32 %v5405_v22, %v2418_v44 }
 0xe4b   :  { %5707 = vmatprep.mubr.msk.f32.mxu0 %vm537_vm1, %v2427_v23 }
 0xe4c   :  { %5708 = vmatmul.mubr.msk.f32.vlgmr.msra.gmra.mrb[24].mxu0 %vm537_vm1, %v2428_v24 }
 0xe4d   :  { %5712 = vmatprep.mubr.msk.f32.mxu0 %vm6555_vm6, %v6542_v0 }
 0xf1f   :  { %v5709_v29 = vpop.f32.mrb[24].mxu0 }
 0xf20   :  { %v7252_v30 = vadd.f32 %v5709_v29, %v5406_v27  ;;  %v2507_v31 = vpop.f32.mrb[25].mxu0 }
 0xf21   :  { %v7254_v32 = vadd.f32 %v5406_v27, %v2507_v31 }
 0xf22   :  { %2520 = vrot.lane.b32.xlu0 %v7252_v30, %s6556_s30 }
 0xf23   :  { %2518 = vrot.lane.b32.xlu1 %v7254_v32, %s6556_s30 }
 0xf26   :  { %2526 = vrot.lane.b32.xlu0 %v7254_v32, %s6557_s11 }
 0xf27   :  { %2522 = vrot.lane.b32.xlu1 %v7254_v32, %s6558_s20 }
 0xf2a   :  { %2530 = vrot.lane.b32.xlu0 %v7254_v32, %s6552_s19 }
 0xf2b   :  { %2524 = vrot.lane.b32.xlu1 %v7252_v30, %s6558_s20 }
 0xf2f   :  { %2528 = vrot.lane.b32.xlu1 %v7252_v30, %s6557_s11 }
 0xf33   :  { %2606 = vrot.lane.b32.xlu1 %v7252_v30, %s6552_s19 }
 0xf94   :  { %v7272_v33 = vpop.permute.xlu0 %2520 }
 0xf95   :  { %2758 = vrot.lane.b32.xlu1 %v7272_v33, %s6552_s19  ;;  %v7276_v35 = vpop.permute.xlu1 %2518 }
 0xf96   :  { %2682 = vrot.lane.b32.xlu0 %v7276_v35, %s6552_s19 }
 0xf98   :  { %v7280_v45 = vpop.permute.xlu0 %2526 }
 0xf99   :  { %v7282_v34 = vpop.permute.xlu1 %2522 }
 0xf9a   :  { %2834 = vrot.lane.b32.xlu0 %v7282_v34, %s6552_s19 }
 0xf9c   :  { %v2531_v46 = vpop.permute.xlu0 %2530 }
 0xf9d   :  { %5711 = vmatpush3.xpose.msk.msra.mxu0 %vm699_vm7, %v2531_v46  ;;  %v7287_v36 = vpop.permute.xlu1 %2524 }
 0xf9e   :  { %2986 = vrot.lane.b32.xlu0 %v7280_v45, %s6552_s19  ;;  %2910 = vrot.lane.b32.xlu1 %v7287_v36, %s6552_s19 }
 0xf9f   :  { %5715 = vmatprep.subr.mxu0 %v6542_v0 }
 0xfa0   :  { %5713 = vmatmul.mubr.msk.f32.vlgmr.msra.gmra.mrb[26].mxu0 %vm699_vm7, %v7254_v32 }
 0xfa1   :  { %v7296_v37 = vpop.permute.xlu1 %2528  ;;  %5717 = vmatprep.mubr.msk.f32.mxu0 %vm6555_vm6, %v6542_v0 }
 0xfa2   :  { %3062 = vrot.lane.b32.xlu1 %v7296_v37, %s6552_s19 }
 0xfa5   :  { %v2607_v42 = vpop.permute.xlu1 %2606 }
 0xfa6   :  { %5716 = vmatpush3.xpose.msk.msra.mxu0 %vm699_vm7, %v2607_v42 }
 0xfa7   :  { %5725 = vmatprep.subr.mxu0 %v6542_v0 }
 0xfa9   :  { %5718 = vmatmul.mubr.msk.f32.vlgmr.msra.gmra.mrb[28].mxu0 %vm699_vm7, %v7252_v30 }
 0xfaa   :  { %5727 = vmatprep.mubr.msk.f32.mxu0 %vm6555_vm6, %v6542_v0 }
0x1007   :  { %v2759_v43 = vpop.permute.xlu1 %2758 }
0x1008   :  { %v2683_v47 = vpop.permute.xlu0 %2682  ;;  %5726 = vmatpush3.xpose.msk.msra.mxu0 %vm699_vm7, %v2759_v43 }
0x1009   :  { %5721 = vmatpush3.xpose.msk.msra.mxu1 %vm699_vm7, %v2683_v47  ;;  %5735 = vmatprep.subr.mxu0 %v6542_v0 }
0x100a   :  { %5730 = vmatprep.subr.mxu1 %v6542_v0 }
0x100b   :  { %5728 = vmatmul.mubr.msk.f32.vlgmr.msra.gmra.mrb[30].mxu0 %vm699_vm7, %v7272_v33 }
0x100c   :  { %5723 = vmatmul.mubr.msk.f32.vlgmr.msra.gmra.mrb[18].mxu1 %vm699_vm7, %v7276_v35  ;;  %v2835_v48 = vpop.permute.xlu0 %2834  ;;  %5737 = vmatprep.mubr.msk.f32.mxu0 %vm6555_vm6, %v6542_v0 }
0x100d   :  { %5731 = vmatpush3.xpose.msk.msra.mxu1 %vm699_vm7, %v2835_v48  ;;  %5732 = vmatprep.mubr.msk.f32.mxu1 %vm6555_vm6, %v6542_v0 }
0x100e   :  { %5740 = vmatprep.subr.mxu1 %v6542_v0 }
0x1010   :  { %5733 = vmatmul.mubr.msk.f32.vlgmr.msra.gmra.mrb[20].mxu1 %vm699_vm7, %v7282_v34  ;;  %v2987_v49 = vpop.permute.xlu0 %2986  ;;  %v2911_v50 = vpop.permute.xlu1 %2910 }
0x1011   :  { %5736 = vmatpush3.xpose.msk.msra.mxu0 %vm699_vm7, %v2911_v50  ;;  %5741 = vmatpush3.xpose.msk.msra.mxu1 %vm699_vm7, %v2987_v49 }
0x1012   :  { %5742 = vmatprep.mubr.msk.f32.mxu1 %vm6555_vm6, %v6542_v0  ;;  %5745 = vmatprep.subr.mxu0 %v6542_v0 }
0x1013   :  { %5750 = vmatprep.subr.mxu1 %v6542_v0 }
0x1014   :  { %5738 = vmatmul.mubr.msk.f32.vlgmr.msra.gmra.mrb[32].mxu0 %vm699_vm7, %v7287_v36  ;;  %5743 = vmatmul.mubr.msk.f32.vlgmr.msra.gmra.mrb[22].mxu1 %vm699_vm7, %v7280_v45  ;;  %v3063_v51 = vpop.permute.xlu1 %3062 }
0x1015   :  { %5746 = vmatpush3.xpose.msk.msra.mxu0 %vm699_vm7, %v3063_v51  ;;  %5747 = vmatprep.mubr.msk.f32.mxu0 %vm6555_vm6, %v6542_v0 }
0x1016   :  { %5755 = vmatprep.subr.mxu0 %v6542_v0  ;;  %5752 = vmatprep.mubr.msk.f32.mxu1 %vm6555_vm6, %v6542_v0 }
0x1018   :  { %5748 = vmatmul.mubr.msk.f32.vlgmr.msra.gmra.mrb[34].mxu0 %vm699_vm7, %v7296_v37 }
0x1019   :  { %5757 = vmatprep.mubr.msk.f32.mxu0 %vm6555_vm6, %v6542_v0 }
0x1073   :  { %v2602_v25 = vpop.f32.mrb[26].mxu0 }
0x1074   :  { %v3138_v52 = vmul.f32 0.35355338, %v2602_v25  ;;  %v5714_v53 = vpop.f32.mrb[27].mxu0 }
0x1076   :  { %v3146_v26 = vsel %vm699_vm7, %v3138_v52, -inf }
0x1077   :  { %3147 = vmax.xlane.f32.xlu0 %v3146_v26 }
0x107c   :  { %v2678_v54 = vpop.f32.mrb[28].mxu0 }
0x107d   :  { %v3139_v55 = vmul.f32 0.35355338, %v2678_v54  ;;  %v5719_v56 = vpop.f32.mrb[29].mxu0 }
0x107f   :  { %v3149_v57 = vsel %vm699_vm7, %v3139_v55, -inf }
0x1080   :  { %3150 = vmax.xlane.f32.xlu1 %v3149_v57 }
0x10de   :  { %v2830_v58 = vpop.f32.mrb[30].mxu0 }
0x10df   :  { %v2754_v59 = vpop.f32.mrb[18].mxu1  ;;  %v5729_v60 = vpop.f32.mrb[31].mxu0  ;;  %v3141_v63 = vmul.f32 0.35355338, %v2830_v58 }
0x10e0   :  { %v3140_v61 = vmul.f32 0.35355338, %v2754_v59  ;;  %v5724_v62 = vpop.f32.mrb[19].mxu1 }
0x10e1   :  { %v3155_v6 = vsel %vm699_vm7, %v3141_v63, -inf }
0x10e2   :  { %v3152_v1 = vsel %vm699_vm7, %v3140_v61, -inf }
0x10e3   :  { %3153 = vmax.xlane.f32.xlu0 %v3152_v1  ;;  %v2906_v2 = vpop.f32.mrb[20].mxu1 }
0x10e4   :  { %v3142_v3 = vmul.f32 0.35355338, %v2906_v2  ;;  %v5734_v4 = vpop.f32.mrb[21].mxu1 }
0x10e6   :  { %v3158_v5 = vsel %vm699_vm7, %v3142_v3, -inf }
0x10e7   :  { %v3058_v7 = vpop.f32.mrb[22].mxu1  ;;  %3159 = vmax.xlane.f32.xlu1 %v3158_v5  ;;  %3156 = vmax.xlane.f32.xlu0 %v3155_v6  ;;  %v2982_v8 = vpop.f32.mrb[32].mxu0 }
0x10e8   :  { %v3144_v11 = vmul.f32 0.35355338, %v3058_v7  ;;  %v3143_v12 = vmul.f32 0.35355338, %v2982_v8  ;;  %v5739_v14 = vpop.f32.mrb[33].mxu0  ;;  %v5744_v15 = vpop.f32.mrb[23].mxu1 }
0x10ea   :  { %v3164_v16 = vsel %vm699_vm7, %v3144_v11, -inf  ;;  %v3161_v17 = vsel %vm699_vm7, %v3143_v12, -inf }
0x10eb   :  { %3165 = vmax.xlane.f32.xlu1 %v3164_v16  ;;  %3162 = vmax.xlane.f32.xlu0 %v3161_v17  ;;  %v3134_v18 = vpop.f32.mrb[34].mxu0 }
0x10ec   :  { %v3145_v19 = vmul.f32 0.35355338, %v3134_v18  ;;  %v5749_v20 = vpop.f32.mrb[35].mxu0 }
0x10ee   :  { %v3167_v21 = vsel %vm699_vm7, %v3145_v19, -inf }
0x10ef   :  { %3168 = vmax.xlane.f32.xlu0 %v3167_v21 }
0x10fc   :  { %3243 = vrot.lane.b32.xlu1 %v7254_v32, %s6544_s28 }
0x1100   :  { %3395 = vrot.lane.b32.xlu1 %v7276_v35, %s6544_s28 }
0x1104   :  { %3471 = vrot.lane.b32.xlu1 %v7272_v33, %s6544_s28  ;;  %v3148_v44 = vpop.xlane.xlu0 %3147 }
0x1105   :  { %3319 = vrot.lane.b32.xlu0 %v7252_v30, %s6544_s28  ;;  %v3170_v23 = vsub.f32 %v3138_v52, %v3148_v44 }
0x1107   :  { %v3178_v27 = vmul.f32 1.442695, %v3170_v23 }
0x1108   :  { %3623 = vrot.lane.b32.xlu1 %v7287_v36, %s6544_s28 }
0x1109   :  { %3547 = vrot.lane.b32.xlu0 %v7282_v34, %s6544_s28 }
0x110d   :  { %v3151_v22 = vpop.xlane.xlu1 %3150 }
0x110e   :  { %v3171_v40 = vsub.f32 %v3139_v55, %v3151_v22 }
0x1110   :  { %v3180_v24 = vmul.f32 1.442695, %v3171_v40 }
0x1112   :  { %6029 = vpow2.f32 %v3180_v24 }
0x1113   :  { %6031 = vpow2.f32 %v3178_v27 }
0x111c   :  { %v7364_v29 = vpop.eup %6029 }
0x111d   :  { %v3197_v31 = vsel %vm699_vm7, %v7364_v29, 0.0  ;;  %v7368_v30 = vpop.eup %6031 }
0x111e   :  { %v3194_v32 = vsel %vm699_vm7, %v7368_v30, 0.0 }
0x1128   :  { %3198 = vadd.xlane.f32.xlu0 %v3197_v31 }
0x112c   :  { %3195 = vadd.xlane.f32.xlu1 %v3194_v32 }
0x1170   :  { %v3154_v33 = vpop.xlane.xlu0 %3153 }
0x1171   :  { %v3172_v35 = vsub.f32 %v3140_v61, %v3154_v33 }
0x1173   :  { %v3182_v34 = vmul.f32 1.442695, %v3172_v35 }
0x1174   :  { %v3157_v46 = vpop.xlane.xlu0 %3156  ;;  %v3160_v36 = vpop.xlane.xlu1 %3159 }
0x1175   :  { %6033 = vpow2.f32 %v3182_v34  ;;  %v3173_v42 = vsub.f32 %v3141_v63, %v3157_v46  ;;  %v3174_v43 = vsub.f32 %v3142_v3, %v3160_v36 }
0x1177   :  { %v3184_v47 = vmul.f32 1.442695, %v3173_v42  ;;  %v3186_v48 = vmul.f32 1.442695, %v3174_v43 }
0x1178   :  { %v3163_v49 = vpop.xlane.xlu0 %3162  ;;  %v3166_v50 = vpop.xlane.xlu1 %3165 }
0x1179   :  { %6035 = vpow2.f32 %v3184_v47  ;;  %v3175_v51 = vsub.f32 %v3143_v12, %v3163_v49  ;;  %v3176_v25 = vsub.f32 %v3144_v11, %v3166_v50  ;;  %v503_v50 = vld [vmem:[#allocation16 + $0x20] sm:$0xff] }
0x117a   :  { %6037 = vpow2.f32 %v3186_v48 }
0x117b   :  { %v3188_v52 = vmul.f32 1.442695, %v3175_v51  ;;  %v3190_v53 = vmul.f32 1.442695, %v3176_v25  ;;  %v504_v51 = vld [vmem:[#allocation16 + $0x28] sm:$0xff] }
0x117c   :  { %v3169_v26 = vpop.xlane.xlu0 %3168  ;;  %v3244_v54 = vpop.permute.xlu1 %3243  ;;  %v5883_v25 = vpack.c.bf16 %v504_v51, %v503_v50  ;;  %v530_v51 = vld [vmem:[%s7635_s13 + $0x58] sm:$0xff] }
0x117d   :  { %6039 = vpow2.f32 %v3188_v52  ;;  %v3177_v55 = vsub.f32 %v3145_v19, %v3169_v26  ;;  %5751 = vmatpush3.msra.mxu1 %v3244_v54  ;;  %v505_v52 = vld [vmem:[#allocation16 + $0x30] sm:$0xff] }
0x117e   :  { %6041 = vpow2.f32 %v3190_v53  ;;  %5760 = vmatprep.subr.mxu1 %v6542_v0  ;;  %v506_v53 = vld [vmem:[#allocation16 + $0x38] sm:$0xff] }
0x117f   :  { %v6034_v56 = vpop.eup %6033  ;;  %v3192_v57 = vmul.f32 1.442695, %v3177_v55  ;;  %v5887_v26 = vpack.c.bf16 %v506_v53, %v505_v52  ;;  %v531_v52 = vld [vmem:[%s7635_s13 + $0x60] sm:$0xff]  ;;  %v532_v53 = vld [vmem:[%s7635_s13 + $0x68] sm:$0xff] }
0x1180   :  { %v3320_v58 = vpop.permute.xlu0 %3319  ;;  %v3200_v59 = vsel %vm699_vm7, %v6034_v56, 0.0  ;;  %v3396_v7 = vpop.permute.xlu1 %3395 }
0x1181   :  { %6043 = vpow2.f32 %v3192_v57  ;;  %3201 = vadd.xlane.f32.xlu1 %v3200_v59  ;;  %5756 = vmatpush3.msra.mxu0 %v3320_v58 }
0x1182   :  { %5765 = vmatprep.subr.mxu0 %v6542_v0 }
0x1183   :  { %v6036_v60 = vpop.eup %6035 }
0x1184   :  { %v6038_v61 = vpop.eup %6037  ;;  %v3203_v62 = vsel %vm699_vm7, %v6036_v60, 0.0  ;;  %v3472_v8 = vpop.permute.xlu1 %3471 }
0x1185   :  { %3204 = vadd.xlane.f32.xlu0 %v3203_v62  ;;  %v3206_v63 = vsel %vm699_vm7, %v6038_v61, 0.0  ;;  %v3548_v11 = vpop.permute.xlu0 %3547 }
0x1186   :  { %3207 = vadd.xlane.f32.xlu1 %v3206_v63 }
0x1187   :  { %v7377_v1 = vpop.eup %6039 }
0x1188   :  { %v7379_v2 = vpop.eup %6041  ;;  %v3209_v3 = vsel %vm699_vm7, %v7377_v1, 0.0  ;;  %v3624_v12 = vpop.permute.xlu1 %3623 }
0x1189   :  { %3210 = vadd.xlane.f32.xlu0 %v3209_v3  ;;  %v3212_v4 = vsel %vm699_vm7, %v7379_v2, 0.0 }
0x118a   :  { %3213 = vadd.xlane.f32.xlu1 %v3212_v4 }
0x118b   :  { %v7385_v5 = vpop.eup %6043 }
0x118c   :  { %v3215_v6 = vsel %vm699_vm7, %v7385_v5, 0.0 }
0x118d   :  { %3216 = vadd.xlane.f32.xlu0 %v3215_v6 }
0x119b   :  { %3775 = vrot.lane.b32.xlu1 %v7296_v37, %s6544_s28 }
0x11a3   :  { %3699 = vrot.lane.b32.xlu0 %v7280_v45, %s6544_s28 }
0x11b5   :  { %v3199_v14 = vpop.xlane.xlu0 %3198 }
0x11b6   :  { %6045 = vrcp.f32 %v3199_v14 }
0x11b9   :  { %v3196_v15 = vpop.xlane.xlu1 %3195 }
0x11ba   :  { %6047 = vrcp.f32 %v3196_v15 }
0x11c0   :  { %v6046_v16 = vpop.eup %6045 }
0x11c1   :  { %v3227_v17 = vmul.f32 %v6046_v16, %v7364_v29 }
0x11c3   :  { %3236 = vst.msk [vmem:[#allocation32 + $0x48] sm:$0xff] %vm699_vm7, %v3227_v17  ;;  %5758 = vmatmul.mubr.msk.f32.vlgmr.msra.gmra.mrb[36].mxu0 %vm699_vm7, %v3227_v17 }
0x11c4   :  { %v6048_v18 = vpop.eup %6047  ;;  %5766 = vmatpush3.msra.mxu0 %v3472_v8  ;;  %5767 = vmatprep.mubr.msk.f32.mxu0 %vm6555_vm6, %v6542_v0 }
0x11c5   :  { %v3226_v45 = vmul.f32 %v6048_v18, %v7368_v30  ;;  %5775 = vmatprep.subr.mxu0 %v6542_v0  ;;  %v5433_v18 = vld [vmem:[#allocation18 + $0x1] ss:$0 sm:$0xff] }
0x11c7   :  { %3235 = vst.msk [vmem:[#allocation32 + $0x40] sm:$0xff] %vm699_vm7, %v3226_v45  ;;  %5753 = vmatmul.mubr.msk.f32.vlgmr.msra.gmra.mrb[24].mxu1 %vm699_vm7, %v3226_v45 }
0x11c8   :  { %5761 = vmatpush3.msra.mxu1 %v3396_v7  ;;  %5762 = vmatprep.mubr.msk.f32.mxu1 %vm6555_vm6, %v6542_v0 }
0x11c9   :  { %5770 = vmatprep.subr.mxu1 %v6542_v0 }
0x120e   :  { %v3202_v37 = vpop.xlane.xlu1 %3201 }
0x120f   :  { %6049 = vrcp.f32 %v3202_v37 }
0x1212   :  { %v3205_v19 = vpop.xlane.xlu0 %3204 }
0x1213   :  { %6051 = vrcp.f32 %v3205_v19  ;;  %v3208_v20 = vpop.xlane.xlu1 %3207 }
0x1214   :  { %6053 = vrcp.f32 %v3208_v20 }
0x1216   :  { %v3211_v21 = vpop.xlane.xlu0 %3210 }
0x1217   :  { %6055 = vrcp.f32 %v3211_v21  ;;  %v3214_v22 = vpop.xlane.xlu1 %3213 }
0x1218   :  { %6057 = vrcp.f32 %v3214_v22 }
0x1219   :  { %v6050_v40 = vpop.eup %6049 }
0x121a   :  { %v3228_v44 = vmul.f32 %v6050_v40, %v6034_v56  ;;  %v3217_v23 = vpop.xlane.xlu0 %3216 }
0x121b   :  { %6059 = vrcp.f32 %v3217_v23  ;;  %v3776_v46 = vpop.permute.xlu1 %3775 }
0x121c   :  { %3237 = vst.msk [vmem:[#allocation32 + $0x50] sm:$0xff] %vm699_vm7, %v3228_v44  ;;  %5763 = vmatmul.mubr.msk.f32.vlgmr.msra.gmra.mrb[26].mxu1 %vm699_vm7, %v3228_v44 }
0x121d   :  { %v6052_v24 = vpop.eup %6051  ;;  %5771 = vmatpush3.msra.mxu1 %v3548_v11  ;;  %5772 = vmatprep.mubr.msk.f32.mxu1 %vm6555_vm6, %v6542_v0 }
0x121e   :  { %v6054_v27 = vpop.eup %6053  ;;  %v3229_v29 = vmul.f32 %v6052_v24, %v6036_v60  ;;  %5780 = vmatprep.subr.mxu1 %v6542_v0  ;;  %v3700_v30 = vpop.permute.xlu0 %3699 }
0x121f   :  { %v3230_v31 = vmul.f32 %v6054_v27, %v6038_v61 }
0x1220   :  { %3238 = vst.msk [vmem:[#allocation32 + $0x58] sm:$0xff] %vm699_vm7, %v3229_v29  ;;  %5768 = vmatmul.mubr.msk.f32.vlgmr.msra.gmra.mrb[38].mxu0 %vm699_vm7, %v3229_v29 }
0x1221   :  { %v6056_v32 = vpop.eup %6055  ;;  %3239 = vst.msk [vmem:[#allocation32 + $0x60] sm:$0xff] %vm699_vm7, %v3230_v31  ;;  %5773 = vmatmul.mubr.msk.f32.vlgmr.msra.gmra.mrb[28].mxu1 %vm699_vm7, %v3230_v31  ;;  %5776 = vmatpush3.msra.mxu0 %v3624_v12 }
0x1222   :  { %v6058_v33 = vpop.eup %6057  ;;  %v3231_v35 = vmul.f32 %v6056_v32, %v7377_v1  ;;  %5781 = vmatpush3.msra.mxu1 %v3700_v30  ;;  %5777 = vmatprep.mubr.msk.f32.mxu0 %vm6555_vm6, %v6542_v0 }
0x1223   :  { %v3232_v34 = vmul.f32 %v6058_v33, %v7379_v2  ;;  %5782 = vmatprep.mubr.msk.f32.mxu1 %vm6555_vm6, %v6542_v0  ;;  %5785 = vmatprep.subr.mxu0 %v6542_v0 }
0x1224   :  { %3240 = vst.msk [vmem:[#allocation32 + $0x68] sm:$0xff] %vm699_vm7, %v3231_v35  ;;  %5778 = vmatmul.mubr.msk.f32.vlgmr.msra.gmra.mrb[40].mxu0 %vm699_vm7, %v3231_v35  ;;  %5884 = vmatprep.subr.bf16.mxu1 %v5883_v25  ;;  %v513_v35 = vld [vmem:[#allocation22 + $0x20] sm:$0xff] }
0x1225   :  { %v6060_v36 = vpop.eup %6059  ;;  %3241 = vst.msk [vmem:[#allocation32 + $0x70] sm:$0xff] %vm699_vm7, %v3232_v34  ;;  %5783 = vmatmul.mubr.msk.f32.vlgmr.msra.gmra.mrb[30].mxu1 %vm699_vm7, %v3232_v34  ;;  %5786 = vmatpush3.msra.mxu0 %v3776_v46  ;;  %v514_v34 = vld [vmem:[#allocation22 + $0x28] sm:$0xff]  ;;  %v515_v46 = vld [vmem:[#allocation22 + $0x30] sm:$0xff] }
0x1226   :  { %v3233_v42 = vmul.f32 %v6060_v36, %v7385_v5  ;;  %5787 = vmatprep.mubr.msk.f32.mxu0 %vm6555_vm6, %v6542_v0  ;;  %5886 = vmatpush3.bf16.msra.mxu1 %v5883_v25  ;;  %v5891_v36 = vpack.c.bf16 %v514_v34, %v513_v35 }
0x1227   :  { %5888 = vmatprep.subr.bf16.mxu1 %v5887_v26 }
0x1228   :  { %3242 = vst.msk [vmem:[#allocation32 + $0x78] sm:$0xff] %vm699_vm7, %v3233_v42  ;;  %5788 = vmatmul.mubr.msk.f32.vlgmr.msra.gmra.mrb[42].mxu0 %vm699_vm7, %v3233_v42  ;;  %v516_v42 = vld [vmem:[#allocation22 + $0x38] sm:$0xff]  ;;  %5892 = vmatprep.subr.bf16.mxu0 %v5891_v36 }
0x1229   :  { %5894 = vmatpush3.bf16.msra.mxu0 %v5891_v36 }
0x122a   :  { %5890 = vmatpush3.bf16.msra.mxu1 %v5887_v26  ;;  %v5907_v26 = vpack.c.bf16 %v532_v53, %v531_v52 }
0x1296   :  { %v3391_v43 = vpop.f32.mrb[36].mxu0 }
0x1297   :  { %v5759_v47 = vpop.f32.mrb[37].mxu0 }
0x1298   :  { %v527_v47 = vld [vmem:[%s7635_s13 + $0x40] sm:$0xff] }
0x129a   :  { %v3315_v48 = vpop.f32.mrb[24].mxu1 }
0x129b   :  { %v5754_v49 = vpop.f32.mrb[25].mxu1 }
0x129c   :  { %v529_v49 = vld [vmem:[%s7635_s13 + $0x50] sm:$0xff] }
0x129d   :  { %v5903_v25 = vpack.c.bf16 %v530_v51, %v529_v49 }
0x12ef   :  { %v3467_v54 = vpop.f32.mrb[26].mxu1 }
0x12f0   :  { %3853 = vrot.lane.b32.xlu0 %v3467_v54, %s6526_s3  ;;  %v5764_v55 = vpop.f32.mrb[27].mxu1 }
0x12f3   :  { %v3543_v56 = vpop.f32.mrb[38].mxu0 }
0x12f4   :  { %v3619_v57 = vpop.f32.mrb[28].mxu1  ;;  %3855 = vrot.lane.b32.xlu1 %v3543_v56, %s6526_s3  ;;  %v5769_v58 = vpop.f32.mrb[39].mxu0 }
0x12f5   :  { %3861 = vrot.lane.b32.xlu0 %v3619_v57, %s7661_s7  ;;  %v5774_v59 = vpop.f32.mrb[29].mxu1 }
0x12f7   :  { %v3695_v60 = vpop.f32.mrb[40].mxu0 }
0x12f8   :  { %v3771_v61 = vpop.f32.mrb[30].mxu1  ;;  %3863 = vrot.lane.b32.xlu1 %v3695_v60, %s7661_s7  ;;  %v5779_v62 = vpop.f32.mrb[41].mxu0 }
0x12f9   :  { %3869 = vrot.lane.b32.xlu0 %v3771_v61, %s6559_s9  ;;  %v5784_v63 = vpop.f32.mrb[31].mxu1 }
0x12fb   :  { %v3847_v1 = vpop.f32.mrb[42].mxu0 }
0x12fc   :  { %3871 = vrot.lane.b32.xlu1 %v3847_v1, %s6559_s9  ;;  %v5789_v2 = vpop.f32.mrb[43].mxu0 }
0x1362   :  { %v3854_v3 = vpop.permute.xlu0 %3853 }
0x1363   :  { %v3875_v6 = vsel %vm699_vm7, %v3315_v48, %v3854_v3  ;;  %v528_v48 = vld [vmem:[%s7635_s13 + $0x48] sm:$0xff] }
0x1364   :  { %v5899_v50 = vpack.c.bf16 %v528_v48, %v527_v47 }
0x1366   :  { %v3856_v4 = vpop.permute.xlu1 %3855  ;;  %5900 = vmatprep.subr.bf16.mxu1 %v5899_v50 }
0x1367   :  { %v3862_v5 = vpop.permute.xlu0 %3861  ;;  %v3876_v14 = vsel %vm699_vm7, %v3391_v43, %v3856_v4  ;;  %v5895_v43 = vpack.c.bf16 %v516_v42, %v515_v46 }
0x1368   :  { %v3877_v8 = vsel %vm336_vm0, %v3875_v6, %v3862_v5 }
0x1369   :  { %5896 = vmatprep.subr.bf16.mxu0 %v5895_v43 }
0x136a   :  { %v3864_v7 = vpop.permute.xlu1 %3863  ;;  %5898 = vmatpush3.bf16.msra.mxu0 %v5895_v43 }
0x136b   :  { %v3870_v11 = vpop.permute.xlu0 %3869  ;;  %v3878_v15 = vsel %vm336_vm0, %v3876_v14, %v3864_v7  ;;  %v5436_v7 = vld [vmem:[#allocation19 + $0x1] ss:$0 sm:$0xff] }
0x136c   :  { %v3879_v12 = vsel %vm2046_vm8, %v3877_v8, %v3870_v11 }
0x136d   :  { %5798 = vmatprep.mubr.msk.f32.mxu1 %vm537_vm1, %v3879_v12  ;;  %v5437_v12 = vld [vmem:[#allocation21 + $0x1] ss:$0 sm:$0xff] }
0x136e   :  { %v3872_v16 = vpop.permute.xlu1 %3871 }
0x136f   :  { %v3880_v17 = vsel %vm2046_vm8, %v3878_v15, %v3872_v16 }
0x1370   :  { %5799 = vmatmul.mubr.msk.f32.vlgmr.msra.gmra.mrb[32].mxu1 %vm537_vm1, %v3880_v17 }
0x1371   :  { %5902 = vmatpush3.bf16.msra.mxu1 %v5899_v50 }
0x1372   :  { %5904 = vmatprep.subr.bf16.mxu1 %v5903_v25 }
0x1375   :  { %5906 = vmatpush3.bf16.msra.mxu1 %v5903_v25 }
0x1376   :  { %5908 = vmatprep.subr.bf16.mxu1 %v5907_v26 }
0x1379   :  { %5910 = vmatpush3.bf16.msra.mxu1 %v5907_v26 }
0x1443   :  { %v5800_v45 = vpop.f32.mrb[32].mxu1 }
0x1444   :  { %v3965_v37 = vadd.f32 %v5800_v45, %v5433_v18  ;;  %v3959_v19 = vpop.f32.mrb[33].mxu1 }
0x1445   :  { %v3960_v20 = vadd.f32 %v5433_v18, %v3959_v19  ;;  %v534_v19 = vld [vmem:[%s7635_s13 + $0x78] sm:$0xff] }
0x1446   :  { %v7445_v21 = vadd.f32 %v3965_v37, %v7234_v39  ;;  %v533_v37 = vld [vmem:[%s7635_s13 + $0x70] sm:$0xff] }
0x1447   :  { %v7448_v22 = vadd.f32 %v3960_v20, %v7237_v41  ;;  %v5911_v20 = vpack.c.bf16 %v534_v19, %v533_v37 }
0x1448   :  { %v3973_v40 = vsel %vm537_vm1, %v7445_v21, 0.0 }
0x1449   :  { %3974 = vadd.xlane.f32.xlu1 %v3973_v40  ;;  %v3970_v44 = vsel %vm537_vm1, %v7448_v22, 0.0  ;;  %5912 = vmatprep.subr.bf16.mxu1 %v5911_v20  ;;  %v5438_v40 = vld [vmem:[#allocation24 + $0x1] ss:$0 sm:$0xff] }
0x144a   :  { %3971 = vadd.xlane.f32.xlu0 %v3970_v44  ;;  %5914 = vmatpush3.bf16.msra.mxu1 %v5911_v20 }
0x14d6   :  { %v3975_v23 = vpop.xlane.xlu1 %3974 }
0x14d7   :  { %v3977_v24 = vmul.f32 0.03125, %v3975_v23  ;;  %v3972_v27 = vpop.xlane.xlu0 %3971 }
0x14d8   :  { %v3976_v29 = vmul.f32 0.03125, %v3972_v27 }
0x14d9   :  { %v3979_v31 = vsub.f32 %v7445_v21, %v3977_v24 }
0x14da   :  { %v3978_v39 = vsub.f32 %v7448_v22, %v3976_v29 }
0x14db   :  { %v3981_v32 = vmul.f32 %v3979_v31, %v3979_v31  ;;  %v4011_v15 = vmul.f32 %v5436_v7, %v3979_v31 }
0x14dc   :  { %v3980_v30 = vmul.f32 %v3978_v39, %v3978_v39  ;;  %v4010_v8 = vmul.f32 %v5436_v7, %v3978_v39  ;;  %v5441_v39 = vld [vmem:[#allocation25 + $0x1] ss:$0 sm:$0xff] }
0x14dd   :  { %v3985_v33 = vsel %vm537_vm1, %v3981_v32, 0.0 }
0x14de   :  { %v3982_v41 = vsel %vm537_vm1, %v3980_v30, 0.0 }
0x14df   :  { %3983 = vadd.xlane.f32.xlu0 %v3982_v41 }
0x14e3   :  { %3986 = vadd.xlane.f32.xlu0 %v3985_v33 }
0x156c   :  { %v3984_v54 = vpop.xlane.xlu0 %3983 }
0x156d   :  { %v3988_v55 = vmul.f32 0.032258064, %v3984_v54 }
0x156f   :  { %6061 = vrsqrt.f32 %v3988_v55  ;;  %vm3992_vm0 = vcmp.eq.f32.partialorder %v3988_v55, inf  ;;  %v3995_v60 = vand.u32 2147483648, %v3988_v55  ;;  %vm3994_vm4 = vcmp.eq.f32.partialorder %v3988_v55, 0.0 }
0x1570   :  { %v3987_v56 = vpop.xlane.xlu0 %3986 }
0x1571   :  { %v3989_v57 = vmul.f32 0.032258064, %v3987_v56 }
0x1573   :  { %6063 = vrsqrt.f32 %v3989_v57  ;;  %vm3999_vm5 = vcmp.eq.f32.partialorder %v3989_v57, inf  ;;  %v4002_v3 = vand.u32 2147483648, %v3989_v57  ;;  %vm4001_vm6 = vcmp.eq.f32.partialorder %v3989_v57, 0.0 }
0x1579   :  { %v6062_v58 = vpop.eup %6061 }
0x157a   :  { %v3991_v59 = vmul.f32 %v6062_v58, %v3988_v55 }
0x157c   :  { %v3993_v61 = vsel %vm3992_vm0, %v3988_v55, %v3991_v59 }
0x157d   :  { %v6064_v62 = vpop.eup %6063  ;;  %v3996_v63 = vsel %vm3994_vm4, %v3995_v60, %v3993_v61 }
0x157e   :  { %v3998_v1 = vmul.f32 %v6064_v62, %v3989_v57  ;;  %v4012_v2 = vadd.f32 1e-06, %v3996_v63 }
0x1580   :  { %v4000_v4 = vsel %vm3999_vm5, %v3989_v57, %v3998_v1  ;;  %6065 = vrcp.f32 %v4012_v2 }
0x1581   :  { %v4003_v5 = vsel %vm4001_vm6, %v4002_v3, %v4000_v4  ;;  %v5444_v4 = vld [vmem:[#allocation27] ss:$0 sm:$0xff] }
0x1582   :  { %v4013_v6 = vadd.f32 1e-06, %v4003_v5 }
0x1584   :  { %6067 = vrcp.f32 %v4013_v6 }
0x158a   :  { %v6066_v11 = vpop.eup %6065 }
0x158b   :  { %v4015_v14 = vmul.f32 %v6066_v11, %v4010_v8  ;;  %v5445_v8 = vld [vmem:[#allocation28] ss:$0 sm:$0xff] }
0x158d   :  { %v4024_v16 = vadd.f32 %v5437_v12, %v4015_v14 }
0x158e   :  { %v6068_v17 = vpop.eup %6067 }
0x158f   :  { %v4017_v18 = vmul.f32 %v6068_v17, %v4011_v15  ;;  %5809 = vmatprep.mubr.msk.f32.mxu0 %vm537_vm1, %v4024_v16 }
0x1591   :  { %v4025_v45 = vadd.f32 %v5437_v12, %v4017_v18 }
0x1593   :  { %5810 = vmatmul.mubr.msk.f32.vlgmr.msra.gmra.mrb[44].mxu0 %vm537_vm1, %v4025_v45 }
0x1666   :  { %v5811_v44 = vpop.f32.mrb[44].mxu0 }
0x1667   :  { %v4110_v23 = vadd.f32 %v5811_v44, %v5438_v40  ;;  %v4104_v24 = vpop.f32.mrb[45].mxu0 }
0x1668   :  { %v4105_v27 = vadd.f32 %v5438_v40, %v4104_v24 }
0x1669   :  { %v4114_v31 = vmax.f32 %v4110_v23, 0.0 }
0x166a   :  { %v4113_v29 = vmax.f32 %v4105_v27, 0.0 }
0x166c   :  { %5828 = vmatprep.mubr.msk.f32.mxu1 %vm2289_vm13, %v4113_v29 }
0x166d   :  { %5829 = vmatmul.mubr.msk.f32.vlgmr.msra.gmra.mrb[34].mxu1 %vm2289_vm13, %v4114_v31 }
0x1740   :  { %v5830_v30 = vpop.f32.mrb[34].mxu1 }
0x1741   :  { %v4199_v41 = vadd.f32 %v5830_v30, %v5441_v39  ;;  %v4193_v32 = vpop.f32.mrb[35].mxu1 }
0x1742   :  { %v4194_v33 = vadd.f32 %v5441_v39, %v4193_v32 }
0x1743   :  { %v4203_v35 = vadd.f32 %v4199_v41, %v7445_v21 }
0x1744   :  { %v4202_v34 = vadd.f32 %v4194_v33, %v7448_v22 }
0x1745   :  { %v4209_v46 = vsel %vm537_vm1, %v4203_v35, 0.0 }
0x1746   :  { %4210 = vadd.xlane.f32.xlu0 %v4209_v46  ;;  %v4206_v36 = vsel %vm537_vm1, %v4202_v34, 0.0 }
0x1747   :  { %4207 = vadd.xlane.f32.xlu1 %v4206_v36 }
0x17d3   :  { %v4211_v42 = vpop.xlane.xlu0 %4210 }
0x17d4   :  { %v4213_v43 = vmul.f32 0.03125, %v4211_v42  ;;  %v4208_v47 = vpop.xlane.xlu1 %4207 }
0x17d5   :  { %v4212_v48 = vmul.f32 0.03125, %v4208_v47 }
0x17d6   :  { %v4215_v49 = vsub.f32 %v4203_v35, %v4213_v43 }
0x17d7   :  { %v4214_v50 = vsub.f32 %v4202_v34, %v4212_v48 }
0x17d8   :  { %v4217_v51 = vmul.f32 %v4215_v49, %v4215_v49  ;;  %v4247_v5 = vmul.f32 %v5444_v4, %v4215_v49 }
0x17d9   :  { %v4216_v25 = vmul.f32 %v4214_v50, %v4214_v50  ;;  %v4246_v7 = vmul.f32 %v5444_v4, %v4214_v50 }
0x17da   :  { %v4221_v52 = vsel %vm537_vm1, %v4217_v51, 0.0 }
0x17db   :  { %4222 = vadd.xlane.f32.xlu0 %v4221_v52  ;;  %v4218_v21 = vsel %vm537_vm1, %v4216_v25, 0.0 }
0x17dc   :  { %4219 = vadd.xlane.f32.xlu1 %v4218_v21 }
0x1868   :  { %v4223_v22 = vpop.xlane.xlu0 %4222 }
0x1869   :  { %v4225_v53 = vmul.f32 0.032258064, %v4223_v22  ;;  %v4220_v26 = vpop.xlane.xlu1 %4219 }
0x186a   :  { %v4224_v54 = vmul.f32 0.032258064, %v4220_v26 }
0x186b   :  { %6069 = vrsqrt.f32 %v4225_v53  ;;  %vm4235_vm7 = vcmp.eq.f32.partialorder %v4225_v53, inf  ;;  %v4238_v58 = vand.u32 2147483648, %v4225_v53  ;;  %vm4237_vm8 = vcmp.eq.f32.partialorder %v4225_v53, 0.0 }
0x186c   :  { %6071 = vrsqrt.f32 %v4224_v54  ;;  %vm4228_vm9 = vcmp.eq.f32.partialorder %v4224_v54, inf  ;;  %v4231_v61 = vand.u32 2147483648, %v4224_v54  ;;  %vm4230_vm10 = vcmp.eq.f32.partialorder %v4224_v54, 0.0 }
0x1875   :  { %v6070_v55 = vpop.eup %6069 }
0x1876   :  { %v6072_v56 = vpop.eup %6071  ;;  %v4234_v57 = vmul.f32 %v6070_v55, %v4225_v53 }
0x1877   :  { %v4227_v59 = vmul.f32 %v6072_v56, %v4224_v54 }
0x1878   :  { %v4236_v60 = vsel %vm4235_vm7, %v4225_v53, %v4234_v57 }
0x1879   :  { %v4239_v62 = vsel %vm4237_vm8, %v4238_v58, %v4236_v60  ;;  %v4229_v63 = vsel %vm4228_vm9, %v4224_v54, %v4227_v59 }
0x187a   :  { %v4249_v1 = vadd.f32 1e-06, %v4239_v62  ;;  %v4232_v2 = vsel %vm4230_vm10, %v4231_v61, %v4229_v63 }
0x187b   :  { %v4248_v3 = vadd.f32 1e-06, %v4232_v2 }
0x187c   :  { %6073 = vrcp.f32 %v4249_v1 }
0x187d   :  { %6075 = vrcp.f32 %v4248_v3 }
0x1886   :  { %v6074_v6 = vpop.eup %6073 }
0x1887   :  { %v6076_v11 = vpop.eup %6075  ;;  %v4253_v12 = vmul.f32 %v6074_v6, %v4247_v5 }
0x1888   :  { %v4251_v14 = vmul.f32 %v6076_v11, %v4246_v7 }
0x1889   :  { %v4261_v15 = vadd.f32 %v5445_v8, %v4253_v12 }
0x188a   :  { %v4260_v16 = vadd.f32 %v5445_v8, %v4251_v14 }
0x188b   :  { %v4277_v17 = vcombine.high %v4261_v15, %v6542_v0  ;;  %v4284_v18 = vrot.slane %v4261_v15, %v6966_v28 }
0x188c   :  { %v4262_v45 = vcombine.high %v4260_v16, %v6542_v0  ;;  %v4269_v37 = vrot.slane %v4260_v16, %v6966_v28 }
0x188d   :  { %v4291_v19 = vrot.slane %v4277_v17, %v6966_v28 }
0x188e   :  { %v4276_v20 = vrot.slane %v4262_v45, %v6966_v28  ;;  %v4293_v40 = vcombine.high %v4269_v37, %v4284_v18  ;;  %v4292_v44 = vcombine.low %v4269_v37, %v4284_v18 }
0x1890   :  { %v4307_v23 = vrot.slane %v4293_v40, %v6971_v38  ;;  %v4309_v24 = vcombine.high %v4276_v20, %v4291_v19  ;;  %v4300_v27 = vrot.slane %v4292_v44, %v6971_v38  ;;  %v4308_v29 = vcombine.low %v4276_v20, %v4291_v19 }
0x1892   :  { %v4323_v31 = vrot.slane %v4309_v24, %v6971_v38  ;;  %v4316_v39 = vrot.slane %v4308_v29, %v6971_v38  ;;  %v4324_v30 = vcombine.high %v4300_v27, %v6542_v0  ;;  %v4325_v33 = vcombine.high %v4307_v23, %v6542_v0 }
0x1894   :  { %v5963_v41 = vpack.i.bf16 %v4323_v31, %v4307_v23  ;;  %v4326_v32 = vcombine.high %v4316_v39, %v6542_v0  ;;  %v4327_v35 = vcombine.high %v4323_v31, %v6542_v0 }
0x1896   :  { %5964 = vrot.lane.b32.xlu0 %v5963_v41, %s6544_s28  ;;  %v5958_v34 = vpack.i.bf16 %v4326_v32, %v4324_v30  ;;  %v5968_v46 = vpack.i.bf16 %v4327_v35, %v4325_v33 }
0x1898   :  { %5959 = vrot.lane.b32.xlu1 %v5958_v34, %s6551_s18 }
0x189c   :  { %5969 = vrot.lane.b32.xlu1 %v5968_v46, %s6552_s19 }
0x1908   :  { %v5965_v42 = vpop.permute.xlu0 %5964 }
0x1909   :  { %v5967_v49 = vunpack.i.h.bf16 %v5965_v42  ;;  %v5966_v50 = vunpack.i.l.bf16 %v5965_v42 }
0x190a   :  { %v5960_v36 = vpop.permute.xlu1 %5959 }
0x190b   :  { %v5962_v38 = vunpack.i.h.bf16 %v5960_v36  ;;  %v5961_v43 = vunpack.i.l.bf16 %v5960_v36 }
0x190d   :  { %v4356_v47 = vsel %vm537_vm1, %v4316_v39, %v5962_v38  ;;  %v4352_v48 = vsel %vm537_vm1, %v4300_v27, %v5961_v43 }
0x190e   :  { %v5970_v0 = vpop.permute.xlu1 %5969  ;;  %v4353_v52 = vsel %vm2289_vm13, %v4352_v48, %v5966_v50  ;;  %v4357_v21 = vsel %vm2289_vm13, %v4356_v47, %v5967_v49 }
0x190f   :  { %v5972_v51 = vunpack.i.h.bf16 %v5970_v0  ;;  %v5971_v25 = vunpack.i.l.bf16 %v5970_v0 }
0x1911   :  { %v4355_v22 = vsel %vm4354_vm11, %v4353_v52, %v5971_v25  ;;  %v4358_v53 = vsel %vm4354_vm11, %v4357_v21, %v5972_v51 }
0x1912   :  { %v7513_v26 = vpack.c.bf16 %v4355_v22, %v4355_v22  ;;  %v7515_v54 = vpack.c.bf16 %v4358_v53, %v4358_v53 }
0x1913   :  { %6513 = dma.done.wait [#allocation3], 40960 }
0x1914   :  { %6514 = vsyncadd [#allocation3], 4294926336  ;;  %4823 = vmatprep.mubr.bf16.mxu0 %v7515_v54  ;;  %4864 = vmatprep.mubr.bf16.mxu1 %v7515_v54  ;;  %v4366_v55 = vld [vmem:[#allocation2 + $0x8] sm:$0xff]  ;;  %v4368_v56 = vld [vmem:[#allocation2 + $0x18] sm:$0xff]  ;;  %s6560_s13 = smov [#allocation32]  }
0x1915   :  { %v4365_v57 = vld [vmem:[#allocation2] sm:$0xff]  ;;  %4791 = vmatprep.subr.bf16.mxu0 %v4366_v55  ;;  %4832 = vmatprep.subr.bf16.mxu1 %v4368_v56  ;;  %v4367_v58 = vld [vmem:[#allocation2 + $0x10] sm:$0xff]  ;;  %v4386_v59 = vld [vmem:[#allocation2 + $0xa8] sm:$0xff]  ;;  %s5331_s28 = sshll.u32 %s6560_s13, 4  ;;  %s5332_s28 = int_to_ptr.vmem [resolvable:$true] %s5331_s28 }
0x1916   :  { %v4388_v60 = vld [vmem:[#allocation2 + $0xb8] sm:$0xff]  ;;  %4792 = vmatpush1.bf16.msra.mxu0 %v4365_v57  ;;  %4833 = vmatpush1.bf16.msra.mxu1 %v4367_v58  ;;  %v4385_v61 = vld [vmem:[#allocation2 + $0xa0] sm:$0xff]  ;;  %v4387_v62 = vld [vmem:[#allocation2 + $0xb0] sm:$0xff]  ;;  %s6451_s18 = scalar_lea.vmem %s5332_s28, 2048  ;;  %p6456_p11 = scmp.lt.s32.totalorder %s5332_s28, %s5332_s28 }
0x1917   :  { %4793 = vmatprep.subr.bf16.mxu0 %v4386_v59  ;;  %4834 = vmatprep.subr.bf16.mxu1 %v4388_v60  ;;  %v4406_v63 = vld [vmem:[#allocation2 + $0x148] sm:$0xff]  ;;  %v4408_v1 = vld [vmem:[#allocation2 + $0x158] sm:$0xff]  ;;  %v4405_v2 = vld [vmem:[#allocation2 + $0x140] sm:$0xff]  ;;  %p6452_p10 = scmp.ne.s32.totalorder %s5332_s28, %s6451_s18  ;;  %p6457_p12 = scmp.lt.s32.totalorder %s6451_s18, %s6451_s18 }
0x1918   :  { %v4407_v3 = vld [vmem:[#allocation2 + $0x150] sm:$0xff]  ;;  %v4426_v4 = vld [vmem:[#allocation2 + $0x1e8] sm:$0xff]  ;;  %v4428_v5 = vld [vmem:[#allocation2 + $0x1f8] sm:$0xff] }
0x1919   :  { %v4425_v6 = vld [vmem:[#allocation2 + $0x1e0] sm:$0xff]  ;;  %v4427_v7 = vld [vmem:[#allocation2 + $0x1f0] sm:$0xff]  ;;  %v4446_v8 = vld [vmem:[#allocation2 + $0x288] sm:$0xff]  ;;  %p6458_p13 = por %p6457_p12, %p6456_p11 }
0x191a   :  { %4794 = vmatpush1.bf16.msra.mxu0 %v4385_v61  ;;  %4835 = vmatpush1.bf16.msra.mxu1 %v4387_v62  ;;  %v4448_v11 = vld [vmem:[#allocation2 + $0x298] sm:$0xff]  ;;  %v4445_v12 = vld [vmem:[#allocation2 + $0x280] sm:$0xff]  ;;  %v4447_v14 = vld [vmem:[#allocation2 + $0x290] sm:$0xff] }
0x191b   :  { %4795 = vmatprep.subr.bf16.mxu0 %v4406_v63  ;;  %4836 = vmatprep.subr.bf16.mxu1 %v4408_v1  ;;  %v4466_v15 = vld [vmem:[#allocation2 + $0x328] sm:$0xff]  ;;  %v4468_v16 = vld [vmem:[#allocation2 + $0x338] sm:$0xff]  ;;  %v4465_v17 = vld [vmem:[#allocation2 + $0x320] sm:$0xff]  ;;  %p6459_p0 = pnand %p6458_p13, %p6452_p10 }
0x191c   :  { %v4467_v18 = vld [vmem:[#allocation2 + $0x330] sm:$0xff]  ;;  %v4486_v45 = vld [vmem:[#allocation2 + $0x3c8] sm:$0xff]  ;;  %v4488_v37 = vld [vmem:[#allocation2 + $0x3d8] sm:$0xff] }
0x191d   :  { %v4485_v19 = vld [vmem:[#allocation2 + $0x3c0] sm:$0xff]  ;;  %v4487_v20 = vld [vmem:[#allocation2 + $0x3d0] sm:$0xff]  ;;  %v4506_v40 = vld [vmem:[#allocation2 + $0x468] sm:$0xff] }
0x191e   :  { %4796 = vmatpush1.bf16.msra.mxu0 %v4405_v2  ;;  %4837 = vmatpush1.bf16.msra.mxu1 %v4407_v3  ;;  %v4508_v44 = vld [vmem:[#allocation2 + $0x478] sm:$0xff]  ;;  %v4505_v23 = vld [vmem:[#allocation2 + $0x460] sm:$0xff]  ;;  %v4507_v24 = vld [vmem:[#allocation2 + $0x470] sm:$0xff] }
0x191f   :  { %4797 = vmatprep.subr.bf16.mxu0 %v4426_v4  ;;  %4838 = vmatprep.subr.bf16.mxu1 %v4428_v5  ;;  %v4526_v27 = vld [vmem:[#allocation2 + $0x508] sm:$0xff]  ;;  %v4528_v29 = vld [vmem:[#allocation2 + $0x518] sm:$0xff]  ;;  %v4525_v31 = vld [vmem:[#allocation2 + $0x500] sm:$0xff] }
0x1920   :  { %v4527_v39 = vld [vmem:[#allocation2 + $0x510] sm:$0xff]  ;;  %v4546_v30 = vld [vmem:[#allocation2 + $0x5a8] sm:$0xff]  ;;  %v4548_v41 = vld [vmem:[#allocation2 + $0x5b8] sm:$0xff] }
0x1921   :  { %v4545_v32 = vld [vmem:[#allocation2 + $0x5a0] sm:$0xff]  ;;  %v4547_v33 = vld [vmem:[#allocation2 + $0x5b0] sm:$0xff]  ;;  %v4566_v35 = vld [vmem:[#allocation2 + $0x648] sm:$0xff] }
0x1922   :  { %4798 = vmatpush1.bf16.msra.mxu0 %v4425_v6  ;;  %4839 = vmatpush1.bf16.msra.mxu1 %v4427_v7  ;;  %v4568_v34 = vld [vmem:[#allocation2 + $0x658] sm:$0xff]  ;;  %v4565_v46 = vld [vmem:[#allocation2 + $0x640] sm:$0xff]  ;;  %v4567_v36 = vld [vmem:[#allocation2 + $0x650] sm:$0xff] }
0x1923   :  { %4799 = vmatprep.subr.bf16.mxu0 %v4446_v8  ;;  %4840 = vmatprep.subr.bf16.mxu1 %v4448_v11  ;;  %v4586_v42 = vld [vmem:[#allocation2 + $0x6e8] sm:$0xff]  ;;  %v4588_v38 = vld [vmem:[#allocation2 + $0x6f8] sm:$0xff]  ;;  %v4585_v43 = vld [vmem:[#allocation2 + $0x6e0] sm:$0xff] }
0x1924   :  { %v4587_v47 = vld [vmem:[#allocation2 + $0x6f0] sm:$0xff]  ;;  %v4606_v48 = vld [vmem:[#allocation2 + $0x788] sm:$0xff]  ;;  %v4608_v49 = vld [vmem:[#allocation2 + $0x798] sm:$0xff] }
0x1925   :  { %v4605_v50 = vld [vmem:[#allocation2 + $0x780] sm:$0xff]  ;;  %v4607_v0 = vld [vmem:[#allocation2 + $0x790] sm:$0xff]  ;;  %v4626_v51 = vld [vmem:[#allocation2 + $0x828] sm:$0xff] }
0x1926   :  { %4800 = vmatpush1.bf16.msra.mxu0 %v4445_v12  ;;  %4841 = vmatpush1.bf16.msra.mxu1 %v4447_v14  ;;  %v4628_v25 = vld [vmem:[#allocation2 + $0x838] sm:$0xff]  ;;  %v4625_v52 = vld [vmem:[#allocation2 + $0x820] sm:$0xff]  ;;  %v4627_v21 = vld [vmem:[#allocation2 + $0x830] sm:$0xff] }
0x1927   :  { %4801 = vmatprep.subr.bf16.mxu0 %v4466_v15  ;;  %4842 = vmatprep.subr.bf16.mxu1 %v4468_v16  ;;  %v4646_v22 = vld [vmem:[#allocation2 + $0x8c8] sm:$0xff]  ;;  %v4648_v53 = vld [vmem:[#allocation2 + $0x8d8] sm:$0xff]  ;;  %v4645_v55 = vld [vmem:[#allocation2 + $0x8c0] sm:$0xff] }
0x1928   :  { %v4647_v56 = vld [vmem:[#allocation2 + $0x8d0] sm:$0xff]  ;;  %v4666_v57 = vld [vmem:[#allocation2 + $0x968] sm:$0xff]  ;;  %v4668_v58 = vld [vmem:[#allocation2 + $0x978] sm:$0xff] }
0x1929   :  { %v4665_v59 = vld [vmem:[#allocation2 + $0x960] sm:$0xff]  ;;  %v4667_v60 = vld [vmem:[#allocation2 + $0x970] sm:$0xff]  ;;  %v4370_v61 = vld [vmem:[#allocation2 + $0x28] sm:$0xff] }
0x192a   :  { %4802 = vmatpush1.bf16.msra.mxu0 %v4465_v17  ;;  %4843 = vmatpush1.bf16.msra.mxu1 %v4467_v18  ;;  %v4372_v62 = vld [vmem:[#allocation2 + $0x38] sm:$0xff]  ;;  %v4369_v63 = vld [vmem:[#allocation2 + $0x20] sm:$0xff]  ;;  %v4371_v1 = vld [vmem:[#allocation2 + $0x30] sm:$0xff] }
0x192b   :  { %4803 = vmatprep.subr.bf16.mxu0 %v4486_v45  ;;  %4844 = vmatprep.subr.bf16.mxu1 %v4488_v37  ;;  %v4390_v2 = vld [vmem:[#allocation2 + $0xc8] sm:$0xff]  ;;  %v4392_v3 = vld [vmem:[#allocation2 + $0xd8] sm:$0xff]  ;;  %v4389_v4 = vld [vmem:[#allocation2 + $0xc0] sm:$0xff] }
0x192c   :  { %v4391_v5 = vld [vmem:[#allocation2 + $0xd0] sm:$0xff]  ;;  %v4410_v6 = vld [vmem:[#allocation2 + $0x168] sm:$0xff]  ;;  %v4412_v7 = vld [vmem:[#allocation2 + $0x178] sm:$0xff] }
0x192d   :  { %v4409_v8 = vld [vmem:[#allocation2 + $0x160] sm:$0xff]  ;;  %v4411_v11 = vld [vmem:[#allocation2 + $0x170] sm:$0xff]  ;;  %v4430_v12 = vld [vmem:[#allocation2 + $0x208] sm:$0xff] }
0x192e   :  { %4804 = vmatpush1.bf16.msra.mxu0 %v4485_v19  ;;  %4845 = vmatpush1.bf16.msra.mxu1 %v4487_v20  ;;  %v4432_v14 = vld [vmem:[#allocation2 + $0x218] sm:$0xff]  ;;  %v4429_v15 = vld [vmem:[#allocation2 + $0x200] sm:$0xff]  ;;  %v4431_v16 = vld [vmem:[#allocation2 + $0x210] sm:$0xff] }
0x192f   :  { %4805 = vmatprep.subr.bf16.mxu0 %v4506_v40  ;;  %4846 = vmatprep.subr.bf16.mxu1 %v4508_v44  ;;  %v4450_v17 = vld [vmem:[#allocation2 + $0x2a8] sm:$0xff]  ;;  %v4452_v18 = vld [vmem:[#allocation2 + $0x2b8] sm:$0xff]  ;;  %v4449_v45 = vld [vmem:[#allocation2 + $0x2a0] sm:$0xff] }
0x1930   :  { %v4451_v37 = vld [vmem:[#allocation2 + $0x2b0] sm:$0xff]  ;;  %v4470_v19 = vld [vmem:[#allocation2 + $0x348] sm:$0xff]  ;;  %v4472_v20 = vld [vmem:[#allocation2 + $0x358] sm:$0xff] }
0x1931   :  { %v4469_v40 = vld [vmem:[#allocation2 + $0x340] sm:$0xff]  ;;  %v4471_v44 = vld [vmem:[#allocation2 + $0x350] sm:$0xff] }
0x1932   :  { %4806 = vmatpush1.bf16.msra.mxu0 %v4505_v23  ;;  %4847 = vmatpush1.bf16.msra.mxu1 %v4507_v24  ;;  %v4490_v23 = vld [vmem:[#allocation2 + $0x3e8] sm:$0xff]  ;;  %v4492_v24 = vld [vmem:[#allocation2 + $0x3f8] sm:$0xff] }
0x1933   :  { %4807 = vmatprep.subr.bf16.mxu0 %v4526_v27  ;;  %4848 = vmatprep.subr.bf16.mxu1 %v4528_v29  ;;  %v4489_v27 = vld [vmem:[#allocation2 + $0x3e0] sm:$0xff]  ;;  %v4491_v29 = vld [vmem:[#allocation2 + $0x3f0] sm:$0xff] }
0x1936   :  { %4808 = vmatpush1.bf16.msra.mxu0 %v4525_v31  ;;  %4849 = vmatpush1.bf16.msra.mxu1 %v4527_v39  ;;  %v4510_v31 = vld [vmem:[#allocation2 + $0x488] sm:$0xff]  ;;  %v4512_v39 = vld [vmem:[#allocation2 + $0x498] sm:$0xff] }
0x1937   :  { %4809 = vmatprep.subr.bf16.mxu0 %v4546_v30  ;;  %4850 = vmatprep.subr.bf16.mxu1 %v4548_v41  ;;  %v4509_v30 = vld [vmem:[#allocation2 + $0x480] sm:$0xff]  ;;  %v4511_v41 = vld [vmem:[#allocation2 + $0x490] sm:$0xff] }
0x193a   :  { %4810 = vmatpush1.bf16.msra.mxu0 %v4545_v32  ;;  %4851 = vmatpush1.bf16.msra.mxu1 %v4547_v33  ;;  %v4530_v32 = vld [vmem:[#allocation2 + $0x528] sm:$0xff]  ;;  %v4532_v33 = vld [vmem:[#allocation2 + $0x538] sm:$0xff] }
0x193b   :  { %4811 = vmatprep.subr.bf16.mxu0 %v4566_v35  ;;  %4852 = vmatprep.subr.bf16.mxu1 %v4568_v34  ;;  %v4529_v35 = vld [vmem:[#allocation2 + $0x520] sm:$0xff]  ;;  %v4531_v34 = vld [vmem:[#allocation2 + $0x530] sm:$0xff] }
0x193e   :  { %4812 = vmatpush1.bf16.msra.mxu0 %v4565_v46  ;;  %4853 = vmatpush1.bf16.msra.mxu1 %v4567_v36  ;;  %v4550_v46 = vld [vmem:[#allocation2 + $0x5c8] sm:$0xff]  ;;  %v4552_v36 = vld [vmem:[#allocation2 + $0x5d8] sm:$0xff] }
0x193f   :  { %4813 = vmatprep.subr.bf16.mxu0 %v4586_v42  ;;  %4854 = vmatprep.subr.bf16.mxu1 %v4588_v38  ;;  %v4549_v42 = vld [vmem:[#allocation2 + $0x5c0] sm:$0xff]  ;;  %v4551_v38 = vld [vmem:[#allocation2 + $0x5d0] sm:$0xff] }
0x1942   :  { %4814 = vmatpush1.bf16.msra.mxu0 %v4585_v43  ;;  %4855 = vmatpush1.bf16.msra.mxu1 %v4587_v47  ;;  %v4570_v43 = vld [vmem:[#allocation2 + $0x668] sm:$0xff]  ;;  %v4572_v47 = vld [vmem:[#allocation2 + $0x678] sm:$0xff] }
0x1943   :  { %4815 = vmatprep.subr.bf16.mxu0 %v4606_v48  ;;  %4856 = vmatprep.subr.bf16.mxu1 %v4608_v49  ;;  %v4569_v48 = vld [vmem:[#allocation2 + $0x660] sm:$0xff]  ;;  %v4571_v49 = vld [vmem:[#allocation2 + $0x670] sm:$0xff] }
0x1946   :  { %4816 = vmatpush1.bf16.msra.mxu0 %v4605_v50  ;;  %4857 = vmatpush1.bf16.msra.mxu1 %v4607_v0  ;;  %v4590_v50 = vld [vmem:[#allocation2 + $0x708] sm:$0xff]  ;;  %v4592_v0 = vld [vmem:[#allocation2 + $0x718] sm:$0xff] }
0x1947   :  { %4817 = vmatprep.subr.bf16.mxu0 %v4626_v51  ;;  %4858 = vmatprep.subr.bf16.mxu1 %v4628_v25  ;;  %v4589_v51 = vld [vmem:[#allocation2 + $0x700] sm:$0xff]  ;;  %v4591_v25 = vld [vmem:[#allocation2 + $0x710] sm:$0xff] }
0x194a   :  { %4818 = vmatpush1.bf16.msra.mxu0 %v4625_v52  ;;  %4859 = vmatpush1.bf16.msra.mxu1 %v4627_v21  ;;  %v4610_v52 = vld [vmem:[#allocation2 + $0x7a8] sm:$0xff]  ;;  %v4612_v21 = vld [vmem:[#allocation2 + $0x7b8] sm:$0xff] }
0x194b   :  { %4819 = vmatprep.subr.bf16.mxu0 %v4646_v22  ;;  %4860 = vmatprep.subr.bf16.mxu1 %v4648_v53  ;;  %v4609_v22 = vld [vmem:[#allocation2 + $0x7a0] sm:$0xff]  ;;  %v4611_v53 = vld [vmem:[#allocation2 + $0x7b0] sm:$0xff] }
0x194e   :  { %4820 = vmatpush1.bf16.msra.mxu0 %v4645_v55  ;;  %4861 = vmatpush1.bf16.msra.mxu1 %v4647_v56  ;;  %v4630_v55 = vld [vmem:[#allocation2 + $0x848] sm:$0xff]  ;;  %v4632_v56 = vld [vmem:[#allocation2 + $0x858] sm:$0xff] }
0x194f   :  { %4821 = vmatprep.subr.bf16.mxu0 %v4666_v57  ;;  %4862 = vmatprep.subr.bf16.mxu1 %v4668_v58  ;;  %v4629_v57 = vld [vmem:[#allocation2 + $0x840] sm:$0xff]  ;;  %v4631_v58 = vld [vmem:[#allocation2 + $0x850] sm:$0xff] }
0x1952   :  { %4822 = vmatpush1.bf16.msra.mxu0 %v4665_v59  ;;  %4863 = vmatpush1.bf16.msra.mxu1 %v4667_v60  ;;  %v4650_v59 = vld [vmem:[#allocation2 + $0x8e8] sm:$0xff]  ;;  %v4652_v60 = vld [vmem:[#allocation2 + $0x8f8] sm:$0xff] }
0x1953   :  { %4873 = vmatprep.subr.bf16.mxu0 %v4370_v61  ;;  %4914 = vmatprep.subr.bf16.mxu1 %v4372_v62  ;;  %v4649_v61 = vld [vmem:[#allocation2 + $0x8e0] sm:$0xff]  ;;  %v4651_v62 = vld [vmem:[#allocation2 + $0x8f0] sm:$0xff] }
0x1955   :  { %4824 = vmatmul.mubr.bf16.vlgmr.msra.gmra.mrb[48].mxu0 %v7513_v26  ;;  %4865 = vmatmul.mubr.bf16.vlgmr.msra.gmra.mrb[36].mxu1 %v7513_v26 }
0x1956   :  { %4874 = vmatpush1.bf16.msra.mxu0 %v4369_v63  ;;  %4915 = vmatpush1.bf16.msra.mxu1 %v4371_v1  ;;  %v4670_v63 = vld [vmem:[#allocation2 + $0x988] sm:$0xff]  ;;  %v4672_v1 = vld [vmem:[#allocation2 + $0x998] sm:$0xff] }
0x1957   :  { %4875 = vmatprep.subr.bf16.mxu0 %v4390_v2  ;;  %4916 = vmatprep.subr.bf16.mxu1 %v4392_v3  ;;  %v4669_v2 = vld [vmem:[#allocation2 + $0x980] sm:$0xff]  ;;  %v4671_v3 = vld [vmem:[#allocation2 + $0x990] sm:$0xff] }
0x1958   :  { %4905 = vmatprep.mubr.bf16.mxu0 %v7515_v54  ;;  %4946 = vmatprep.mubr.bf16.mxu1 %v7515_v54 }
0x195a   :  { %4876 = vmatpush1.bf16.msra.mxu0 %v4389_v4  ;;  %4917 = vmatpush1.bf16.msra.mxu1 %v4391_v5  ;;  %v4374_v4 = vld [vmem:[#allocation2 + $0x48] sm:$0xff]  ;;  %v4376_v5 = vld [vmem:[#allocation2 + $0x58] sm:$0xff] }
0x195b   :  { %4877 = vmatprep.subr.bf16.mxu0 %v4410_v6  ;;  %4918 = vmatprep.subr.bf16.mxu1 %v4412_v7  ;;  %v4373_v6 = vld [vmem:[#allocation2 + $0x40] sm:$0xff]  ;;  %v4375_v7 = vld [vmem:[#allocation2 + $0x50] sm:$0xff] }
0x195e   :  { %4878 = vmatpush1.bf16.msra.mxu0 %v4409_v8  ;;  %4919 = vmatpush1.bf16.msra.mxu1 %v4411_v11  ;;  %v4394_v8 = vld [vmem:[#allocation2 + $0xe8] sm:$0xff]  ;;  %v4396_v11 = vld [vmem:[#allocation2 + $0xf8] sm:$0xff] }
0x195f   :  { %4879 = vmatprep.subr.bf16.mxu0 %v4430_v12  ;;  %4920 = vmatprep.subr.bf16.mxu1 %v4432_v14  ;;  %v4393_v12 = vld [vmem:[#allocation2 + $0xe0] sm:$0xff]  ;;  %v4395_v14 = vld [vmem:[#allocation2 + $0xf0] sm:$0xff] }
0x1962   :  { %4880 = vmatpush1.bf16.msra.mxu0 %v4429_v15  ;;  %4921 = vmatpush1.bf16.msra.mxu1 %v4431_v16  ;;  %v4414_v15 = vld [vmem:[#allocation2 + $0x188] sm:$0xff]  ;;  %v4416_v16 = vld [vmem:[#allocation2 + $0x198] sm:$0xff] }
0x1963   :  { %4881 = vmatprep.subr.bf16.mxu0 %v4450_v17  ;;  %4922 = vmatprep.subr.bf16.mxu1 %v4452_v18  ;;  %v4413_v17 = vld [vmem:[#allocation2 + $0x180] sm:$0xff]  ;;  %v4415_v18 = vld [vmem:[#allocation2 + $0x190] sm:$0xff] }
0x1966   :  { %4882 = vmatpush1.bf16.msra.mxu0 %v4449_v45  ;;  %4923 = vmatpush1.bf16.msra.mxu1 %v4451_v37  ;;  %v4434_v45 = vld [vmem:[#allocation2 + $0x228] sm:$0xff]  ;;  %v4436_v37 = vld [vmem:[#allocation2 + $0x238] sm:$0xff] }
0x1967   :  { %4883 = vmatprep.subr.bf16.mxu0 %v4470_v19  ;;  %4924 = vmatprep.subr.bf16.mxu1 %v4472_v20  ;;  %v4433_v19 = vld [vmem:[#allocation2 + $0x220] sm:$0xff]  ;;  %v4435_v20 = vld [vmem:[#allocation2 + $0x230] sm:$0xff] }
0x196a   :  { %4884 = vmatpush1.bf16.msra.mxu0 %v4469_v40  ;;  %4925 = vmatpush1.bf16.msra.mxu1 %v4471_v44  ;;  %v4454_v40 = vld [vmem:[#allocation2 + $0x2c8] sm:$0xff]  ;;  %v4456_v44 = vld [vmem:[#allocation2 + $0x2d8] sm:$0xff] }
0x196b   :  { %4885 = vmatprep.subr.bf16.mxu0 %v4490_v23  ;;  %4926 = vmatprep.subr.bf16.mxu1 %v4492_v24  ;;  %v4453_v23 = vld [vmem:[#allocation2 + $0x2c0] sm:$0xff]  ;;  %v4455_v24 = vld [vmem:[#allocation2 + $0x2d0] sm:$0xff] }
0x196e   :  { %4886 = vmatpush1.bf16.msra.mxu0 %v4489_v27  ;;  %4927 = vmatpush1.bf16.msra.mxu1 %v4491_v29  ;;  %v4474_v27 = vld [vmem:[#allocation2 + $0x368] sm:$0xff]  ;;  %v4476_v29 = vld [vmem:[#allocation2 + $0x378] sm:$0xff] }
0x196f   :  { %4887 = vmatprep.subr.bf16.mxu0 %v4510_v31  ;;  %4928 = vmatprep.subr.bf16.mxu1 %v4512_v39  ;;  %v4473_v31 = vld [vmem:[#allocation2 + $0x360] sm:$0xff]  ;;  %v4475_v39 = vld [vmem:[#allocation2 + $0x370] sm:$0xff] }
0x1972   :  { %4888 = vmatpush1.bf16.msra.mxu0 %v4509_v30  ;;  %4929 = vmatpush1.bf16.msra.mxu1 %v4511_v41  ;;  %v4494_v30 = vld [vmem:[#allocation2 + $0x408] sm:$0xff]  ;;  %v4496_v41 = vld [vmem:[#allocation2 + $0x418] sm:$0xff] }
0x1973   :  { %4889 = vmatprep.subr.bf16.mxu0 %v4530_v32  ;;  %4930 = vmatprep.subr.bf16.mxu1 %v4532_v33  ;;  %v4493_v32 = vld [vmem:[#allocation2 + $0x400] sm:$0xff]  ;;  %v4495_v33 = vld [vmem:[#allocation2 + $0x410] sm:$0xff] }
0x1976   :  { %4890 = vmatpush1.bf16.msra.mxu0 %v4529_v35  ;;  %4931 = vmatpush1.bf16.msra.mxu1 %v4531_v34  ;;  %v4514_v35 = vld [vmem:[#allocation2 + $0x4a8] sm:$0xff]  ;;  %v4516_v34 = vld [vmem:[#allocation2 + $0x4b8] sm:$0xff] }
0x1977   :  { %4891 = vmatprep.subr.bf16.mxu0 %v4550_v46  ;;  %4932 = vmatprep.subr.bf16.mxu1 %v4552_v36  ;;  %v4513_v46 = vld [vmem:[#allocation2 + $0x4a0] sm:$0xff]  ;;  %v4515_v36 = vld [vmem:[#allocation2 + $0x4b0] sm:$0xff] }
0x197a   :  { %4892 = vmatpush1.bf16.msra.mxu0 %v4549_v42  ;;  %4933 = vmatpush1.bf16.msra.mxu1 %v4551_v38  ;;  %v4534_v42 = vld [vmem:[#allocation2 + $0x548] sm:$0xff]  ;;  %v4536_v38 = vld [vmem:[#allocation2 + $0x558] sm:$0xff] }
0x197b   :  { %4893 = vmatprep.subr.bf16.mxu0 %v4570_v43  ;;  %4934 = vmatprep.subr.bf16.mxu1 %v4572_v47  ;;  %v4533_v43 = vld [vmem:[#allocation2 + $0x540] sm:$0xff]  ;;  %v4535_v47 = vld [vmem:[#allocation2 + $0x550] sm:$0xff] }
0x197e   :  { %4894 = vmatpush1.bf16.msra.mxu0 %v4569_v48  ;;  %4935 = vmatpush1.bf16.msra.mxu1 %v4571_v49  ;;  %v4554_v48 = vld [vmem:[#allocation2 + $0x5e8] sm:$0xff]  ;;  %v4556_v49 = vld [vmem:[#allocation2 + $0x5f8] sm:$0xff] }
0x197f   :  { %4895 = vmatprep.subr.bf16.mxu0 %v4590_v50  ;;  %4936 = vmatprep.subr.bf16.mxu1 %v4592_v0  ;;  %v4553_v50 = vld [vmem:[#allocation2 + $0x5e0] sm:$0xff]  ;;  %v4555_v0 = vld [vmem:[#allocation2 + $0x5f0] sm:$0xff] }
0x1982   :  { %4896 = vmatpush1.bf16.msra.mxu0 %v4589_v51  ;;  %4937 = vmatpush1.bf16.msra.mxu1 %v4591_v25  ;;  %v4574_v51 = vld [vmem:[#allocation2 + $0x688] sm:$0xff]  ;;  %v4576_v25 = vld [vmem:[#allocation2 + $0x698] sm:$0xff] }
0x1983   :  { %4897 = vmatprep.subr.bf16.mxu0 %v4610_v52  ;;  %4938 = vmatprep.subr.bf16.mxu1 %v4612_v21  ;;  %v4573_v52 = vld [vmem:[#allocation2 + $0x680] sm:$0xff]  ;;  %v4575_v21 = vld [vmem:[#allocation2 + $0x690] sm:$0xff] }
0x1986   :  { %4898 = vmatpush1.bf16.msra.mxu0 %v4609_v22  ;;  %4939 = vmatpush1.bf16.msra.mxu1 %v4611_v53  ;;  %v4594_v22 = vld [vmem:[#allocation2 + $0x728] sm:$0xff]  ;;  %v4596_v53 = vld [vmem:[#allocation2 + $0x738] sm:$0xff] }
0x1987   :  { %4899 = vmatprep.subr.bf16.mxu0 %v4630_v55  ;;  %4940 = vmatprep.subr.bf16.mxu1 %v4632_v56  ;;  %v4593_v55 = vld [vmem:[#allocation2 + $0x720] sm:$0xff]  ;;  %v4595_v56 = vld [vmem:[#allocation2 + $0x730] sm:$0xff] }
0x198a   :  { %4900 = vmatpush1.bf16.msra.mxu0 %v4629_v57  ;;  %4941 = vmatpush1.bf16.msra.mxu1 %v4631_v58  ;;  %v4614_v57 = vld [vmem:[#allocation2 + $0x7c8] sm:$0xff]  ;;  %v4616_v58 = vld [vmem:[#allocation2 + $0x7d8] sm:$0xff] }
0x198b   :  { %4901 = vmatprep.subr.bf16.mxu0 %v4650_v59  ;;  %4942 = vmatprep.subr.bf16.mxu1 %v4652_v60  ;;  %v4613_v59 = vld [vmem:[#allocation2 + $0x7c0] sm:$0xff]  ;;  %v4615_v60 = vld [vmem:[#allocation2 + $0x7d0] sm:$0xff] }
0x198e   :  { %4902 = vmatpush1.bf16.msra.mxu0 %v4649_v61  ;;  %4943 = vmatpush1.bf16.msra.mxu1 %v4651_v62  ;;  %v4634_v61 = vld [vmem:[#allocation2 + $0x868] sm:$0xff]  ;;  %v4636_v62 = vld [vmem:[#allocation2 + $0x878] sm:$0xff] }
0x198f   :  { %4903 = vmatprep.subr.bf16.mxu0 %v4670_v63  ;;  %4944 = vmatprep.subr.bf16.mxu1 %v4672_v1  ;;  %v4633_v63 = vld [vmem:[#allocation2 + $0x860] sm:$0xff]  ;;  %v4635_v1 = vld [vmem:[#allocation2 + $0x870] sm:$0xff] }
0x1992   :  { %4904 = vmatpush1.bf16.msra.mxu0 %v4669_v2  ;;  %4945 = vmatpush1.bf16.msra.mxu1 %v4671_v3  ;;  %v4654_v2 = vld [vmem:[#allocation2 + $0x908] sm:$0xff]  ;;  %v4656_v3 = vld [vmem:[#allocation2 + $0x918] sm:$0xff] }
0x1993   :  { %4955 = vmatprep.subr.bf16.mxu0 %v4374_v4  ;;  %4996 = vmatprep.subr.bf16.mxu1 %v4376_v5  ;;  %v4653_v4 = vld [vmem:[#allocation2 + $0x900] sm:$0xff]  ;;  %v4655_v5 = vld [vmem:[#allocation2 + $0x910] sm:$0xff] }
0x1995   :  { %4906 = vmatmul.mubr.bf16.vlgmr.msra.gmra.mrb[52].mxu0 %v7513_v26  ;;  %4947 = vmatmul.mubr.bf16.vlgmr.msra.gmra.mrb[40].mxu1 %v7513_v26 }
0x1996   :  { %4956 = vmatpush1.bf16.msra.mxu0 %v4373_v6  ;;  %4997 = vmatpush1.bf16.msra.mxu1 %v4375_v7  ;;  %v4674_v6 = vld [vmem:[#allocation2 + $0x9a8] sm:$0xff]  ;;  %v4676_v7 = vld [vmem:[#allocation2 + $0x9b8] sm:$0xff] }
0x1997   :  { %4957 = vmatprep.subr.bf16.mxu0 %v4394_v8  ;;  %4998 = vmatprep.subr.bf16.mxu1 %v4396_v11  ;;  %v4673_v8 = vld [vmem:[#allocation2 + $0x9a0] sm:$0xff]  ;;  %v4675_v11 = vld [vmem:[#allocation2 + $0x9b0] sm:$0xff] }
0x1998   :  { %4987 = vmatprep.mubr.bf16.mxu0 %v7515_v54  ;;  %5028 = vmatprep.mubr.bf16.mxu1 %v7515_v54 }
0x199a   :  { %4958 = vmatpush1.bf16.msra.mxu0 %v4393_v12  ;;  %4999 = vmatpush1.bf16.msra.mxu1 %v4395_v14  ;;  %v4378_v12 = vld [vmem:[#allocation2 + $0x68] sm:$0xff]  ;;  %v4380_v14 = vld [vmem:[#allocation2 + $0x78] sm:$0xff] }
0x199b   :  { %4959 = vmatprep.subr.bf16.mxu0 %v4414_v15  ;;  %5000 = vmatprep.subr.bf16.mxu1 %v4416_v16  ;;  %v4377_v15 = vld [vmem:[#allocation2 + $0x60] sm:$0xff]  ;;  %v4379_v16 = vld [vmem:[#allocation2 + $0x70] sm:$0xff] }
0x199e   :  { %4960 = vmatpush1.bf16.msra.mxu0 %v4413_v17  ;;  %5001 = vmatpush1.bf16.msra.mxu1 %v4415_v18  ;;  %v4398_v17 = vld [vmem:[#allocation2 + $0x108] sm:$0xff]  ;;  %v4400_v18 = vld [vmem:[#allocation2 + $0x118] sm:$0xff] }
0x199f   :  { %4961 = vmatprep.subr.bf16.mxu0 %v4434_v45  ;;  %5002 = vmatprep.subr.bf16.mxu1 %v4436_v37  ;;  %v4397_v45 = vld [vmem:[#allocation2 + $0x100] sm:$0xff]  ;;  %v4399_v37 = vld [vmem:[#allocation2 + $0x110] sm:$0xff] }
0x19a2   :  { %4962 = vmatpush1.bf16.msra.mxu0 %v4433_v19  ;;  %5003 = vmatpush1.bf16.msra.mxu1 %v4435_v20  ;;  %v4418_v19 = vld [vmem:[#allocation2 + $0x1a8] sm:$0xff]  ;;  %v4420_v20 = vld [vmem:[#allocation2 + $0x1b8] sm:$0xff] }
0x19a3   :  { %4963 = vmatprep.subr.bf16.mxu0 %v4454_v40  ;;  %5004 = vmatprep.subr.bf16.mxu1 %v4456_v44  ;;  %v4417_v40 = vld [vmem:[#allocation2 + $0x1a0] sm:$0xff]  ;;  %v4419_v44 = vld [vmem:[#allocation2 + $0x1b0] sm:$0xff] }
0x19a6   :  { %4964 = vmatpush1.bf16.msra.mxu0 %v4453_v23  ;;  %5005 = vmatpush1.bf16.msra.mxu1 %v4455_v24  ;;  %v4438_v23 = vld [vmem:[#allocation2 + $0x248] sm:$0xff]  ;;  %v4440_v24 = vld [vmem:[#allocation2 + $0x258] sm:$0xff] }
0x19a7   :  { %4965 = vmatprep.subr.bf16.mxu0 %v4474_v27  ;;  %5006 = vmatprep.subr.bf16.mxu1 %v4476_v29  ;;  %v4437_v27 = vld [vmem:[#allocation2 + $0x240] sm:$0xff]  ;;  %v4439_v29 = vld [vmem:[#allocation2 + $0x250] sm:$0xff] }
0x19aa   :  { %4966 = vmatpush1.bf16.msra.mxu0 %v4473_v31  ;;  %5007 = vmatpush1.bf16.msra.mxu1 %v4475_v39  ;;  %v4458_v31 = vld [vmem:[#allocation2 + $0x2e8] sm:$0xff]  ;;  %v4460_v39 = vld [vmem:[#allocation2 + $0x2f8] sm:$0xff] }
0x19ab   :  { %4967 = vmatprep.subr.bf16.mxu0 %v4494_v30  ;;  %5008 = vmatprep.subr.bf16.mxu1 %v4496_v41  ;;  %v4457_v30 = vld [vmem:[#allocation2 + $0x2e0] sm:$0xff]  ;;  %v4459_v41 = vld [vmem:[#allocation2 + $0x2f0] sm:$0xff] }
0x19ae   :  { %4968 = vmatpush1.bf16.msra.mxu0 %v4493_v32  ;;  %5009 = vmatpush1.bf16.msra.mxu1 %v4495_v33  ;;  %v4478_v32 = vld [vmem:[#allocation2 + $0x388] sm:$0xff]  ;;  %v4480_v33 = vld [vmem:[#allocation2 + $0x398] sm:$0xff] }
0x19af   :  { %4969 = vmatprep.subr.bf16.mxu0 %v4514_v35  ;;  %5010 = vmatprep.subr.bf16.mxu1 %v4516_v34  ;;  %v4477_v35 = vld [vmem:[#allocation2 + $0x380] sm:$0xff]  ;;  %v4479_v34 = vld [vmem:[#allocation2 + $0x390] sm:$0xff] }
0x19b2   :  { %4970 = vmatpush1.bf16.msra.mxu0 %v4513_v46  ;;  %5011 = vmatpush1.bf16.msra.mxu1 %v4515_v36  ;;  %v4498_v46 = vld [vmem:[#allocation2 + $0x428] sm:$0xff]  ;;  %v4500_v36 = vld [vmem:[#allocation2 + $0x438] sm:$0xff] }
0x19b3   :  { %4971 = vmatprep.subr.bf16.mxu0 %v4534_v42  ;;  %5012 = vmatprep.subr.bf16.mxu1 %v4536_v38  ;;  %v4497_v42 = vld [vmem:[#allocation2 + $0x420] sm:$0xff]  ;;  %v4499_v38 = vld [vmem:[#allocation2 + $0x430] sm:$0xff] }
0x19b6   :  { %4972 = vmatpush1.bf16.msra.mxu0 %v4533_v43  ;;  %5013 = vmatpush1.bf16.msra.mxu1 %v4535_v47  ;;  %v4518_v43 = vld [vmem:[#allocation2 + $0x4c8] sm:$0xff]  ;;  %v4520_v47 = vld [vmem:[#allocation2 + $0x4d8] sm:$0xff] }
0x19b7   :  { %4973 = vmatprep.subr.bf16.mxu0 %v4554_v48  ;;  %5014 = vmatprep.subr.bf16.mxu1 %v4556_v49  ;;  %v4517_v48 = vld [vmem:[#allocation2 + $0x4c0] sm:$0xff]  ;;  %v4519_v49 = vld [vmem:[#allocation2 + $0x4d0] sm:$0xff] }
0x19ba   :  { %4974 = vmatpush1.bf16.msra.mxu0 %v4553_v50  ;;  %5015 = vmatpush1.bf16.msra.mxu1 %v4555_v0  ;;  %v4538_v50 = vld [vmem:[#allocation2 + $0x568] sm:$0xff]  ;;  %v4540_v0 = vld [vmem:[#allocation2 + $0x578] sm:$0xff] }
0x19bb   :  { %4975 = vmatprep.subr.bf16.mxu0 %v4574_v51  ;;  %5016 = vmatprep.subr.bf16.mxu1 %v4576_v25  ;;  %v4537_v51 = vld [vmem:[#allocation2 + $0x560] sm:$0xff]  ;;  %v4539_v25 = vld [vmem:[#allocation2 + $0x570] sm:$0xff] }
0x19be   :  { %4976 = vmatpush1.bf16.msra.mxu0 %v4573_v52  ;;  %5017 = vmatpush1.bf16.msra.mxu1 %v4575_v21  ;;  %v4558_v52 = vld [vmem:[#allocation2 + $0x608] sm:$0xff]  ;;  %v4560_v21 = vld [vmem:[#allocation2 + $0x618] sm:$0xff] }
0x19bf   :  { %4977 = vmatprep.subr.bf16.mxu0 %v4594_v22  ;;  %5018 = vmatprep.subr.bf16.mxu1 %v4596_v53  ;;  %v4557_v22 = vld [vmem:[#allocation2 + $0x600] sm:$0xff]  ;;  %v4559_v53 = vld [vmem:[#allocation2 + $0x610] sm:$0xff] }
0x19c2   :  { %4978 = vmatpush1.bf16.msra.mxu0 %v4593_v55  ;;  %5019 = vmatpush1.bf16.msra.mxu1 %v4595_v56  ;;  %v4578_v55 = vld [vmem:[#allocation2 + $0x6a8] sm:$0xff]  ;;  %v4580_v56 = vld [vmem:[#allocation2 + $0x6b8] sm:$0xff] }
0x19c3   :  { %4979 = vmatprep.subr.bf16.mxu0 %v4614_v57  ;;  %5020 = vmatprep.subr.bf16.mxu1 %v4616_v58  ;;  %v4577_v57 = vld [vmem:[#allocation2 + $0x6a0] sm:$0xff]  ;;  %v4579_v58 = vld [vmem:[#allocation2 + $0x6b0] sm:$0xff] }
0x19c6   :  { %4980 = vmatpush1.bf16.msra.mxu0 %v4613_v59  ;;  %5021 = vmatpush1.bf16.msra.mxu1 %v4615_v60  ;;  %v4598_v59 = vld [vmem:[#allocation2 + $0x748] sm:$0xff]  ;;  %v4600_v60 = vld [vmem:[#allocation2 + $0x758] sm:$0xff] }
0x19c7   :  { %4981 = vmatprep.subr.bf16.mxu0 %v4634_v61  ;;  %5022 = vmatprep.subr.bf16.mxu1 %v4636_v62  ;;  %v4597_v61 = vld [vmem:[#allocation2 + $0x740] sm:$0xff]  ;;  %v4599_v62 = vld [vmem:[#allocation2 + $0x750] sm:$0xff] }
0x19ca   :  { %4982 = vmatpush1.bf16.msra.mxu0 %v4633_v63  ;;  %5023 = vmatpush1.bf16.msra.mxu1 %v4635_v1  ;;  %v4618_v63 = vld [vmem:[#allocation2 + $0x7e8] sm:$0xff]  ;;  %v4620_v1 = vld [vmem:[#allocation2 + $0x7f8] sm:$0xff] }
0x19cb   :  { %4983 = vmatprep.subr.bf16.mxu0 %v4654_v2  ;;  %5024 = vmatprep.subr.bf16.mxu1 %v4656_v3  ;;  %v4617_v2 = vld [vmem:[#allocation2 + $0x7e0] sm:$0xff]  ;;  %v4619_v3 = vld [vmem:[#allocation2 + $0x7f0] sm:$0xff] }
0x19ce   :  { %4984 = vmatpush1.bf16.msra.mxu0 %v4653_v4  ;;  %5025 = vmatpush1.bf16.msra.mxu1 %v4655_v5  ;;  %v4638_v4 = vld [vmem:[#allocation2 + $0x888] sm:$0xff]  ;;  %v4640_v5 = vld [vmem:[#allocation2 + $0x898] sm:$0xff] }
0x19cf   :  { %4985 = vmatprep.subr.bf16.mxu0 %v4674_v6  ;;  %5026 = vmatprep.subr.bf16.mxu1 %v4676_v7  ;;  %v4637_v6 = vld [vmem:[#allocation2 + $0x880] sm:$0xff]  ;;  %v4639_v7 = vld [vmem:[#allocation2 + $0x890] sm:$0xff] }
0x19d2   :  { %4986 = vmatpush1.bf16.msra.mxu0 %v4673_v8  ;;  %5027 = vmatpush1.bf16.msra.mxu1 %v4675_v11  ;;  %v4658_v8 = vld [vmem:[#allocation2 + $0x928] sm:$0xff]  ;;  %v4660_v11 = vld [vmem:[#allocation2 + $0x938] sm:$0xff] }
0x19d3   :  { %5037 = vmatprep.subr.bf16.mxu0 %v4378_v12  ;;  %5078 = vmatprep.subr.bf16.mxu1 %v4380_v14  ;;  %v4657_v12 = vld [vmem:[#allocation2 + $0x920] sm:$0xff]  ;;  %v4659_v14 = vld [vmem:[#allocation2 + $0x930] sm:$0xff] }
0x19d5   :  { %4988 = vmatmul.mubr.bf16.vlgmr.msra.gmra.mrb[56].mxu0 %v7513_v26  ;;  %5029 = vmatmul.mubr.bf16.vlgmr.msra.gmra.mrb[44].mxu1 %v7513_v26 }
0x19d6   :  { %5038 = vmatpush1.bf16.msra.mxu0 %v4377_v15  ;;  %5079 = vmatpush1.bf16.msra.mxu1 %v4379_v16  ;;  %v4678_v15 = vld [vmem:[#allocation2 + $0x9c8] sm:$0xff]  ;;  %v4680_v16 = vld [vmem:[#allocation2 + $0x9d8] sm:$0xff] }
0x19d7   :  { %5039 = vmatprep.subr.bf16.mxu0 %v4398_v17  ;;  %5080 = vmatprep.subr.bf16.mxu1 %v4400_v18  ;;  %v4677_v17 = vld [vmem:[#allocation2 + $0x9c0] sm:$0xff]  ;;  %v4679_v18 = vld [vmem:[#allocation2 + $0x9d0] sm:$0xff] }
0x19d8   :  { %5069 = vmatprep.mubr.bf16.mxu0 %v7515_v54  ;;  %5110 = vmatprep.mubr.bf16.mxu1 %v7515_v54 }
0x19da   :  { %5040 = vmatpush1.bf16.msra.mxu0 %v4397_v45  ;;  %5081 = vmatpush1.bf16.msra.mxu1 %v4399_v37  ;;  %v4382_v45 = vld [vmem:[#allocation2 + $0x88] sm:$0xff]  ;;  %v4384_v37 = vld [vmem:[#allocation2 + $0x98] sm:$0xff] }
0x19db   :  { %5041 = vmatprep.subr.bf16.mxu0 %v4418_v19  ;;  %5082 = vmatprep.subr.bf16.mxu1 %v4420_v20  ;;  %v4381_v19 = vld [vmem:[#allocation2 + $0x80] sm:$0xff]  ;;  %v4383_v20 = vld [vmem:[#allocation2 + $0x90] sm:$0xff] }
0x19de   :  { %5042 = vmatpush1.bf16.msra.mxu0 %v4417_v40  ;;  %5083 = vmatpush1.bf16.msra.mxu1 %v4419_v44  ;;  %v4402_v40 = vld [vmem:[#allocation2 + $0x128] sm:$0xff]  ;;  %v4404_v44 = vld [vmem:[#allocation2 + $0x138] sm:$0xff] }
0x19df   :  { %5043 = vmatprep.subr.bf16.mxu0 %v4438_v23  ;;  %5084 = vmatprep.subr.bf16.mxu1 %v4440_v24  ;;  %v4401_v23 = vld [vmem:[#allocation2 + $0x120] sm:$0xff]  ;;  %v4403_v24 = vld [vmem:[#allocation2 + $0x130] sm:$0xff] }
0x19e2   :  { %5044 = vmatpush1.bf16.msra.mxu0 %v4437_v27  ;;  %5085 = vmatpush1.bf16.msra.mxu1 %v4439_v29  ;;  %v4422_v27 = vld [vmem:[#allocation2 + $0x1c8] sm:$0xff]  ;;  %v4424_v29 = vld [vmem:[#allocation2 + $0x1d8] sm:$0xff] }
0x19e3   :  { %5045 = vmatprep.subr.bf16.mxu0 %v4458_v31  ;;  %5086 = vmatprep.subr.bf16.mxu1 %v4460_v39  ;;  %v4421_v31 = vld [vmem:[#allocation2 + $0x1c0] sm:$0xff]  ;;  %v4423_v39 = vld [vmem:[#allocation2 + $0x1d0] sm:$0xff] }
0x19e6   :  { %5046 = vmatpush1.bf16.msra.mxu0 %v4457_v30  ;;  %5087 = vmatpush1.bf16.msra.mxu1 %v4459_v41  ;;  %v4442_v30 = vld [vmem:[#allocation2 + $0x268] sm:$0xff]  ;;  %v4444_v41 = vld [vmem:[#allocation2 + $0x278] sm:$0xff] }
0x19e7   :  { %5047 = vmatprep.subr.bf16.mxu0 %v4478_v32  ;;  %5088 = vmatprep.subr.bf16.mxu1 %v4480_v33  ;;  %v4441_v32 = vld [vmem:[#allocation2 + $0x260] sm:$0xff]  ;;  %v4443_v33 = vld [vmem:[#allocation2 + $0x270] sm:$0xff] }
0x19ea   :  { %5048 = vmatpush1.bf16.msra.mxu0 %v4477_v35  ;;  %5089 = vmatpush1.bf16.msra.mxu1 %v4479_v34  ;;  %v4462_v35 = vld [vmem:[#allocation2 + $0x308] sm:$0xff]  ;;  %v4464_v34 = vld [vmem:[#allocation2 + $0x318] sm:$0xff] }
0x19eb   :  { %5049 = vmatprep.subr.bf16.mxu0 %v4498_v46  ;;  %5090 = vmatprep.subr.bf16.mxu1 %v4500_v36  ;;  %v7536_v46 = vsub.s32 2, %v6949_v9  ;;  %v7541_v36 = vsub.s32 3, %v6949_v9 }
0x19ee   :  { %5050 = vmatpush1.bf16.msra.mxu0 %v4497_v42  ;;  %5091 = vmatpush1.bf16.msra.mxu1 %v4499_v38  ;;  %v4461_v42 = vld [vmem:[#allocation2 + $0x300] sm:$0xff]  ;;  %v4463_v38 = vld [vmem:[#allocation2 + $0x310] sm:$0xff] }
0x19ef   :  { %5051 = vmatprep.subr.bf16.mxu0 %v4518_v43  ;;  %5092 = vmatprep.subr.bf16.mxu1 %v4520_v47  ;;  %v4482_v43 = vld [vmem:[#allocation2 + $0x3a8] sm:$0xff]  ;;  %v4484_v47 = vld [vmem:[#allocation2 + $0x3b8] sm:$0xff] }
0x19f2   :  { %5052 = vmatpush1.bf16.msra.mxu0 %v4517_v48  ;;  %5093 = vmatpush1.bf16.msra.mxu1 %v4519_v49 }
0x19f3   :  { %5053 = vmatprep.subr.bf16.mxu0 %v4538_v50  ;;  %5094 = vmatprep.subr.bf16.mxu1 %v4540_v0 }
0x19f6   :  { %5054 = vmatpush1.bf16.msra.mxu0 %v4537_v51  ;;  %5095 = vmatpush1.bf16.msra.mxu1 %v4539_v25  ;;  %v4481_v51 = vld [vmem:[#allocation2 + $0x3a0] sm:$0xff]  ;;  %v4483_v25 = vld [vmem:[#allocation2 + $0x3b0] sm:$0xff] }
0x19f7   :  { %5055 = vmatprep.subr.bf16.mxu0 %v4558_v52  ;;  %5096 = vmatprep.subr.bf16.mxu1 %v4560_v21 }
0x19fa   :  { %5056 = vmatpush1.bf16.msra.mxu0 %v4557_v22  ;;  %5097 = vmatpush1.bf16.msra.mxu1 %v4559_v53  ;;  %v4502_v22 = vld [vmem:[#allocation2 + $0x448] sm:$0xff]  ;;  %v4504_v53 = vld [vmem:[#allocation2 + $0x458] sm:$0xff] }
0x19fb   :  { %5057 = vmatprep.subr.bf16.mxu0 %v4578_v55  ;;  %5098 = vmatprep.subr.bf16.mxu1 %v4580_v56 }
0x19fe   :  { %5058 = vmatpush1.bf16.msra.mxu0 %v4577_v57  ;;  %5099 = vmatpush1.bf16.msra.mxu1 %v4579_v58 }
0x19ff   :  { %5059 = vmatprep.subr.bf16.mxu0 %v4598_v59  ;;  %5100 = vmatprep.subr.bf16.mxu1 %v4600_v60 }
0x1a02   :  { %5060 = vmatpush1.bf16.msra.mxu0 %v4597_v61  ;;  %5101 = vmatpush1.bf16.msra.mxu1 %v4599_v62 }
0x1a03   :  { %5061 = vmatprep.subr.bf16.mxu0 %v4618_v63  ;;  %5102 = vmatprep.subr.bf16.mxu1 %v4620_v1 }
0x1a06   :  { %5062 = vmatpush1.bf16.msra.mxu0 %v4617_v2  ;;  %5103 = vmatpush1.bf16.msra.mxu1 %v4619_v3  ;;  %v4501_v2 = vld [vmem:[#allocation2 + $0x440] sm:$0xff]  ;;  %v4503_v3 = vld [vmem:[#allocation2 + $0x450] sm:$0xff] }
0x1a07   :  { %5063 = vmatprep.subr.bf16.mxu0 %v4638_v4  ;;  %5104 = vmatprep.subr.bf16.mxu1 %v4640_v5 }
0x1a0a   :  { %5064 = vmatpush1.bf16.msra.mxu0 %v4637_v6  ;;  %5105 = vmatpush1.bf16.msra.mxu1 %v4639_v7  ;;  %v4522_v6 = vld [vmem:[#allocation2 + $0x4e8] sm:$0xff]  ;;  %v4524_v7 = vld [vmem:[#allocation2 + $0x4f8] sm:$0xff] }
0x1a0b   :  { %5065 = vmatprep.subr.bf16.mxu0 %v4658_v8  ;;  %5106 = vmatprep.subr.bf16.mxu1 %v4660_v11 }
0x1a0e   :  { %5066 = vmatpush1.bf16.msra.mxu0 %v4657_v12  ;;  %5107 = vmatpush1.bf16.msra.mxu1 %v4659_v14  ;;  %v4521_v12 = vld [vmem:[#allocation2 + $0x4e0] sm:$0xff]  ;;  %v4523_v14 = vld [vmem:[#allocation2 + $0x4f0] sm:$0xff] }
0x1a0f   :  { %5067 = vmatprep.subr.bf16.mxu0 %v4678_v15  ;;  %5108 = vmatprep.subr.bf16.mxu1 %v4680_v16  ;;  %v4542_v16 = vld [vmem:[#allocation2 + $0x588] sm:$0xff] }
0x1a12   :  { %5068 = vmatpush1.bf16.msra.mxu0 %v4677_v17  ;;  %5109 = vmatpush1.bf16.msra.mxu1 %v4679_v18  ;;  %v4544_v17 = vld [vmem:[#allocation2 + $0x598] sm:$0xff]  ;;  %v4541_v18 = vld [vmem:[#allocation2 + $0x580] sm:$0xff] }
0x1a13   :  { %5119 = vmatprep.subr.bf16.mxu0 %v4382_v45  ;;  %5160 = vmatprep.subr.bf16.mxu1 %v4384_v37  ;;  %v4543_v45 = vld [vmem:[#allocation2 + $0x590] sm:$0xff]  ;;  %v4562_v37 = vld [vmem:[#allocation2 + $0x628] sm:$0xff] }
0x1a15   :  { %5070 = vmatmul.mubr.bf16.vlgmr.msra.gmra.mrb[60].mxu0 %v7513_v26  ;;  %5111 = vmatmul.mubr.bf16.vlgmr.msra.gmra.mrb[48].mxu1 %v7513_v26 }
0x1a16   :  { %5120 = vmatpush1.bf16.msra.mxu0 %v4381_v19  ;;  %5161 = vmatpush1.bf16.msra.mxu1 %v4383_v20  ;;  %v4564_v19 = vld [vmem:[#allocation2 + $0x638] sm:$0xff]  ;;  %v4561_v20 = vld [vmem:[#allocation2 + $0x620] sm:$0xff] }
0x1a17   :  { %5121 = vmatprep.subr.bf16.mxu0 %v4402_v40  ;;  %5162 = vmatprep.subr.bf16.mxu1 %v4404_v44  ;;  %v4563_v40 = vld [vmem:[#allocation2 + $0x630] sm:$0xff]  ;;  %v4582_v44 = vld [vmem:[#allocation2 + $0x6c8] sm:$0xff] }
0x1a18   :  { %5151 = vmatprep.mubr.bf16.mxu0 %v7515_v54  ;;  %5192 = vmatprep.mubr.bf16.mxu1 %v7515_v54  ;;  %v7538_v54 = vld [vmem:[#allocation30] sm:$0xff] }
0x1a19   :  { %v4694_v48 = vrot.slane %v7538_v54, %v6952_v10  ;;  %v4702_v49 = vrot.slane %v7538_v54, %v7536_v46  ;;  %v4698_v50 = vrot.slane %v7538_v54, %v6956_v13  ;;  %v4706_v0 = vrot.slane %v7538_v54, %v7541_v36 }
0x1a1a   :  { %5122 = vmatpush1.bf16.msra.mxu0 %v4401_v23  ;;  %5163 = vmatpush1.bf16.msra.mxu1 %v4403_v24  ;;  %v4584_v23 = vld [vmem:[#allocation2 + $0x6d8] sm:$0xff]  ;;  %v4581_v24 = vld [vmem:[#allocation2 + $0x6c0] sm:$0xff] }
0x1a1b   :  { %5123 = vmatprep.subr.bf16.mxu0 %v4422_v27  ;;  %5164 = vmatprep.subr.bf16.mxu1 %v4424_v29  ;;  %v4583_v27 = vld [vmem:[#allocation2 + $0x6d0] sm:$0xff]  ;;  %v4602_v29 = vld [vmem:[#allocation2 + $0x768] sm:$0xff] }
0x1a1e   :  { %5124 = vmatpush1.bf16.msra.mxu0 %v4421_v31  ;;  %5165 = vmatpush1.bf16.msra.mxu1 %v4423_v39  ;;  %v4604_v31 = vld [vmem:[#allocation2 + $0x778] sm:$0xff]  ;;  %v4601_v39 = vld [vmem:[#allocation2 + $0x760] sm:$0xff] }
0x1a1f   :  { %5125 = vmatprep.subr.bf16.mxu0 %v4442_v30  ;;  %5166 = vmatprep.subr.bf16.mxu1 %v4444_v41  ;;  %v4603_v30 = vld [vmem:[#allocation2 + $0x770] sm:$0xff]  ;;  %v4622_v41 = vld [vmem:[#allocation2 + $0x808] sm:$0xff] }
0x1a22   :  { %5126 = vmatpush1.bf16.msra.mxu0 %v4441_v32  ;;  %5167 = vmatpush1.bf16.msra.mxu1 %v4443_v33  ;;  %v4624_v32 = vld [vmem:[#allocation2 + $0x818] sm:$0xff]  ;;  %v4621_v33 = vld [vmem:[#allocation2 + $0x800] sm:$0xff] }
0x1a23   :  { %5127 = vmatprep.subr.bf16.mxu0 %v4462_v35  ;;  %5168 = vmatprep.subr.bf16.mxu1 %v4464_v34  ;;  %v4623_v35 = vld [vmem:[#allocation2 + $0x810] sm:$0xff]  ;;  %v4642_v34 = vld [vmem:[#allocation2 + $0x8a8] sm:$0xff] }
0x1a26   :  { %5128 = vmatpush1.bf16.msra.mxu0 %v4461_v42  ;;  %5169 = vmatpush1.bf16.msra.mxu1 %v4463_v38  ;;  %v4644_v42 = vld [vmem:[#allocation2 + $0x8b8] sm:$0xff]  ;;  %v4641_v38 = vld [vmem:[#allocation2 + $0x8a0] sm:$0xff] }
0x1a27   :  { %5129 = vmatprep.subr.bf16.mxu0 %v4482_v43  ;;  %5170 = vmatprep.subr.bf16.mxu1 %v4484_v47  ;;  %v4643_v43 = vld [vmem:[#allocation2 + $0x8b0] sm:$0xff]  ;;  %v4662_v47 = vld [vmem:[#allocation2 + $0x948] sm:$0xff] }
0x1a28   :  { %v4825_v52 = vpop.f32.mrb[48].mxu0  ;;  %v4866_v21 = vpop.f32.mrb[36].mxu1 }
0x1a29   :  { %v4826_v55 = vadd.f32 %v4825_v52, %v4694_v48  ;;  %v4867_v56 = vadd.f32 %v4866_v21, %v4702_v49  ;;  %v4827_v57 = vpop.f32.mrb[49].mxu0  ;;  %v4868_v58 = vpop.f32.mrb[37].mxu1  ;;  %v4664_v48 = vld [vmem:[#allocation2 + $0x958] sm:$0xff]  ;;  %v4661_v49 = vld [vmem:[#allocation2 + $0x940] sm:$0xff]  ;;  %v4683_v52 = vld [vmem:[#allocation2 + $0x9f0] sm:$0xff]  ;;  %v4709_v21 = vsub.s32 4, %v6949_v9 }
0x1a2a   :  { %v4828_v59 = vadd.f32 %v4827_v57, %v4698_v50  ;;  %v4869_v60 = vadd.f32 %v4868_v58, %v4706_v0  ;;  %v4829_v61 = vpop.f32.mrb[50].mxu0  ;;  %v4870_v62 = vpop.f32.mrb[38].mxu1  ;;  %5130 = vmatpush1.bf16.msra.mxu0 %v4481_v51  ;;  %5171 = vmatpush1.bf16.msra.mxu1 %v4483_v25  ;;  %v4663_v50 = vld [vmem:[#allocation2 + $0x950] sm:$0xff]  ;;  %v4682_v0 = vld [vmem:[#allocation2 + $0x9e8] sm:$0xff]  ;;  %v4684_v51 = vld [vmem:[#allocation2 + $0x9f8] sm:$0xff] }
0x1a2b   :  { %v4830_v63 = vpop.f32.mrb[51].mxu0  ;;  %v4871_v1 = vpop.f32.mrb[39].mxu1  ;;  %5131 = vmatprep.subr.bf16.mxu0 %v4502_v22  ;;  %5172 = vmatprep.subr.bf16.mxu1 %v4504_v53  ;;  %v4681_v25 = vld [vmem:[#allocation2 + $0x9e0] sm:$0xff]  ;;  %v4717_v22 = vsub.s32 6, %v6949_v9  ;;  %v4713_v53 = vsub.s32 5, %v6949_v9 }
0x1a2c   :  { %v5221_v4 = vcombine.low %v4826_v55, %v4828_v59  ;;  %v5222_v5 = vcombine.low %v4867_v56, %v4869_v60  ;;  %v4721_v55 = vsub.s32 7, %v6949_v9  ;;  %v4710_v56 = vrot.slane %v7538_v54, %v4709_v21 }
0x1a2d   :  { %v4718_v57 = vrot.slane %v7538_v54, %v4717_v22 }
0x1a2e   :  { %v5229_v8 = vrot.slane %v5221_v4, %v6966_v28  ;;  %v5236_v11 = vrot.slane %v5222_v5, %v6966_v28  ;;  %5132 = vmatpush1.bf16.msra.mxu0 %v4501_v2  ;;  %5173 = vmatpush1.bf16.msra.mxu1 %v4503_v3  ;;  %v4722_v58 = vrot.slane %v7538_v54, %v4721_v55 }
0x1a2f   :  { %5133 = vmatprep.subr.bf16.mxu0 %v4522_v6  ;;  %5174 = vmatprep.subr.bf16.mxu1 %v4524_v7 }
0x1a30   :  { %v5237_v15 = vcombine.low %v5229_v8, %v5236_v11 }
0x1a32   :  { %5311 = vst [vmem:[#allocation31] sm:$0xff] %v5237_v15  ;;  %5134 = vmatpush1.bf16.msra.mxu0 %v4521_v12  ;;  %5175 = vmatpush1.bf16.msra.mxu1 %v4523_v14 }
0x1a33   :  { %5135 = vmatprep.subr.bf16.mxu0 %v4542_v16  ;;  %5176 = vmatprep.subr.bf16.mxu1 %v4544_v17 }
0x1a36   :  { %5136 = vmatpush1.bf16.msra.mxu0 %v4541_v18  ;;  %5177 = vmatpush1.bf16.msra.mxu1 %v4543_v45 }
0x1a37   :  { %5137 = vmatprep.subr.bf16.mxu0 %v4562_v37  ;;  %5178 = vmatprep.subr.bf16.mxu1 %v4564_v19 }
0x1a3a   :  { %5138 = vmatpush1.bf16.msra.mxu0 %v4561_v20  ;;  %5179 = vmatpush1.bf16.msra.mxu1 %v4563_v40 }
0x1a3b   :  { %5139 = vmatprep.subr.bf16.mxu0 %v4582_v44  ;;  %5180 = vmatprep.subr.bf16.mxu1 %v4584_v23 }
0x1a3e   :  { %5140 = vmatpush1.bf16.msra.mxu0 %v4581_v24  ;;  %5181 = vmatpush1.bf16.msra.mxu1 %v4583_v27 }
0x1a3f   :  { %5141 = vmatprep.subr.bf16.mxu0 %v4602_v29  ;;  %5182 = vmatprep.subr.bf16.mxu1 %v4604_v31 }
0x1a42   :  { %5142 = vmatpush1.bf16.msra.mxu0 %v4601_v39  ;;  %5183 = vmatpush1.bf16.msra.mxu1 %v4603_v30 }
0x1a43   :  { %5143 = vmatprep.subr.bf16.mxu0 %v4622_v41  ;;  %5184 = vmatprep.subr.bf16.mxu1 %v4624_v32 }
0x1a46   :  { %5144 = vmatpush1.bf16.msra.mxu0 %v4621_v33  ;;  %5185 = vmatpush1.bf16.msra.mxu1 %v4623_v35 }
0x1a47   :  { %5145 = vmatprep.subr.bf16.mxu0 %v4642_v34  ;;  %5186 = vmatprep.subr.bf16.mxu1 %v4644_v42 }
0x1a4a   :  { %5146 = vmatpush1.bf16.msra.mxu0 %v4641_v38  ;;  %5187 = vmatpush1.bf16.msra.mxu1 %v4643_v43 }
0x1a4b   :  { %5147 = vmatprep.subr.bf16.mxu0 %v4662_v47  ;;  %5188 = vmatprep.subr.bf16.mxu1 %v4664_v48 }
0x1a4e   :  { %5148 = vmatpush1.bf16.msra.mxu0 %v4661_v49  ;;  %5189 = vmatpush1.bf16.msra.mxu1 %v4663_v50 }
0x1a4f   :  { %5149 = vmatprep.subr.bf16.mxu0 %v4682_v0  ;;  %5190 = vmatprep.subr.bf16.mxu1 %v4684_v51 }
0x1a52   :  { %5150 = vmatpush1.bf16.msra.mxu0 %v4681_v25  ;;  %5191 = vmatpush1.bf16.msra.mxu1 %v4683_v52 }
0x1a55   :  { %5152 = vmatmul.mubr.bf16.vlgmr.msra.gmra.mrb[64].mxu0 %v7513_v26  ;;  %5193 = vmatmul.mubr.bf16.vlgmr.msra.gmra.mrb[52].mxu1 %v7513_v26  ;;  %v4714_v26 = vrot.slane %v7538_v54, %v4713_v53  ;;  %v4686_v54 = vld [vmem:[#allocation30 + $0x8] sm:$0xff] }
0x1a56   :  { %v4726_v16 = vrot.slane %v4686_v54, %v6952_v10  ;;  %v4734_v17 = vrot.slane %v4686_v54, %v7536_v46  ;;  %v4730_v18 = vrot.slane %v4686_v54, %v6956_v13  ;;  %v4738_v45 = vrot.slane %v4686_v54, %v7541_v36 }
0x1a68   :  { %v4907_v59 = vpop.f32.mrb[52].mxu0  ;;  %v4948_v60 = vpop.f32.mrb[40].mxu1 }
0x1a69   :  { %v4908_v61 = vadd.f32 %v4907_v59, %v4710_v56  ;;  %v4949_v62 = vadd.f32 %v4948_v60, %v4718_v57  ;;  %v4909_v63 = vpop.f32.mrb[53].mxu0  ;;  %v4950_v1 = vpop.f32.mrb[41].mxu1 }
0x1a6a   :  { %v4910_v2 = vadd.f32 %v4909_v63, %v4714_v26  ;;  %v4951_v3 = vadd.f32 %v4950_v1, %v4722_v58  ;;  %v4911_v4 = vpop.f32.mrb[54].mxu0  ;;  %v4952_v5 = vpop.f32.mrb[42].mxu1 }
0x1a6b   :  { %v4912_v6 = vpop.f32.mrb[55].mxu0  ;;  %v4953_v7 = vpop.f32.mrb[43].mxu1 }
0x1a6c   :  { %v5238_v8 = vcombine.low %v4908_v61, %v4910_v2  ;;  %v5239_v11 = vcombine.low %v4949_v62, %v4951_v3 }
0x1a6e   :  { %v5246_v12 = vrot.slane %v5238_v8, %v6966_v28  ;;  %v5253_v14 = vrot.slane %v5239_v11, %v6966_v28 }
0x1a70   :  { %v5254_v15 = vcombine.low %v5246_v12, %v5253_v14 }
0x1a72   :  { %5312 = vst [vmem:[#allocation31 + $0x8] sm:$0xff] %v5254_v15 }
0x1aa8   :  { %v4989_v37 = vpop.f32.mrb[56].mxu0  ;;  %v5030_v19 = vpop.f32.mrb[44].mxu1 }
0x1aa9   :  { %v4990_v20 = vadd.f32 %v4989_v37, %v4726_v16  ;;  %v5031_v40 = vadd.f32 %v5030_v19, %v4734_v17  ;;  %v4991_v44 = vpop.f32.mrb[57].mxu0  ;;  %v5032_v23 = vpop.f32.mrb[45].mxu1 }
0x1aaa   :  { %v4992_v24 = vadd.f32 %v4991_v44, %v4730_v18  ;;  %v5033_v27 = vadd.f32 %v5032_v23, %v4738_v45  ;;  %v4993_v29 = vpop.f32.mrb[58].mxu0  ;;  %v5034_v31 = vpop.f32.mrb[46].mxu1 }
0x1aab   :  { %v4994_v39 = vpop.f32.mrb[59].mxu0  ;;  %v5035_v30 = vpop.f32.mrb[47].mxu1 }
0x1aac   :  { %v5255_v41 = vcombine.low %v4990_v20, %v4992_v24  ;;  %v5256_v32 = vcombine.low %v5031_v40, %v5033_v27 }
0x1aae   :  { %v5263_v33 = vrot.slane %v5255_v41, %v6966_v28  ;;  %v5270_v35 = vrot.slane %v5256_v32, %v6966_v28 }
0x1ab0   :  { %v5271_v34 = vcombine.low %v5263_v33, %v5270_v35 }
0x1ab2   :  { %5313 = vst [vmem:[#allocation31 + $0x10] sm:$0xff] %v5271_v34 }
0x1ab3   :  { %6462 = shalt.err (!%p6459_p0)
}
0x1ab4   :  { %s7665_s25 = sld [smem:[#allocation54_spill]] }
0x1aba   :  { %s6463_s14 = scalar_lea.hbm %s7665_s25, 2048 }
0x1abb   :  { %p6464_p1 = scmp.ne.s32.totalorder %s7665_s25, %s6463_s14  ;;  %p6467_p2 = scmp.lt.u32.totalorder %s6463_s14, %s7665_s25 }
0x1abd   :  { %p6469_p3 = pnand %p6467_p2, %p6464_p1 }
0x1abf   :  { %6472 = shalt.err (!%p6469_p3)
}
0x1ac0   :  { %5337 = dma.vmem_to_hbm [thread:$0]  %s5332_s28, 2048, %s7665_s25, [#allocation33], %s6525_s23, %s6525_s23, %s6526_s3   ;;  %v4742_v42 = vrot.slane %v4686_v54, %v4709_v21  ;;  %v4750_v38 = vrot.slane %v4686_v54, %v4717_v22  ;;  %v4746_v43 = vrot.slane %v4686_v54, %v4713_v53  ;;  %v4754_v47 = vrot.slane %v4686_v54, %v4721_v55  ;;  %v4687_v55 = vld [vmem:[#allocation30 + $0x10] sm:$0xf] }
0x1ac1   :  { %v4758_v61 = vrot.slane %v4687_v55, %v6952_v10  ;;  %v4766_v62 = vrot.slane %v4687_v55, %v7536_v46  ;;  %v4762_v63 = vrot.slane %v4687_v55, %v6956_v13  ;;  %v4770_v1 = vrot.slane %v4687_v55, %v7541_v36  ;;  %s6561_s23 = smov [#allocation31]  }
0x1ac2   :  { %s5322_s3 = sshll.u32 %s6561_s23, 4  ;;  %s5323_s3 = int_to_ptr.vmem [resolvable:$true] %s5322_s3 }
0x1ac3   :  { %s6473_s7 = scalar_lea.vmem %s5323_s3, 640  ;;  %p6478_p5 = scmp.lt.s32.totalorder %s5323_s3, %s5323_s3 }
0x1ac4   :  { %p6474_p4 = scmp.ne.s32.totalorder %s5323_s3, %s6473_s7  ;;  %p6479_p6 = scmp.lt.s32.totalorder %s6473_s7, %s6473_s7 }
0x1ac6   :  { %p6480_p7 = por %p6479_p6, %p6478_p5 }
0x1ac8   :  { %p6481_p8 = pnand %p6480_p7, %p6474_p4 }
0x1ae8   :  { %v5071_v48 = vpop.f32.mrb[60].mxu0  ;;  %v5112_v49 = vpop.f32.mrb[48].mxu1 }
0x1ae9   :  { %v5072_v50 = vadd.f32 %v5071_v48, %v4742_v42  ;;  %v5113_v0 = vadd.f32 %v5112_v49, %v4750_v38  ;;  %v5073_v51 = vpop.f32.mrb[61].mxu0  ;;  %v5114_v25 = vpop.f32.mrb[49].mxu1 }
0x1aea   :  { %v5074_v52 = vadd.f32 %v5073_v51, %v4746_v43  ;;  %v5115_v56 = vadd.f32 %v5114_v25, %v4754_v47  ;;  %v5075_v57 = vpop.f32.mrb[62].mxu0  ;;  %v5116_v26 = vpop.f32.mrb[50].mxu1 }
0x1aeb   :  { %v5076_v21 = vpop.f32.mrb[63].mxu0  ;;  %v5117_v58 = vpop.f32.mrb[51].mxu1 }
0x1aec   :  { %v5272_v59 = vcombine.low %v5072_v50, %v5074_v52  ;;  %v5273_v22 = vcombine.low %v5113_v0, %v5115_v56 }
0x1aee   :  { %v5280_v60 = vrot.slane %v5272_v59, %v6966_v28  ;;  %v5287_v53 = vrot.slane %v5273_v22, %v6966_v28 }
0x1af0   :  { %v5288_v9 = vcombine.low %v5280_v60, %v5287_v53 }
0x1af2   :  { %5314 = vst [vmem:[#allocation31 + $0x18] sm:$0xff] %v5288_v9 }
0x1b28   :  { %v5153_v2 = vpop.f32.mrb[64].mxu0  ;;  %v5194_v3 = vpop.f32.mrb[52].mxu1 }
0x1b29   :  { %v5154_v4 = vadd.f32 %v5153_v2, %v4758_v61  ;;  %v5195_v5 = vadd.f32 %v5194_v3, %v4766_v62  ;;  %v5155_v6 = vpop.f32.mrb[65].mxu0  ;;  %v5196_v7 = vpop.f32.mrb[53].mxu1 }
0x1b2a   :  { %v5156_v8 = vadd.f32 %v5155_v6, %v4762_v63  ;;  %v5197_v11 = vadd.f32 %v5196_v7, %v4770_v1  ;;  %v5157_v12 = vpop.f32.mrb[66].mxu0  ;;  %v5198_v14 = vpop.f32.mrb[54].mxu1 }
0x1b2b   :  { %v5158_v15 = vpop.f32.mrb[67].mxu0  ;;  %v5199_v54 = vpop.f32.mrb[55].mxu1 }
0x1b2c   :  { %v5289_v16 = vcombine.low %v5154_v4, %v5156_v8  ;;  %v5290_v10 = vcombine.low %v5195_v5, %v5197_v11 }
0x1b2e   :  { %v5297_v13 = vrot.slane %v5289_v16, %v6966_v28  ;;  %v5304_v46 = vrot.slane %v5290_v10, %v6966_v28 }
0x1b30   :  { %v5305_v36 = vcombine.low %v5297_v13, %v5304_v46 }
0x1b32   :  { %5315 = vst [vmem:[#allocation31 + $0x20] sm:$0xff] %v5305_v36 }
0x1b33   :  { %6484 = shalt.err (!%p6481_p8)
}
0x1b34   :  { %s7666_s22 = sld [smem:[#allocation53_spill]] }
0x1b3a   :  { %s6485_s27 = scalar_lea.hbm %s7666_s22, 640 }
0x1b3b   :  { %p6486_p9 = scmp.ne.s32.totalorder %s7666_s22, %s6485_s27  ;;  %p6489_p10 = scmp.lt.u32.totalorder %s6485_s27, %s7666_s22 }
0x1b3d   :  { %p6491_p11 = pnand %p6489_p10, %p6486_p9 }
0x1b3f   :  { %6494 = shalt.err (!%p6491_p11)
}
0x1b40   :  { %5325 = dma.vmem_to_hbm [thread:$0]  %s5323_s3, 640, %s7666_s22, [#allocation6]  }
0x1b41   :  { %6515 = dma.done.wait [#allocation6], 640  }
0x1b42   :  { %6516 = vsyncadd [#allocation6], 4294966656 }
0x1b43   :  { %6517 = dma.done.wait [#allocation33], 2048  }
0x1b44   :  { %6518 = vsyncadd [#allocation33], 4294965248 }
0x1b45   :  { %5344 = vsyncpa [#allocation5], 1 }
0x1b46   :  { %5345 = vsyncpa [#allocation8], 1 }
0x1b47   :  { %5346 = vsyncpa [#allocation11], 1 }
0x1b48   :  { %5347 = vsyncpa [#allocation14], 1 }
0x1b49   :  { %5348 = vsyncpa [#allocation17], 1 }
0x1b4a   :  { %5349 = vsyncpa [#allocation20], 1 }
0x1b4b   :  { %5350 = vsyncpa [#allocation23], 1 }
0x1b4c   :  { %5351 = vsyncpa [#allocation26], 1 }
0x1b4d   :  { %5352 = vsyncpa [#allocation29], 1 }
0x1b4e   :  { %5353 = vsyncpa [#allocation6], 1 }
0x1b4f   :  { %5354 = vsyncpa [#allocation33], 1 }
0x1b50   :  { %5355 = vsyncmov [#allocation3] }
0x1b53   :  { %s5356_s5 = vpop.sfrf %5355 }
0x1b54   :  { %p5446_p12 = scmp.ne.s32.totalorder %s5356_s5, 0 }
0x1b56   :  { %5360 = shalt.err (%p5446_p12)  }

</bundles_post_ra>
